<compile_context>
chip_gen: v6e
topology: v6e:2x2x1
jax: 0.10.0
libtpu: 0.0.40
codegen_flags: <defaults>
</compile_context>

<pallas_src>
import functools

import numpy as np
import jax
import jax.numpy as jnp
from jax.experimental import pallas as pl
from jax.experimental.pallas import tpu as pltpu


# ----------------------------- in-kernel helpers -----------------------------

def _sigmoid(x):
    return 1.0 / (1.0 + jnp.exp(-x))


def _shift_lanes(x, off):
    """Cyclic shift along the lane (last) axis: result[..., q] = x[..., q + off].

    `off` is a static Python int; positions whose source wraps around (or crosses
    a sample boundary) are always zeroed afterwards by the border masks.
    """
    n = x.shape[-1]
    s = (-off) % n
    if s == 0:
        return x
    return pltpu.roll(x, shift=s, axis=x.ndim - 1)


# --------------------------------- the kernel --------------------------------

def _fuse_kernel(xh_ref, xl_ref,
                 w_fh_ref, b_fh_ref,
                 w_td1_ref, b_td1_ref,
                 w_td2_ref, b_td2_ref,
                 w_bu_ref, b_bu_ref,
                 w_sa_ref,                      # SMEM: flattened (18,) spatial-attn weights
                 w_post9_ref, b_post_ref,       # (9, Cout, Cout) per-tap weights, (Cout, 1) bias
                 mask_ref,                      # (9, 1, L) resident border masks
                 out1_ref, out2_ref,
                 *, H, W, BN, mxu_dtype):
    HW = H * W
    xh = xh_ref[0]                              # (Ch,   L)  pixels (BN samples) on lanes
    xl = xl_ref[0]                              # (Cout, L)
    cout = xl.shape[0]
    L = xl.shape[1]

    # ---- feature_high: 1x1 conv (BN folded) + ReLU ----
    fh = jnp.dot(w_fh_ref[...].astype(mxu_dtype), xh.astype(mxu_dtype),
                 preferred_element_type=jnp.float32) + b_fh_ref[...]
    fh = jnp.maximum(fh, 0.0)                   # (Cout, L)

    # ---- topdown gate: per-sample GAP -> 1x1+ReLU -> 1x1 -> sigmoid ----
    # Per-sample mean via tile-aligned static lane slices (exact; no MXU round trip).
    gaps = [jnp.mean(fh[:, b * HW:(b + 1) * HW], axis=1, keepdims=True) for b in range(BN)]
    gap = gaps[0] if BN == 1 else jnp.concatenate(gaps, axis=1)                    # (Cout, BN)
    # Tiny 1x1s: accepted as pure latency (few MACs; they gate everything downstream).
    t1 = jnp.maximum(jnp.dot(w_td1_ref[...], gap, preferred_element_type=jnp.float32)
                     + b_td1_ref[...], 0.0)                                        # (Bc, BN)
    td = _sigmoid(jnp.dot(w_td2_ref[...], t1, preferred_element_type=jnp.float32)
                  + b_td2_ref[...])                                                # (Cout, BN)
    # Broadcast each per-sample gate back over its HW lane segment (exact).
    cols = [jnp.broadcast_to(td[:, b:b + 1], (cout, HW)) for b in range(BN)]
    td_full = cols[0] if BN == 1 else jnp.concatenate(cols, axis=1)                # (Cout, L)

    xlw = xl * td_full                          # == xs1 (the 2.0 is folded into w_post9)

    # ---- shared 3x3 post conv (BN folded) as a 9-tap accumulate ----
    def post_conv(x):
        acc = jnp.zeros((cout, L), jnp.float32)
        for k in range(9):
            dy, dx = k // 3 - 1, k % 3 - 1
            off = dy * W + dx
            tap = x if off == 0 else _shift_lanes(x, off)
            if not (dy == 0 and dx == 0):
                tap = tap * mask_ref[k]                                            # (1, L) mask
            acc = acc + jnp.dot(w_post9_ref[k].astype(mxu_dtype), tap.astype(mxu_dtype),
                                preferred_element_type=jnp.float32)
        return jnp.maximum(acc + b_post_ref[...], 0.0)

    # out1 branch first: independent of the spatial-attention chain, so its MXU
    # work can overlap the bottomup VPU/XLU work below.
    out1_ref[0] = post_conv(xlw).astype(out1_ref.dtype)

    # ---- bottomup: 1x1+ReLU, spatial attention (3x3, 2->1, no bias), sigmoid ----
    bu = jnp.maximum(jnp.dot(w_bu_ref[...].astype(mxu_dtype), xlw.astype(mxu_dtype),
                             preferred_element_type=jnp.float32) + b_bu_ref[...], 0.0)   # (Bc, L)
    amx = jnp.concatenate([jnp.mean(bu, axis=0, keepdims=True),
                           jnp.max(bu, axis=0, keepdims=True)], axis=0)                  # (2, L)
    sa = jnp.zeros((1, L), jnp.float32)
    for k in range(9):
        dy, dx = k // 3 - 1, k % 3 - 1
        off = dy * W + dx
        r = amx if off == 0 else _shift_lanes(amx, off)             # one roll per tap
        tap = r[0:1, :] * w_sa_ref[2 * k] + r[1:2, :] * w_sa_ref[2 * k + 1]
        if not (dy == 0 and dx == 0):
            tap = tap * mask_ref[k]
        sa = sa + tap
    bu_wei = _sigmoid(sa)                                                                # (1, L)

    out2_ref[0] = post_conv(fh * bu_wei).astype(out2_ref.dtype)


# --------------------------------- wrapper ------------------------------------

def asym_bi_cha_fuse_reduce(xh, xl, params, *, mxu_dtype=jnp.float32, lane_target=1024):
    """xh: (N, Ch_high, H, W), xl: (N, C_out, H, W) — PyTorch NCHW layout."""
    (w_fh, b_fh, w_td1, b_td1, w_td2, b_td2,
     w_bu, b_bu, w_sa, w_post, b_post) = params
    N, Ch, H, W = xh.shape
    Cout = xl.shape[1]
    Bc = w_td1.shape[1]
    HW = H * W
    assert xl.shape == (N, Cout, H, W)
    # Module asserts in_low_channels == out_channels; the per-tap reshape below relies on it.
    assert w_post.shape == (3, 3, Cout, Cout), "post conv must be Cout -> Cout"
    assert w_sa.shape == (3, 3, 2, 1)

    # ---- fold BN samples onto lanes per grid step (L = bn * HW lanes) ----
    bn = max(1, min(N, lane_target // HW))
    while N % bn:
        bn -= 1
    G = N // bn
    L = bn * HW

    # Weights transposed to (out, in) so every kernel matmul is W @ X with the
    # lane-dense spatial axis as the matmul N dimension.
    w_fh_t = w_fh.T                                             # (Cout, Ch)
    w_td1_t = w_td1.T                                           # (Bc, Cout)
    w_td2_t = w_td2.T                                           # (Cout, Bc)
    w_bu_t = w_bu.T                                             # (Bc, Cout)
    # 3x3 post conv as 9 per-tap (Cout_out, Cout_in) matrices; 2.0 (xs1/xs2) folded in.
    w_post9 = 2.0 * jnp.transpose(w_post.reshape(9, Cout, Cout), (0, 2, 1))
    w_sa_flat = w_sa.reshape(-1).astype(jnp.float32)            # (18,) -> SMEM scalars

    b_fh_c = b_fh.reshape(Cout, 1)
    b_td1_c = b_td1.reshape(Bc, 1)
    b_td2_c = b_td2.reshape(Cout, 1)
    b_bu_c = b_bu.reshape(Bc, 1)
    b_post_c = b_post.reshape(Cout, 1)

    # ---- grid-invariant 3x3 border masks, resident in VMEM ----
    q = np.arange(L)
    p = q % HW
    yy, xx = p // W, p % W
    mask_np = np.zeros((9, 1, L), np.float32)
    for k in range(9):
        dy, dx = k // 3 - 1, k % 3 - 1
        mask_np[k, 0] = ((yy + dy >= 0) & (yy + dy < H) &
                         (xx + dx >= 0) & (xx + dx < W)).astype(np.float32)
    mask = jnp.asarray(mask_np)

    # ---- lane-fold the batch (wrapper-side layout plumbing, free view for bn=1) ----
    xh_f = xh.reshape(G, bn, Ch, HW).transpose(0, 2, 1, 3).reshape(G, Ch, L)
    xl_f = xl.reshape(G, bn, Cout, HW).transpose(0, 2, 1, 3).reshape(G, Cout, L)

    def const_spec(a):
        zeros = (0,) * a.ndim
        return pl.BlockSpec(a.shape, lambda g, _z=zeros: _z)

    in_specs = [
        pl.BlockSpec((1, Ch, L), lambda g: (g, 0, 0)),
        pl.BlockSpec((1, Cout, L), lambda g: (g, 0, 0)),
        const_spec(w_fh_t), const_spec(b_fh_c),
        const_spec(w_td1_t), const_spec(b_td1_c),
        const_spec(w_td2_t), const_spec(b_td2_c),
        const_spec(w_bu_t), const_spec(b_bu_c),
        pl.BlockSpec(memory_space=pltpu.MemorySpace.SMEM),
        const_spec(w_post9), const_spec(b_post_c),
        const_spec(mask),
    ]
    out_specs = (pl.BlockSpec((1, Cout, L), lambda g: (g, 0, 0)),
                 pl.BlockSpec((1, Cout, L), lambda g: (g, 0, 0)))
    out_shape = (jax.ShapeDtypeStruct((G, Cout, L), jnp.float32),
                 jax.ShapeDtypeStruct((G, Cout, L), jnp.float32))

    fn = pl.pallas_call(
        functools.partial(_fuse_kernel, H=H, W=W, BN=bn, mxu_dtype=mxu_dtype),
        grid=(G,),
        in_specs=in_specs,
        out_specs=out_specs,
        out_shape=out_shape,
        compiler_params=pltpu.CompilerParams(
            dimension_semantics=("parallel",)),     # groups independent; shards over v7x TCs
    )
    out1, out2 = fn(xh_f, xl_f, w_fh_t, b_fh_c, w_td1_t, b_td1_c, w_td2_t, b_td2_c,
                    w_bu_t, b_bu_c, w_sa_flat, w_post9, b_post_c, mask)

    def unfold(o):
        return o.reshape(G, Cout, bn, HW).transpose(0, 2, 1, 3).reshape(N, Cout, H, W)

    return unfold(out1), unfold(out2)


# ------------------------- deterministic parameter init -----------------------

def _fold_bn(w, b, gamma, beta, mean, var, eps=1e-5):
    """Fold eval-mode BatchNorm (per out-channel) into the preceding conv."""
    scale = gamma / jnp.sqrt(var + eps)
    return w * scale, (b - mean) * scale + beta


def init_params(key, ch_high, c_out, r):
    bneck = c_out // r
    keys = jax.random.split(key, 32)
    it = iter(keys)

    def nrm(shape, scale):
        return scale * jax.random.normal(next(it), shape, dtype=jnp.float32)

    def bn(c):
        gamma = 1.0 + 0.1 * jax.random.normal(next(it), (c,), dtype=jnp.float32)
        beta = 0.1 * jax.random.normal(next(it), (c,), dtype=jnp.float32)
        mean = 0.1 * jax.random.normal(next(it), (c,), dtype=jnp.float32)
        var = 1.0 + 0.2 * jax.random.uniform(next(it), (c,), dtype=jnp.float32)
        return gamma, beta, mean, var

    # feature_high: 1x1 conv (ch_high -> c_out) + BN
    w_fh = nrm((ch_high, c_out), 1.0 / np.sqrt(ch_high))
    b_fh = nrm((c_out,), 0.1)
    w_fh, b_fh = _fold_bn(w_fh, b_fh, *bn(c_out))

    # topdown: 1x1 (c_out->bneck)+BN, 1x1 (bneck->c_out)+BN
    w_td1 = nrm((c_out, bneck), 1.0 / np.sqrt(c_out))
    b_td1 = nrm((bneck,), 0.1)
    w_td1, b_td1 = _fold_bn(w_td1, b_td1, *bn(bneck))
    w_td2 = nrm((bneck, c_out), 1.0 / np.sqrt(bneck))
    b_td2 = nrm((c_out,), 0.1)
    w_td2, b_td2 = _fold_bn(w_td2, b_td2, *bn(c_out))

    # bottomup: 1x1 (c_out->bneck)+BN, SpatialAttention 3x3 conv (2->1, no bias)
    w_bu = nrm((c_out, bneck), 1.0 / np.sqrt(c_out))
    b_bu = nrm((bneck,), 0.1)
    w_bu, b_bu = _fold_bn(w_bu, b_bu, *bn(bneck))
    w_sa = nrm((3, 3, 2, 1), 1.0 / np.sqrt(18.0))            # HWIO, in-chan 0=avg, 1=max

    # post: 3x3 conv (c_out -> c_out) + BN
    w_post = nrm((3, 3, c_out, c_out), 1.0 / np.sqrt(9.0 * c_out))   # HWIO
    b_post = nrm((c_out,), 0.1)
    w_post, b_post = _fold_bn(w_post, b_post, *bn(c_out))

    return (w_fh, b_fh, w_td1, b_td1, w_td2, b_td2, w_bu, b_bu, w_sa, w_post, b_post)


# ------------------------------ pure-JAX reference ----------------------------

def _reference(xh, xl, params):
    (w_fh, b_fh, w_td1, b_td1, w_td2, b_td2,
     w_bu, b_bu, w_sa, w_post, b_post) = params
    P = jax.lax.Precision.HIGHEST

    def c1(x, w, b):
        return jnp.einsum('nchw,cd->ndhw', x, w, precision=P) + b[None, :, None, None]

    fh = jnp.maximum(c1(xh, w_fh, b_fh), 0.0)
    gap = jnp.mean(fh, axis=(2, 3), keepdims=True)
    t1 = jnp.maximum(c1(gap, w_td1, b_td1), 0.0)
    td = jax.nn.sigmoid(c1(t1, w_td2, b_td2))
    xlw = xl * td
    bu = jnp.maximum(c1(xlw, w_bu, b_bu), 0.0)
    avg = jnp.mean(bu, axis=1, keepdims=True)
    mx = jnp.max(bu, axis=1, keepdims=True)
    cat = jnp.concatenate([avg, mx], axis=1)
    sa = jax.lax.conv_general_dilated(
        cat, w_sa, (1, 1), ((1, 1), (1, 1)),
        dimension_numbers=('NCHW', 'HWIO', 'NCHW'), precision=P)
    bu_wei = jax.nn.sigmoid(sa)

    def post(x):
        y = jax.lax.conv_general_dilated(
            x, w_post, (1, 1), ((1, 1), (1, 1)),
            dimension_numbers=('NCHW', 'HWIO', 'NCHW'), precision=P)
        return jnp.maximum(y + b_post[None, :, None, None], 0.0)

    return post(2.0 * xl * td), post(2.0 * fh * bu_wei)


# ----------------------------------- main --------------------------------------

if __name__ == "__main__":
    key = jax.random.PRNGKey(0)
    N, H, W = 2, 16, 16
    CH_HIGH, C_OUT, R = 8, 16, 4          # in_low_channels == out_channels == 16, bottleneck = 4

    k_xh, k_xl, k_p = jax.random.split(key, 3)
    xh = jax.random.normal(k_xh, (N, CH_HIGH, H, W), dtype=jnp.float32)   # NCHW like PyTorch
    xl = jax.random.normal(k_xl, (N, C_OUT, H, W), dtype=jnp.float32)
    params = init_params(k_p, CH_HIGH, C_OUT, R)

    out1, out2 = asym_bi_cha_fuse_reduce(xh, xl, params)
    jax.block_until_ready((out1, out2))

    r1, r2 = _reference(xh, xl, params)
    np.testing.assert_allclose(np.asarray(out1), np.asarray(r1), rtol=2e-3, atol=2e-3)
    np.testing.assert_allclose(np.asarray(out2), np.asarray(r2), rtol=2e-3, atol=2e-3)

    print("KERNEL_OK")
</pallas_src>

<mosaic_0001>
module attributes {stable_mosaic.version = 11 : i64} {
  func.func @_fuse_kernel(%arg0: i32, %arg1: memref<1x8x512xf32, #tpu.memory_space<vmem>>, %arg2: memref<1x16x512xf32, #tpu.memory_space<vmem>>, %arg3: memref<16x8xf32, #tpu.memory_space<vmem>>, %arg4: memref<16x1xf32, #tpu.memory_space<vmem>>, %arg5: memref<4x16xf32, #tpu.memory_space<vmem>>, %arg6: memref<4x1xf32, #tpu.memory_space<vmem>>, %arg7: memref<16x4xf32, #tpu.memory_space<vmem>>, %arg8: memref<16x1xf32, #tpu.memory_space<vmem>>, %arg9: memref<4x16xf32, #tpu.memory_space<vmem>>, %arg10: memref<4x1xf32, #tpu.memory_space<vmem>>, %arg11: memref<18xf32, #tpu.memory_space<smem>>, %arg12: memref<9x16x16xf32, #tpu.memory_space<vmem>>, %arg13: memref<16x1xf32, #tpu.memory_space<vmem>>, %arg14: memref<9x1x512xf32, #tpu.memory_space<vmem>>, %arg15: memref<1x16x512xf32, #tpu.memory_space<vmem>>, %arg16: memref<1x16x512xf32, #tpu.memory_space<vmem>>) attributes {dimension_semantics = [#tpu.dimension_semantics<parallel>], iteration_bounds = array<i64: 1>, scalar_prefetch = 0 : i64, scratch_operands = 0 : i64, tpu.core_type = #tpu.core_type<tc>, window_params = [{transform_indices = @transform_0, window_bounds = array<i64: 1, 8, 512>}, {transform_indices = @transform_1, window_bounds = array<i64: 1, 16, 512>}, {pipeline_mode = #tpu.pipeline_mode<synchronous>, transform_indices = @transform_2, window_bounds = array<i64: 16, 8>}, {pipeline_mode = #tpu.pipeline_mode<synchronous>, transform_indices = @transform_3, window_bounds = array<i64: 16, 1>}, {pipeline_mode = #tpu.pipeline_mode<synchronous>, transform_indices = @transform_4, window_bounds = array<i64: 4, 16>}, {pipeline_mode = #tpu.pipeline_mode<synchronous>, transform_indices = @transform_5, window_bounds = array<i64: 4, 1>}, {pipeline_mode = #tpu.pipeline_mode<synchronous>, transform_indices = @transform_6, window_bounds = array<i64: 16, 4>}, {pipeline_mode = #tpu.pipeline_mode<synchronous>, transform_indices = @transform_7, window_bounds = array<i64: 16, 1>}, {pipeline_mode = #tpu.pipeline_mode<synchronous>, transform_indices = @transform_8, window_bounds = array<i64: 4, 16>}, {pipeline_mode = #tpu.pipeline_mode<synchronous>, transform_indices = @transform_9, window_bounds = array<i64: 4, 1>}, {transform_indices = @transform_10, window_bounds = array<i64: 18>}, {pipeline_mode = #tpu.pipeline_mode<synchronous>, transform_indices = @transform_11, window_bounds = array<i64: 9, 16, 16>}, {pipeline_mode = #tpu.pipeline_mode<synchronous>, transform_indices = @transform_12, window_bounds = array<i64: 16, 1>}, {pipeline_mode = #tpu.pipeline_mode<synchronous>, transform_indices = @transform_13, window_bounds = array<i64: 9, 1, 512>}, {transform_indices = @transform_14, window_bounds = array<i64: 1, 16, 512>}, {transform_indices = @transform_15, window_bounds = array<i64: 1, 16, 512>}]} {
    %c0 = arith.constant 0 : index
    %c0_0 = arith.constant 0 : index
    %c0_1 = arith.constant 0 : index
    %0 = vector.load %arg1[%c0, %c0_0, %c0_1] : memref<1x8x512xf32, #tpu.memory_space<vmem>>, vector<1x8x512xf32>
    %1 = vector.shape_cast %0 : vector<1x8x512xf32> to vector<8x512xf32>
    %c0_2 = arith.constant 0 : index
    %c0_3 = arith.constant 0 : index
    %c0_4 = arith.constant 0 : index
    %2 = vector.load %arg2[%c0_2, %c0_3, %c0_4] : memref<1x16x512xf32, #tpu.memory_space<vmem>>, vector<1x16x512xf32>
    %3 = vector.shape_cast %2 : vector<1x16x512xf32> to vector<16x512xf32>
    %c0_5 = arith.constant 0 : index
    %c0_6 = arith.constant 0 : index
    %4 = vector.load %arg3[%c0_5, %c0_6] : memref<16x8xf32, #tpu.memory_space<vmem>>, vector<16x8xf32>
    %cst = arith.constant dense<0.000000e+00> : vector<16x512xf32>
    %5 = tpu.matmul %4, %1, %cst {dimension_numbers = #tpu.dot_dimension_numbers<[1], [0], [0], [1], [0, 0, 1, 1], [], []>} : vector<16x8xf32>, vector<8x512xf32>, vector<16x512xf32> -> vector<16x512xf32>
    %c0_7 = arith.constant 0 : index
    %c0_8 = arith.constant 0 : index
    %6 = vector.load %arg4[%c0_7, %c0_8] : memref<16x1xf32, #tpu.memory_space<vmem>>, vector<16x1xf32>
    %7 = vector.broadcast %6 : vector<16x1xf32> to vector<16x512xf32>
    %8 = arith.addf %5, %7 : vector<16x512xf32>
    %cst_9 = arith.constant 0.000000e+00 : f32
    %9 = vector.broadcast %cst_9 : f32 to vector<16x512xf32>
    %10 = arith.maximumf %8, %9 : vector<16x512xf32>
    %11 = vector.extract_strided_slice %10 {offsets = [0, 0], sizes = [16, 256], strides = [1, 1]} : vector<16x512xf32> to vector<16x256xf32>
    %cst_10 = arith.constant dense<0.000000e+00> : vector<16xf32>
    %12 = vector.multi_reduction <add>, %11, %cst_10 [1] : vector<16x256xf32> to vector<16xf32>
    %13 = vector.shape_cast %12 : vector<16xf32> to vector<16x1xf32>
    %cst_11 = arith.constant 2.560000e+02 : f32
    %14 = vector.broadcast %cst_11 : f32 to vector<16x1xf32>
    %15 = arith.divf %13, %14 : vector<16x1xf32>
    %16 = vector.extract_strided_slice %10 {offsets = [0, 256], sizes = [16, 256], strides = [1, 1]} : vector<16x512xf32> to vector<16x256xf32>
    %cst_12 = arith.constant dense<0.000000e+00> : vector<16xf32>
    %17 = vector.multi_reduction <add>, %16, %cst_12 [1] : vector<16x256xf32> to vector<16xf32>
    %18 = vector.shape_cast %17 : vector<16xf32> to vector<16x1xf32>
    %cst_13 = arith.constant 2.560000e+02 : f32
    %19 = vector.broadcast %cst_13 : f32 to vector<16x1xf32>
    %20 = arith.divf %18, %19 : vector<16x1xf32>
    %21 = tpu.concatenate %15, %20 in 1 : vector<16x1xf32>, vector<16x1xf32> -> vector<16x2xf32>
    %c0_14 = arith.constant 0 : index
    %c0_15 = arith.constant 0 : index
    %22 = vector.load %arg5[%c0_14, %c0_15] : memref<4x16xf32, #tpu.memory_space<vmem>>, vector<4x16xf32>
    %cst_16 = arith.constant dense<0.000000e+00> : vector<4x2xf32>
    %23 = tpu.matmul %22, %21, %cst_16 {dimension_numbers = #tpu.dot_dimension_numbers<[1], [0], [0], [1], [0, 0, 1, 1], [], []>} : vector<4x16xf32>, vector<16x2xf32>, vector<4x2xf32> -> vector<4x2xf32>
    %c0_17 = arith.constant 0 : index
    %c0_18 = arith.constant 0 : index
    %24 = vector.load %arg6[%c0_17, %c0_18] : memref<4x1xf32, #tpu.memory_space<vmem>>, vector<4x1xf32>
    %25 = vector.broadcast %24 : vector<4x1xf32> to vector<4x2xf32>
    %26 = arith.addf %23, %25 : vector<4x2xf32>
    %cst_19 = arith.constant 0.000000e+00 : f32
    %27 = vector.broadcast %cst_19 : f32 to vector<4x2xf32>
    %28 = arith.maximumf %26, %27 : vector<4x2xf32>
    %c0_20 = arith.constant 0 : index
    %c0_21 = arith.constant 0 : index
    %29 = vector.load %arg7[%c0_20, %c0_21] : memref<16x4xf32, #tpu.memory_space<vmem>>, vector<16x4xf32>
    %cst_22 = arith.constant dense<0.000000e+00> : vector<16x2xf32>
    %30 = tpu.matmul %29, %28, %cst_22 {dimension_numbers = #tpu.dot_dimension_numbers<[1], [0], [0], [1], [0, 0, 1, 1], [], []>} : vector<16x4xf32>, vector<4x2xf32>, vector<16x2xf32> -> vector<16x2xf32>
    %c0_23 = arith.constant 0 : index
    %c0_24 = arith.constant 0 : index
    %31 = vector.load %arg8[%c0_23, %c0_24] : memref<16x1xf32, #tpu.memory_space<vmem>>, vector<16x1xf32>
    %32 = vector.broadcast %31 : vector<16x1xf32> to vector<16x2xf32>
    %33 = arith.addf %30, %32 : vector<16x2xf32>
    %cst_25 = arith.constant 0.000000e+00 : f32
    %34 = vector.broadcast %cst_25 : f32 to vector<16x2xf32>
    %35 = arith.subf %34, %33 : vector<16x2xf32>
    %36 = math.exp %35 : vector<16x2xf32>
    %cst_26 = arith.constant 1.000000e+00 : f32
    %37 = vector.broadcast %cst_26 : f32 to vector<16x2xf32>
    %38 = arith.addf %37, %36 : vector<16x2xf32>
    %cst_27 = arith.constant 1.000000e+00 : f32
    %39 = vector.broadcast %cst_27 : f32 to vector<16x2xf32>
    %40 = arith.divf %39, %38 : vector<16x2xf32>
    %41 = vector.extract_strided_slice %40 {offsets = [0, 0], sizes = [16, 1], strides = [1, 1]} : vector<16x2xf32> to vector<16x1xf32>
    %42 = vector.shape_cast %41 : vector<16x1xf32> to vector<16x1xf32>
    %43 = vector.broadcast %42 : vector<16x1xf32> to vector<16x256xf32>
    %44 = vector.extract_strided_slice %40 {offsets = [0, 1], sizes = [16, 1], strides = [1, 1]} : vector<16x2xf32> to vector<16x1xf32>
    %45 = vector.shape_cast %44 : vector<16x1xf32> to vector<16x1xf32>
    %46 = vector.broadcast %45 : vector<16x1xf32> to vector<16x256xf32>
    %47 = tpu.concatenate %43, %46 in 1 : vector<16x256xf32>, vector<16x256xf32> -> vector<16x512xf32>
    %48 = arith.mulf %3, %47 : vector<16x512xf32>
    %cst_28 = arith.constant 0.000000e+00 : f32
    %49 = vector.broadcast %cst_28 : f32 to vector<16x512xf32>
    %c17_i32 = arith.constant 17 : i32
    %50 = tpu.dynamic_rotate %48 by %c17_i32 dim 1 : vector<16x512xf32>, i32 -> vector<16x512xf32>
    %c0_29 = arith.constant 0 : index
    %c0_30 = arith.constant 0 : index
    %c0_31 = arith.constant 0 : index
    %51 = vector.load %arg14[%c0_29, %c0_30, %c0_31] : memref<9x1x512xf32, #tpu.memory_space<vmem>>, vector<1x1x512xf32>
    %52 = vector.shape_cast %51 : vector<1x1x512xf32> to vector<1x512xf32>
    %53 = vector.broadcast %52 : vector<1x512xf32> to vector<16x512xf32>
    %54 = arith.mulf %50, %53 : vector<16x512xf32>
    %c0_32 = arith.constant 0 : index
    %c0_33 = arith.constant 0 : index
    %c0_34 = arith.constant 0 : index
    %55 = vector.load %arg12[%c0_32, %c0_33, %c0_34] : memref<9x16x16xf32, #tpu.memory_space<vmem>>, vector<1x16x16xf32>
    %56 = vector.shape_cast %55 : vector<1x16x16xf32> to vector<16x16xf32>
    %cst_35 = arith.constant dense<0.000000e+00> : vector<16x512xf32>
    %57 = tpu.matmul %56, %54, %cst_35 {dimension_numbers = #tpu.dot_dimension_numbers<[1], [0], [0], [1], [0, 0, 1, 1], [], []>} : vector<16x16xf32>, vector<16x512xf32>, vector<16x512xf32> -> vector<16x512xf32>
    %58 = arith.addf %49, %57 : vector<16x512xf32>
    %c16_i32 = arith.constant 16 : i32
    %59 = tpu.dynamic_rotate %48 by %c16_i32 dim 1 : vector<16x512xf32>, i32 -> vector<16x512xf32>
    %c1 = arith.constant 1 : index
    %c0_36 = arith.constant 0 : index
    %c0_37 = arith.constant 0 : index
    %60 = vector.load %arg14[%c1, %c0_36, %c0_37] : memref<9x1x512xf32, #tpu.memory_space<vmem>>, vector<1x1x512xf32>
    %61 = vector.shape_cast %60 : vector<1x1x512xf32> to vector<1x512xf32>
    %62 = vector.broadcast %61 : vector<1x512xf32> to vector<16x512xf32>
    %63 = arith.mulf %59, %62 : vector<16x512xf32>
    %c1_38 = arith.constant 1 : index
    %c0_39 = arith.constant 0 : index
    %c0_40 = arith.constant 0 : index
    %64 = vector.load %arg12[%c1_38, %c0_39, %c0_40] : memref<9x16x16xf32, #tpu.memory_space<vmem>>, vector<1x16x16xf32>
    %65 = vector.shape_cast %64 : vector<1x16x16xf32> to vector<16x16xf32>
    %cst_41 = arith.constant dense<0.000000e+00> : vector<16x512xf32>
    %66 = tpu.matmul %65, %63, %cst_41 {dimension_numbers = #tpu.dot_dimension_numbers<[1], [0], [0], [1], [0, 0, 1, 1], [], []>} : vector<16x16xf32>, vector<16x512xf32>, vector<16x512xf32> -> vector<16x512xf32>
    %67 = arith.addf %58, %66 : vector<16x512xf32>
    %c15_i32 = arith.constant 15 : i32
    %68 = tpu.dynamic_rotate %48 by %c15_i32 dim 1 : vector<16x512xf32>, i32 -> vector<16x512xf32>
    %c2 = arith.constant 2 : index
    %c0_42 = arith.constant 0 : index
    %c0_43 = arith.constant 0 : index
    %69 = vector.load %arg14[%c2, %c0_42, %c0_43] : memref<9x1x512xf32, #tpu.memory_space<vmem>>, vector<1x1x512xf32>
    %70 = vector.shape_cast %69 : vector<1x1x512xf32> to vector<1x512xf32>
    %71 = vector.broadcast %70 : vector<1x512xf32> to vector<16x512xf32>
    %72 = arith.mulf %68, %71 : vector<16x512xf32>
    %c2_44 = arith.constant 2 : index
    %c0_45 = arith.constant 0 : index
    %c0_46 = arith.constant 0 : index
    %73 = vector.load %arg12[%c2_44, %c0_45, %c0_46] : memref<9x16x16xf32, #tpu.memory_space<vmem>>, vector<1x16x16xf32>
    %74 = vector.shape_cast %73 : vector<1x16x16xf32> to vector<16x16xf32>
    %cst_47 = arith.constant dense<0.000000e+00> : vector<16x512xf32>
    %75 = tpu.matmul %74, %72, %cst_47 {dimension_numbers = #tpu.dot_dimension_numbers<[1], [0], [0], [1], [0, 0, 1, 1], [], []>} : vector<16x16xf32>, vector<16x512xf32>, vector<16x512xf32> -> vector<16x512xf32>
    %76 = arith.addf %67, %75 : vector<16x512xf32>
    %c1_i32 = arith.constant 1 : i32
    %77 = tpu.dynamic_rotate %48 by %c1_i32 dim 1 : vector<16x512xf32>, i32 -> vector<16x512xf32>
    %c3 = arith.constant 3 : index
    %c0_48 = arith.constant 0 : index
    %c0_49 = arith.constant 0 : index
    %78 = vector.load %arg14[%c3, %c0_48, %c0_49] : memref<9x1x512xf32, #tpu.memory_space<vmem>>, vector<1x1x512xf32>
    %79 = vector.shape_cast %78 : vector<1x1x512xf32> to vector<1x512xf32>
    %80 = vector.broadcast %79 : vector<1x512xf32> to vector<16x512xf32>
    %81 = arith.mulf %77, %80 : vector<16x512xf32>
    %c3_50 = arith.constant 3 : index
    %c0_51 = arith.constant 0 : index
    %c0_52 = arith.constant 0 : index
    %82 = vector.load %arg12[%c3_50, %c0_51, %c0_52] : memref<9x16x16xf32, #tpu.memory_space<vmem>>, vector<1x16x16xf32>
    %83 = vector.shape_cast %82 : vector<1x16x16xf32> to vector<16x16xf32>
    %cst_53 = arith.constant dense<0.000000e+00> : vector<16x512xf32>
    %84 = tpu.matmul %83, %81, %cst_53 {dimension_numbers = #tpu.dot_dimension_numbers<[1], [0], [0], [1], [0, 0, 1, 1], [], []>} : vector<16x16xf32>, vector<16x512xf32>, vector<16x512xf32> -> vector<16x512xf32>
    %85 = arith.addf %76, %84 : vector<16x512xf32>
    %c4 = arith.constant 4 : index
    %c0_54 = arith.constant 0 : index
    %c0_55 = arith.constant 0 : index
    %86 = vector.load %arg12[%c4, %c0_54, %c0_55] : memref<9x16x16xf32, #tpu.memory_space<vmem>>, vector<1x16x16xf32>
    %87 = vector.shape_cast %86 : vector<1x16x16xf32> to vector<16x16xf32>
    %cst_56 = arith.constant dense<0.000000e+00> : vector<16x512xf32>
    %88 = tpu.matmul %87, %48, %cst_56 {dimension_numbers = #tpu.dot_dimension_numbers<[1], [0], [0], [1], [0, 0, 1, 1], [], []>} : vector<16x16xf32>, vector<16x512xf32>, vector<16x512xf32> -> vector<16x512xf32>
    %89 = arith.addf %85, %88 : vector<16x512xf32>
    %c511_i32 = arith.constant 511 : i32
    %90 = tpu.dynamic_rotate %48 by %c511_i32 dim 1 : vector<16x512xf32>, i32 -> vector<16x512xf32>
    %c5 = arith.constant 5 : index
    %c0_57 = arith.constant 0 : index
    %c0_58 = arith.constant 0 : index
    %91 = vector.load %arg14[%c5, %c0_57, %c0_58] : memref<9x1x512xf32, #tpu.memory_space<vmem>>, vector<1x1x512xf32>
    %92 = vector.shape_cast %91 : vector<1x1x512xf32> to vector<1x512xf32>
    %93 = vector.broadcast %92 : vector<1x512xf32> to vector<16x512xf32>
    %94 = arith.mulf %90, %93 : vector<16x512xf32>
    %c5_59 = arith.constant 5 : index
    %c0_60 = arith.constant 0 : index
    %c0_61 = arith.constant 0 : index
    %95 = vector.load %arg12[%c5_59, %c0_60, %c0_61] : memref<9x16x16xf32, #tpu.memory_space<vmem>>, vector<1x16x16xf32>
    %96 = vector.shape_cast %95 : vector<1x16x16xf32> to vector<16x16xf32>
    %cst_62 = arith.constant dense<0.000000e+00> : vector<16x512xf32>
    %97 = tpu.matmul %96, %94, %cst_62 {dimension_numbers = #tpu.dot_dimension_numbers<[1], [0], [0], [1], [0, 0, 1, 1], [], []>} : vector<16x16xf32>, vector<16x512xf32>, vector<16x512xf32> -> vector<16x512xf32>
    %98 = arith.addf %89, %97 : vector<16x512xf32>
    %c497_i32 = arith.constant 497 : i32
    %99 = tpu.dynamic_rotate %48 by %c497_i32 dim 1 : vector<16x512xf32>, i32 -> vector<16x512xf32>
    %c6 = arith.constant 6 : index
    %c0_63 = arith.constant 0 : index
    %c0_64 = arith.constant 0 : index
    %100 = vector.load %arg14[%c6, %c0_63, %c0_64] : memref<9x1x512xf32, #tpu.memory_space<vmem>>, vector<1x1x512xf32>
    %101 = vector.shape_cast %100 : vector<1x1x512xf32> to vector<1x512xf32>
    %102 = vector.broadcast %101 : vector<1x512xf32> to vector<16x512xf32>
    %103 = arith.mulf %99, %102 : vector<16x512xf32>
    %c6_65 = arith.constant 6 : index
    %c0_66 = arith.constant 0 : index
    %c0_67 = arith.constant 0 : index
    %104 = vector.load %arg12[%c6_65, %c0_66, %c0_67] : memref<9x16x16xf32, #tpu.memory_space<vmem>>, vector<1x16x16xf32>
    %105 = vector.shape_cast %104 : vector<1x16x16xf32> to vector<16x16xf32>
    %cst_68 = arith.constant dense<0.000000e+00> : vector<16x512xf32>
    %106 = tpu.matmul %105, %103, %cst_68 {dimension_numbers = #tpu.dot_dimension_numbers<[1], [0], [0], [1], [0, 0, 1, 1], [], []>} : vector<16x16xf32>, vector<16x512xf32>, vector<16x512xf32> -> vector<16x512xf32>
    %107 = arith.addf %98, %106 : vector<16x512xf32>
    %c496_i32 = arith.constant 496 : i32
    %108 = tpu.dynamic_rotate %48 by %c496_i32 dim 1 : vector<16x512xf32>, i32 -> vector<16x512xf32>
    %c7 = arith.constant 7 : index
    %c0_69 = arith.constant 0 : index
    %c0_70 = arith.constant 0 : index
    %109 = vector.load %arg14[%c7, %c0_69, %c0_70] : memref<9x1x512xf32, #tpu.memory_space<vmem>>, vector<1x1x512xf32>
    %110 = vector.shape_cast %109 : vector<1x1x512xf32> to vector<1x512xf32>
    %111 = vector.broadcast %110 : vector<1x512xf32> to vector<16x512xf32>
    %112 = arith.mulf %108, %111 : vector<16x512xf32>
    %c7_71 = arith.constant 7 : index
    %c0_72 = arith.constant 0 : index
    %c0_73 = arith.constant 0 : index
    %113 = vector.load %arg12[%c7_71, %c0_72, %c0_73] : memref<9x16x16xf32, #tpu.memory_space<vmem>>, vector<1x16x16xf32>
    %114 = vector.shape_cast %113 : vector<1x16x16xf32> to vector<16x16xf32>
    %cst_74 = arith.constant dense<0.000000e+00> : vector<16x512xf32>
    %115 = tpu.matmul %114, %112, %cst_74 {dimension_numbers = #tpu.dot_dimension_numbers<[1], [0], [0], [1], [0, 0, 1, 1], [], []>} : vector<16x16xf32>, vector<16x512xf32>, vector<16x512xf32> -> vector<16x512xf32>
    %116 = arith.addf %107, %115 : vector<16x512xf32>
    %c495_i32 = arith.constant 495 : i32
    %117 = tpu.dynamic_rotate %48 by %c495_i32 dim 1 : vector<16x512xf32>, i32 -> vector<16x512xf32>
    %c8 = arith.constant 8 : index
    %c0_75 = arith.constant 0 : index
    %c0_76 = arith.constant 0 : index
    %118 = vector.load %arg14[%c8, %c0_75, %c0_76] : memref<9x1x512xf32, #tpu.memory_space<vmem>>, vector<1x1x512xf32>
    %119 = vector.shape_cast %118 : vector<1x1x512xf32> to vector<1x512xf32>
    %120 = vector.broadcast %119 : vector<1x512xf32> to vector<16x512xf32>
    %121 = arith.mulf %117, %120 : vector<16x512xf32>
    %c8_77 = arith.constant 8 : index
    %c0_78 = arith.constant 0 : index
    %c0_79 = arith.constant 0 : index
    %122 = vector.load %arg12[%c8_77, %c0_78, %c0_79] : memref<9x16x16xf32, #tpu.memory_space<vmem>>, vector<1x16x16xf32>
    %123 = vector.shape_cast %122 : vector<1x16x16xf32> to vector<16x16xf32>
    %cst_80 = arith.constant dense<0.000000e+00> : vector<16x512xf32>
    %124 = tpu.matmul %123, %121, %cst_80 {dimension_numbers = #tpu.dot_dimension_numbers<[1], [0], [0], [1], [0, 0, 1, 1], [], []>} : vector<16x16xf32>, vector<16x512xf32>, vector<16x512xf32> -> vector<16x512xf32>
    %125 = arith.addf %116, %124 : vector<16x512xf32>
    %c0_81 = arith.constant 0 : index
    %c0_82 = arith.constant 0 : index
    %126 = vector.load %arg13[%c0_81, %c0_82] : memref<16x1xf32, #tpu.memory_space<vmem>>, vector<16x1xf32>
    %127 = vector.broadcast %126 : vector<16x1xf32> to vector<16x512xf32>
    %128 = arith.addf %125, %127 : vector<16x512xf32>
    %cst_83 = arith.constant 0.000000e+00 : f32
    %129 = vector.broadcast %cst_83 : f32 to vector<16x512xf32>
    %130 = arith.maximumf %128, %129 : vector<16x512xf32>
    %c0_84 = arith.constant 0 : index
    %c0_85 = arith.constant 0 : index
    %c0_86 = arith.constant 0 : index
    %131 = vector.load %arg15[%c0_84, %c0_85, %c0_86] : memref<1x16x512xf32, #tpu.memory_space<vmem>>, vector<1x16x512xf32>
    %132 = vector.shape_cast %131 : vector<1x16x512xf32> to vector<16x512xf32>
    %133 = vector.shape_cast %130 : vector<16x512xf32> to vector<1x16x512xf32>
    tpu.vector_store %arg15[%c0_84, %c0_85, %c0_86], %133 {strides = array<i32>} : memref<1x16x512xf32, #tpu.memory_space<vmem>>, vector<1x16x512xf32>,
    %c0_87 = arith.constant 0 : index
    %c0_88 = arith.constant 0 : index
    %134 = vector.load %arg9[%c0_87, %c0_88] : memref<4x16xf32, #tpu.memory_space<vmem>>, vector<4x16xf32>
    %cst_89 = arith.constant dense<0.000000e+00> : vector<4x512xf32>
    %135 = tpu.matmul %134, %48, %cst_89 {dimension_numbers = #tpu.dot_dimension_numbers<[1], [0], [0], [1], [0, 0, 1, 1], [], []>} : vector<4x16xf32>, vector<16x512xf32>, vector<4x512xf32> -> vector<4x512xf32>
    %c0_90 = arith.constant 0 : index
    %c0_91 = arith.constant 0 : index
    %136 = vector.load %arg10[%c0_90, %c0_91] : memref<4x1xf32, #tpu.memory_space<vmem>>, vector<4x1xf32>
    %137 = vector.broadcast %136 : vector<4x1xf32> to vector<4x512xf32>
    %138 = arith.addf %135, %137 : vector<4x512xf32>
    %cst_92 = arith.constant 0.000000e+00 : f32
    %139 = vector.broadcast %cst_92 : f32 to vector<4x512xf32>
    %140 = arith.maximumf %138, %139 : vector<4x512xf32>
    %cst_93 = arith.constant dense<0.000000e+00> : vector<512xf32>
    %141 = vector.multi_reduction <add>, %140, %cst_93 [0] : vector<4x512xf32> to vector<512xf32>
    %142 = vector.shape_cast %141 : vector<512xf32> to vector<1x512xf32>
    %cst_94 = arith.constant 4.000000e+00 : f32
    %143 = vector.broadcast %cst_94 : f32 to vector<1x512xf32>
    %144 = arith.divf %142, %143 : vector<1x512xf32>
    %cst_95 = arith.constant dense<0xFF800000> : vector<512xf32>
    %145 = vector.multi_reduction <maximumf>, %140, %cst_95 [0] : vector<4x512xf32> to vector<512xf32>
    %146 = vector.shape_cast %145 : vector<512xf32> to vector<1x512xf32>
    %147 = tpu.concatenate %144, %146 in 0 : vector<1x512xf32>, vector<1x512xf32> -> vector<2x512xf32>
    %cst_96 = arith.constant 0.000000e+00 : f32
    %148 = vector.broadcast %cst_96 : f32 to vector<1x512xf32>
    %c17_i32_97 = arith.constant 17 : i32
    %149 = tpu.dynamic_rotate %147 by %c17_i32_97 dim 1 : vector<2x512xf32>, i32 -> vector<2x512xf32>
    %150 = vector.extract_strided_slice %149 {offsets = [0, 0], sizes = [1, 512], strides = [1, 1]} : vector<2x512xf32> to vector<1x512xf32>
    %c0_98 = arith.constant 0 : index
    %151 = memref.load %arg11[%c0_98] : memref<18xf32, #tpu.memory_space<smem>>
    %152 = vector.broadcast %151 : f32 to vector<1x512xf32>
    %153 = arith.mulf %150, %152 : vector<1x512xf32>
    %154 = vector.extract_strided_slice %149 {offsets = [1, 0], sizes = [1, 512], strides = [1, 1]} : vector<2x512xf32> to vector<1x512xf32>
    %c1_99 = arith.constant 1 : index
    %155 = memref.load %arg11[%c1_99] : memref<18xf32, #tpu.memory_space<smem>>
    %156 = vector.broadcast %155 : f32 to vector<1x512xf32>
    %157 = arith.mulf %154, %156 : vector<1x512xf32>
    %158 = arith.addf %153, %157 : vector<1x512xf32>
    %c0_100 = arith.constant 0 : index
    %c0_101 = arith.constant 0 : index
    %c0_102 = arith.constant 0 : index
    %159 = vector.load %arg14[%c0_100, %c0_101, %c0_102] : memref<9x1x512xf32, #tpu.memory_space<vmem>>, vector<1x1x512xf32>
    %160 = vector.shape_cast %159 : vector<1x1x512xf32> to vector<1x512xf32>
    %161 = arith.mulf %158, %160 : vector<1x512xf32>
    %162 = arith.addf %148, %161 : vector<1x512xf32>
    %c16_i32_103 = arith.constant 16 : i32
    %163 = tpu.dynamic_rotate %147 by %c16_i32_103 dim 1 : vector<2x512xf32>, i32 -> vector<2x512xf32>
    %164 = vector.extract_strided_slice %163 {offsets = [0, 0], sizes = [1, 512], strides = [1, 1]} : vector<2x512xf32> to vector<1x512xf32>
    %c2_104 = arith.constant 2 : index
    %165 = memref.load %arg11[%c2_104] : memref<18xf32, #tpu.memory_space<smem>>
    %166 = vector.broadcast %165 : f32 to vector<1x512xf32>
    %167 = arith.mulf %164, %166 : vector<1x512xf32>
    %168 = vector.extract_strided_slice %163 {offsets = [1, 0], sizes = [1, 512], strides = [1, 1]} : vector<2x512xf32> to vector<1x512xf32>
    %c3_105 = arith.constant 3 : index
    %169 = memref.load %arg11[%c3_105] : memref<18xf32, #tpu.memory_space<smem>>
    %170 = vector.broadcast %169 : f32 to vector<1x512xf32>
    %171 = arith.mulf %168, %170 : vector<1x512xf32>
    %172 = arith.addf %167, %171 : vector<1x512xf32>
    %c1_106 = arith.constant 1 : index
    %c0_107 = arith.constant 0 : index
    %c0_108 = arith.constant 0 : index
    %173 = vector.load %arg14[%c1_106, %c0_107, %c0_108] : memref<9x1x512xf32, #tpu.memory_space<vmem>>, vector<1x1x512xf32>
    %174 = vector.shape_cast %173 : vector<1x1x512xf32> to vector<1x512xf32>
    %175 = arith.mulf %172, %174 : vector<1x512xf32>
    %176 = arith.addf %162, %175 : vector<1x512xf32>
    %c15_i32_109 = arith.constant 15 : i32
    %177 = tpu.dynamic_rotate %147 by %c15_i32_109 dim 1 : vector<2x512xf32>, i32 -> vector<2x512xf32>
    %178 = vector.extract_strided_slice %177 {offsets = [0, 0], sizes = [1, 512], strides = [1, 1]} : vector<2x512xf32> to vector<1x512xf32>
    %c4_110 = arith.constant 4 : index
    %179 = memref.load %arg11[%c4_110] : memref<18xf32, #tpu.memory_space<smem>>
    %180 = vector.broadcast %179 : f32 to vector<1x512xf32>
    %181 = arith.mulf %178, %180 : vector<1x512xf32>
    %182 = vector.extract_strided_slice %177 {offsets = [1, 0], sizes = [1, 512], strides = [1, 1]} : vector<2x512xf32> to vector<1x512xf32>
    %c5_111 = arith.constant 5 : index
    %183 = memref.load %arg11[%c5_111] : memref<18xf32, #tpu.memory_space<smem>>
    %184 = vector.broadcast %183 : f32 to vector<1x512xf32>
    %185 = arith.mulf %182, %184 : vector<1x512xf32>
    %186 = arith.addf %181, %185 : vector<1x512xf32>
    %c2_112 = arith.constant 2 : index
    %c0_113 = arith.constant 0 : index
    %c0_114 = arith.constant 0 : index
    %187 = vector.load %arg14[%c2_112, %c0_113, %c0_114] : memref<9x1x512xf32, #tpu.memory_space<vmem>>, vector<1x1x512xf32>
    %188 = vector.shape_cast %187 : vector<1x1x512xf32> to vector<1x512xf32>
    %189 = arith.mulf %186, %188 : vector<1x512xf32>
    %190 = arith.addf %176, %189 : vector<1x512xf32>
    %c1_i32_115 = arith.constant 1 : i32
    %191 = tpu.dynamic_rotate %147 by %c1_i32_115 dim 1 : vector<2x512xf32>, i32 -> vector<2x512xf32>
    %192 = vector.extract_strided_slice %191 {offsets = [0, 0], sizes = [1, 512], strides = [1, 1]} : vector<2x512xf32> to vector<1x512xf32>
    %c6_116 = arith.constant 6 : index
    %193 = memref.load %arg11[%c6_116] : memref<18xf32, #tpu.memory_space<smem>>
    %194 = vector.broadcast %193 : f32 to vector<1x512xf32>
    %195 = arith.mulf %192, %194 : vector<1x512xf32>
    %196 = vector.extract_strided_slice %191 {offsets = [1, 0], sizes = [1, 512], strides = [1, 1]} : vector<2x512xf32> to vector<1x512xf32>
    %c7_117 = arith.constant 7 : index
    %197 = memref.load %arg11[%c7_117] : memref<18xf32, #tpu.memory_space<smem>>
    %198 = vector.broadcast %197 : f32 to vector<1x512xf32>
    %199 = arith.mulf %196, %198 : vector<1x512xf32>
    %200 = arith.addf %195, %199 : vector<1x512xf32>
    %c3_118 = arith.constant 3 : index
    %c0_119 = arith.constant 0 : index
    %c0_120 = arith.constant 0 : index
    %201 = vector.load %arg14[%c3_118, %c0_119, %c0_120] : memref<9x1x512xf32, #tpu.memory_space<vmem>>, vector<1x1x512xf32>
    %202 = vector.shape_cast %201 : vector<1x1x512xf32> to vector<1x512xf32>
    %203 = arith.mulf %200, %202 : vector<1x512xf32>
    %204 = arith.addf %190, %203 : vector<1x512xf32>
    %205 = vector.extract_strided_slice %147 {offsets = [0, 0], sizes = [1, 512], strides = [1, 1]} : vector<2x512xf32> to vector<1x512xf32>
    %c8_121 = arith.constant 8 : index
    %206 = memref.load %arg11[%c8_121] : memref<18xf32, #tpu.memory_space<smem>>
    %207 = vector.broadcast %206 : f32 to vector<1x512xf32>
    %208 = arith.mulf %205, %207 : vector<1x512xf32>
    %209 = vector.extract_strided_slice %147 {offsets = [1, 0], sizes = [1, 512], strides = [1, 1]} : vector<2x512xf32> to vector<1x512xf32>
    %c9 = arith.constant 9 : index
    %210 = memref.load %arg11[%c9] : memref<18xf32, #tpu.memory_space<smem>>
    %211 = vector.broadcast %210 : f32 to vector<1x512xf32>
    %212 = arith.mulf %209, %211 : vector<1x512xf32>
    %213 = arith.addf %208, %212 : vector<1x512xf32>
    %214 = arith.addf %204, %213 : vector<1x512xf32>
    %c511_i32_122 = arith.constant 511 : i32
    %215 = tpu.dynamic_rotate %147 by %c511_i32_122 dim 1 : vector<2x512xf32>, i32 -> vector<2x512xf32>
    %216 = vector.extract_strided_slice %215 {offsets = [0, 0], sizes = [1, 512], strides = [1, 1]} : vector<2x512xf32> to vector<1x512xf32>
    %c10 = arith.constant 10 : index
    %217 = memref.load %arg11[%c10] : memref<18xf32, #tpu.memory_space<smem>>
    %218 = vector.broadcast %217 : f32 to vector<1x512xf32>
    %219 = arith.mulf %216, %218 : vector<1x512xf32>
    %220 = vector.extract_strided_slice %215 {offsets = [1, 0], sizes = [1, 512], strides = [1, 1]} : vector<2x512xf32> to vector<1x512xf32>
    %c11 = arith.constant 11 : index
    %221 = memref.load %arg11[%c11] : memref<18xf32, #tpu.memory_space<smem>>
    %222 = vector.broadcast %221 : f32 to vector<1x512xf32>
    %223 = arith.mulf %220, %222 : vector<1x512xf32>
    %224 = arith.addf %219, %223 : vector<1x512xf32>
    %c5_123 = arith.constant 5 : index
    %c0_124 = arith.constant 0 : index
    %c0_125 = arith.constant 0 : index
    %225 = vector.load %arg14[%c5_123, %c0_124, %c0_125] : memref<9x1x512xf32, #tpu.memory_space<vmem>>, vector<1x1x512xf32>
    %226 = vector.shape_cast %225 : vector<1x1x512xf32> to vector<1x512xf32>
    %227 = arith.mulf %224, %226 : vector<1x512xf32>
    %228 = arith.addf %214, %227 : vector<1x512xf32>
    %c497_i32_126 = arith.constant 497 : i32
    %229 = tpu.dynamic_rotate %147 by %c497_i32_126 dim 1 : vector<2x512xf32>, i32 -> vector<2x512xf32>
    %230 = vector.extract_strided_slice %229 {offsets = [0, 0], sizes = [1, 512], strides = [1, 1]} : vector<2x512xf32> to vector<1x512xf32>
    %c12 = arith.constant 12 : index
    %231 = memref.load %arg11[%c12] : memref<18xf32, #tpu.memory_space<smem>>
    %232 = vector.broadcast %231 : f32 to vector<1x512xf32>
    %233 = arith.mulf %230, %232 : vector<1x512xf32>
    %234 = vector.extract_strided_slice %229 {offsets = [1, 0], sizes = [1, 512], strides = [1, 1]} : vector<2x512xf32> to vector<1x512xf32>
    %c13 = arith.constant 13 : index
    %235 = memref.load %arg11[%c13] : memref<18xf32, #tpu.memory_space<smem>>
    %236 = vector.broadcast %235 : f32 to vector<1x512xf32>
    %237 = arith.mulf %234, %236 : vector<1x512xf32>
    %238 = arith.addf %233, %237 : vector<1x512xf32>
    %c6_127 = arith.constant 6 : index
    %c0_128 = arith.constant 0 : index
    %c0_129 = arith.constant 0 : index
    %239 = vector.load %arg14[%c6_127, %c0_128, %c0_129] : memref<9x1x512xf32, #tpu.memory_space<vmem>>, vector<1x1x512xf32>
    %240 = vector.shape_cast %239 : vector<1x1x512xf32> to vector<1x512xf32>
    %241 = arith.mulf %238, %240 : vector<1x512xf32>
    %242 = arith.addf %228, %241 : vector<1x512xf32>
    %c496_i32_130 = arith.constant 496 : i32
    %243 = tpu.dynamic_rotate %147 by %c496_i32_130 dim 1 : vector<2x512xf32>, i32 -> vector<2x512xf32>
    %244 = vector.extract_strided_slice %243 {offsets = [0, 0], sizes = [1, 512], strides = [1, 1]} : vector<2x512xf32> to vector<1x512xf32>
    %c14 = arith.constant 14 : index
    %245 = memref.load %arg11[%c14] : memref<18xf32, #tpu.memory_space<smem>>
    %246 = vector.broadcast %245 : f32 to vector<1x512xf32>
    %247 = arith.mulf %244, %246 : vector<1x512xf32>
    %248 = vector.extract_strided_slice %243 {offsets = [1, 0], sizes = [1, 512], strides = [1, 1]} : vector<2x512xf32> to vector<1x512xf32>
    %c15 = arith.constant 15 : index
    %249 = memref.load %arg11[%c15] : memref<18xf32, #tpu.memory_space<smem>>
    %250 = vector.broadcast %249 : f32 to vector<1x512xf32>
    %251 = arith.mulf %248, %250 : vector<1x512xf32>
    %252 = arith.addf %247, %251 : vector<1x512xf32>
    %c7_131 = arith.constant 7 : index
    %c0_132 = arith.constant 0 : index
    %c0_133 = arith.constant 0 : index
    %253 = vector.load %arg14[%c7_131, %c0_132, %c0_133] : memref<9x1x512xf32, #tpu.memory_space<vmem>>, vector<1x1x512xf32>
    %254 = vector.shape_cast %253 : vector<1x1x512xf32> to vector<1x512xf32>
    %255 = arith.mulf %252, %254 : vector<1x512xf32>
    %256 = arith.addf %242, %255 : vector<1x512xf32>
    %c495_i32_134 = arith.constant 495 : i32
    %257 = tpu.dynamic_rotate %147 by %c495_i32_134 dim 1 : vector<2x512xf32>, i32 -> vector<2x512xf32>
    %258 = vector.extract_strided_slice %257 {offsets = [0, 0], sizes = [1, 512], strides = [1, 1]} : vector<2x512xf32> to vector<1x512xf32>
    %c16 = arith.constant 16 : index
    %259 = memref.load %arg11[%c16] : memref<18xf32, #tpu.memory_space<smem>>
    %260 = vector.broadcast %259 : f32 to vector<1x512xf32>
    %261 = arith.mulf %258, %260 : vector<1x512xf32>
    %262 = vector.extract_strided_slice %257 {offsets = [1, 0], sizes = [1, 512], strides = [1, 1]} : vector<2x512xf32> to vector<1x512xf32>
    %c17 = arith.constant 17 : index
    %263 = memref.load %arg11[%c17] : memref<18xf32, #tpu.memory_space<smem>>
    %264 = vector.broadcast %263 : f32 to vector<1x512xf32>
    %265 = arith.mulf %262, %264 : vector<1x512xf32>
    %266 = arith.addf %261, %265 : vector<1x512xf32>
    %c8_135 = arith.constant 8 : index
    %c0_136 = arith.constant 0 : index
    %c0_137 = arith.constant 0 : index
    %267 = vector.load %arg14[%c8_135, %c0_136, %c0_137] : memref<9x1x512xf32, #tpu.memory_space<vmem>>, vector<1x1x512xf32>
    %268 = vector.shape_cast %267 : vector<1x1x512xf32> to vector<1x512xf32>
    %269 = arith.mulf %266, %268 : vector<1x512xf32>
    %270 = arith.addf %256, %269 : vector<1x512xf32>
    %cst_138 = arith.constant 0.000000e+00 : f32
    %271 = vector.broadcast %cst_138 : f32 to vector<1x512xf32>
    %272 = arith.subf %271, %270 : vector<1x512xf32>
    %273 = math.exp %272 : vector<1x512xf32>
    %cst_139 = arith.constant 1.000000e+00 : f32
    %274 = vector.broadcast %cst_139 : f32 to vector<1x512xf32>
    %275 = arith.addf %274, %273 : vector<1x512xf32>
    %cst_140 = arith.constant 1.000000e+00 : f32
    %276 = vector.broadcast %cst_140 : f32 to vector<1x512xf32>
    %277 = arith.divf %276, %275 : vector<1x512xf32>
    %278 = vector.broadcast %277 : vector<1x512xf32> to vector<16x512xf32>
    %279 = arith.mulf %10, %278 : vector<16x512xf32>
    %cst_141 = arith.constant 0.000000e+00 : f32
    %280 = vector.broadcast %cst_141 : f32 to vector<16x512xf32>
    %c17_i32_142 = arith.constant 17 : i32
    %281 = tpu.dynamic_rotate %279 by %c17_i32_142 dim 1 : vector<16x512xf32>, i32 -> vector<16x512xf32>
    %c0_143 = arith.constant 0 : index
    %c0_144 = arith.constant 0 : index
    %c0_145 = arith.constant 0 : index
    %282 = vector.load %arg14[%c0_143, %c0_144, %c0_145] : memref<9x1x512xf32, #tpu.memory_space<vmem>>, vector<1x1x512xf32>
    %283 = vector.shape_cast %282 : vector<1x1x512xf32> to vector<1x512xf32>
    %284 = vector.broadcast %283 : vector<1x512xf32> to vector<16x512xf32>
    %285 = arith.mulf %281, %284 : vector<16x512xf32>
    %c0_146 = arith.constant 0 : index
    %c0_147 = arith.constant 0 : index
    %c0_148 = arith.constant 0 : index
    %286 = vector.load %arg12[%c0_146, %c0_147, %c0_148] : memref<9x16x16xf32, #tpu.memory_space<vmem>>, vector<1x16x16xf32>
    %287 = vector.shape_cast %286 : vector<1x16x16xf32> to vector<16x16xf32>
    %cst_149 = arith.constant dense<0.000000e+00> : vector<16x512xf32>
    %288 = tpu.matmul %287, %285, %cst_149 {dimension_numbers = #tpu.dot_dimension_numbers<[1], [0], [0], [1], [0, 0, 1, 1], [], []>} : vector<16x16xf32>, vector<16x512xf32>, vector<16x512xf32> -> vector<16x512xf32>
    %289 = arith.addf %280, %288 : vector<16x512xf32>
    %c16_i32_150 = arith.constant 16 : i32
    %290 = tpu.dynamic_rotate %279 by %c16_i32_150 dim 1 : vector<16x512xf32>, i32 -> vector<16x512xf32>
    %c1_151 = arith.constant 1 : index
    %c0_152 = arith.constant 0 : index
    %c0_153 = arith.constant 0 : index
    %291 = vector.load %arg14[%c1_151, %c0_152, %c0_153] : memref<9x1x512xf32, #tpu.memory_space<vmem>>, vector<1x1x512xf32>
    %292 = vector.shape_cast %291 : vector<1x1x512xf32> to vector<1x512xf32>
    %293 = vector.broadcast %292 : vector<1x512xf32> to vector<16x512xf32>
    %294 = arith.mulf %290, %293 : vector<16x512xf32>
    %c1_154 = arith.constant 1 : index
    %c0_155 = arith.constant 0 : index
    %c0_156 = arith.constant 0 : index
    %295 = vector.load %arg12[%c1_154, %c0_155, %c0_156] : memref<9x16x16xf32, #tpu.memory_space<vmem>>, vector<1x16x16xf32>
    %296 = vector.shape_cast %295 : vector<1x16x16xf32> to vector<16x16xf32>
    %cst_157 = arith.constant dense<0.000000e+00> : vector<16x512xf32>
    %297 = tpu.matmul %296, %294, %cst_157 {dimension_numbers = #tpu.dot_dimension_numbers<[1], [0], [0], [1], [0, 0, 1, 1], [], []>} : vector<16x16xf32>, vector<16x512xf32>, vector<16x512xf32> -> vector<16x512xf32>
    %298 = arith.addf %289, %297 : vector<16x512xf32>
    %c15_i32_158 = arith.constant 15 : i32
    %299 = tpu.dynamic_rotate %279 by %c15_i32_158 dim 1 : vector<16x512xf32>, i32 -> vector<16x512xf32>
    %c2_159 = arith.constant 2 : index
    %c0_160 = arith.constant 0 : index
    %c0_161 = arith.constant 0 : index
    %300 = vector.load %arg14[%c2_159, %c0_160, %c0_161] : memref<9x1x512xf32, #tpu.memory_space<vmem>>, vector<1x1x512xf32>
    %301 = vector.shape_cast %300 : vector<1x1x512xf32> to vector<1x512xf32>
    %302 = vector.broadcast %301 : vector<1x512xf32> to vector<16x512xf32>
    %303 = arith.mulf %299, %302 : vector<16x512xf32>
    %c2_162 = arith.constant 2 : index
    %c0_163 = arith.constant 0 : index
    %c0_164 = arith.constant 0 : index
    %304 = vector.load %arg12[%c2_162, %c0_163, %c0_164] : memref<9x16x16xf32, #tpu.memory_space<vmem>>, vector<1x16x16xf32>
    %305 = vector.shape_cast %304 : vector<1x16x16xf32> to vector<16x16xf32>
    %cst_165 = arith.constant dense<0.000000e+00> : vector<16x512xf32>
    %306 = tpu.matmul %305, %303, %cst_165 {dimension_numbers = #tpu.dot_dimension_numbers<[1], [0], [0], [1], [0, 0, 1, 1], [], []>} : vector<16x16xf32>, vector<16x512xf32>, vector<16x512xf32> -> vector<16x512xf32>
    %307 = arith.addf %298, %306 : vector<16x512xf32>
    %c1_i32_166 = arith.constant 1 : i32
    %308 = tpu.dynamic_rotate %279 by %c1_i32_166 dim 1 : vector<16x512xf32>, i32 -> vector<16x512xf32>
    %c3_167 = arith.constant 3 : index
    %c0_168 = arith.constant 0 : index
    %c0_169 = arith.constant 0 : index
    %309 = vector.load %arg14[%c3_167, %c0_168, %c0_169] : memref<9x1x512xf32, #tpu.memory_space<vmem>>, vector<1x1x512xf32>
    %310 = vector.shape_cast %309 : vector<1x1x512xf32> to vector<1x512xf32>
    %311 = vector.broadcast %310 : vector<1x512xf32> to vector<16x512xf32>
    %312 = arith.mulf %308, %311 : vector<16x512xf32>
    %c3_170 = arith.constant 3 : index
    %c0_171 = arith.constant 0 : index
    %c0_172 = arith.constant 0 : index
    %313 = vector.load %arg12[%c3_170, %c0_171, %c0_172] : memref<9x16x16xf32, #tpu.memory_space<vmem>>, vector<1x16x16xf32>
    %314 = vector.shape_cast %313 : vector<1x16x16xf32> to vector<16x16xf32>
    %cst_173 = arith.constant dense<0.000000e+00> : vector<16x512xf32>
    %315 = tpu.matmul %314, %312, %cst_173 {dimension_numbers = #tpu.dot_dimension_numbers<[1], [0], [0], [1], [0, 0, 1, 1], [], []>} : vector<16x16xf32>, vector<16x512xf32>, vector<16x512xf32> -> vector<16x512xf32>
    %316 = arith.addf %307, %315 : vector<16x512xf32>
    %c4_174 = arith.constant 4 : index
    %c0_175 = arith.constant 0 : index
    %c0_176 = arith.constant 0 : index
    %317 = vector.load %arg12[%c4_174, %c0_175, %c0_176] : memref<9x16x16xf32, #tpu.memory_space<vmem>>, vector<1x16x16xf32>
    %318 = vector.shape_cast %317 : vector<1x16x16xf32> to vector<16x16xf32>
    %cst_177 = arith.constant dense<0.000000e+00> : vector<16x512xf32>
    %319 = tpu.matmul %318, %279, %cst_177 {dimension_numbers = #tpu.dot_dimension_numbers<[1], [0], [0], [1], [0, 0, 1, 1], [], []>} : vector<16x16xf32>, vector<16x512xf32>, vector<16x512xf32> -> vector<16x512xf32>
    %320 = arith.addf %316, %319 : vector<16x512xf32>
    %c511_i32_178 = arith.constant 511 : i32
    %321 = tpu.dynamic_rotate %279 by %c511_i32_178 dim 1 : vector<16x512xf32>, i32 -> vector<16x512xf32>
    %c5_179 = arith.constant 5 : index
    %c0_180 = arith.constant 0 : index
    %c0_181 = arith.constant 0 : index
    %322 = vector.load %arg14[%c5_179, %c0_180, %c0_181] : memref<9x1x512xf32, #tpu.memory_space<vmem>>, vector<1x1x512xf32>
    %323 = vector.shape_cast %322 : vector<1x1x512xf32> to vector<1x512xf32>
    %324 = vector.broadcast %323 : vector<1x512xf32> to vector<16x512xf32>
    %325 = arith.mulf %321, %324 : vector<16x512xf32>
    %c5_182 = arith.constant 5 : index
    %c0_183 = arith.constant 0 : index
    %c0_184 = arith.constant 0 : index
    %326 = vector.load %arg12[%c5_182, %c0_183, %c0_184] : memref<9x16x16xf32, #tpu.memory_space<vmem>>, vector<1x16x16xf32>
    %327 = vector.shape_cast %326 : vector<1x16x16xf32> to vector<16x16xf32>
    %cst_185 = arith.constant dense<0.000000e+00> : vector<16x512xf32>
    %328 = tpu.matmul %327, %325, %cst_185 {dimension_numbers = #tpu.dot_dimension_numbers<[1], [0], [0], [1], [0, 0, 1, 1], [], []>} : vector<16x16xf32>, vector<16x512xf32>, vector<16x512xf32> -> vector<16x512xf32>
    %329 = arith.addf %320, %328 : vector<16x512xf32>
    %c497_i32_186 = arith.constant 497 : i32
    %330 = tpu.dynamic_rotate %279 by %c497_i32_186 dim 1 : vector<16x512xf32>, i32 -> vector<16x512xf32>
    %c6_187 = arith.constant 6 : index
    %c0_188 = arith.constant 0 : index
    %c0_189 = arith.constant 0 : index
    %331 = vector.load %arg14[%c6_187, %c0_188, %c0_189] : memref<9x1x512xf32, #tpu.memory_space<vmem>>, vector<1x1x512xf32>
    %332 = vector.shape_cast %331 : vector<1x1x512xf32> to vector<1x512xf32>
    %333 = vector.broadcast %332 : vector<1x512xf32> to vector<16x512xf32>
    %334 = arith.mulf %330, %333 : vector<16x512xf32>
    %c6_190 = arith.constant 6 : index
    %c0_191 = arith.constant 0 : index
    %c0_192 = arith.constant 0 : index
    %335 = vector.load %arg12[%c6_190, %c0_191, %c0_192] : memref<9x16x16xf32, #tpu.memory_space<vmem>>, vector<1x16x16xf32>
    %336 = vector.shape_cast %335 : vector<1x16x16xf32> to vector<16x16xf32>
    %cst_193 = arith.constant dense<0.000000e+00> : vector<16x512xf32>
    %337 = tpu.matmul %336, %334, %cst_193 {dimension_numbers = #tpu.dot_dimension_numbers<[1], [0], [0], [1], [0, 0, 1, 1], [], []>} : vector<16x16xf32>, vector<16x512xf32>, vector<16x512xf32> -> vector<16x512xf32>
    %338 = arith.addf %329, %337 : vector<16x512xf32>
    %c496_i32_194 = arith.constant 496 : i32
    %339 = tpu.dynamic_rotate %279 by %c496_i32_194 dim 1 : vector<16x512xf32>, i32 -> vector<16x512xf32>
    %c7_195 = arith.constant 7 : index
    %c0_196 = arith.constant 0 : index
    %c0_197 = arith.constant 0 : index
    %340 = vector.load %arg14[%c7_195, %c0_196, %c0_197] : memref<9x1x512xf32, #tpu.memory_space<vmem>>, vector<1x1x512xf32>
    %341 = vector.shape_cast %340 : vector<1x1x512xf32> to vector<1x512xf32>
    %342 = vector.broadcast %341 : vector<1x512xf32> to vector<16x512xf32>
    %343 = arith.mulf %339, %342 : vector<16x512xf32>
    %c7_198 = arith.constant 7 : index
    %c0_199 = arith.constant 0 : index
    %c0_200 = arith.constant 0 : index
    %344 = vector.load %arg12[%c7_198, %c0_199, %c0_200] : memref<9x16x16xf32, #tpu.memory_space<vmem>>, vector<1x16x16xf32>
    %345 = vector.shape_cast %344 : vector<1x16x16xf32> to vector<16x16xf32>
    %cst_201 = arith.constant dense<0.000000e+00> : vector<16x512xf32>
    %346 = tpu.matmul %345, %343, %cst_201 {dimension_numbers = #tpu.dot_dimension_numbers<[1], [0], [0], [1], [0, 0, 1, 1], [], []>} : vector<16x16xf32>, vector<16x512xf32>, vector<16x512xf32> -> vector<16x512xf32>
    %347 = arith.addf %338, %346 : vector<16x512xf32>
    %c495_i32_202 = arith.constant 495 : i32
    %348 = tpu.dynamic_rotate %279 by %c495_i32_202 dim 1 : vector<16x512xf32>, i32 -> vector<16x512xf32>
    %c8_203 = arith.constant 8 : index
    %c0_204 = arith.constant 0 : index
    %c0_205 = arith.constant 0 : index
    %349 = vector.load %arg14[%c8_203, %c0_204, %c0_205] : memref<9x1x512xf32, #tpu.memory_space<vmem>>, vector<1x1x512xf32>
    %350 = vector.shape_cast %349 : vector<1x1x512xf32> to vector<1x512xf32>
    %351 = vector.broadcast %350 : vector<1x512xf32> to vector<16x512xf32>
    %352 = arith.mulf %348, %351 : vector<16x512xf32>
    %c8_206 = arith.constant 8 : index
    %c0_207 = arith.constant 0 : index
    %c0_208 = arith.constant 0 : index
    %353 = vector.load %arg12[%c8_206, %c0_207, %c0_208] : memref<9x16x16xf32, #tpu.memory_space<vmem>>, vector<1x16x16xf32>
    %354 = vector.shape_cast %353 : vector<1x16x16xf32> to vector<16x16xf32>
    %cst_209 = arith.constant dense<0.000000e+00> : vector<16x512xf32>
    %355 = tpu.matmul %354, %352, %cst_209 {dimension_numbers = #tpu.dot_dimension_numbers<[1], [0], [0], [1], [0, 0, 1, 1], [], []>} : vector<16x16xf32>, vector<16x512xf32>, vector<16x512xf32> -> vector<16x512xf32>
    %356 = arith.addf %347, %355 : vector<16x512xf32>
    %c0_210 = arith.constant 0 : index
    %c0_211 = arith.constant 0 : index
    %357 = vector.load %arg13[%c0_210, %c0_211] : memref<16x1xf32, #tpu.memory_space<vmem>>, vector<16x1xf32>
    %358 = vector.broadcast %357 : vector<16x1xf32> to vector<16x512xf32>
    %359 = arith.addf %356, %358 : vector<16x512xf32>
    %cst_212 = arith.constant 0.000000e+00 : f32
    %360 = vector.broadcast %cst_212 : f32 to vector<16x512xf32>
    %361 = arith.maximumf %359, %360 : vector<16x512xf32>
    %c0_213 = arith.constant 0 : index
    %c0_214 = arith.constant 0 : index
    %c0_215 = arith.constant 0 : index
    %362 = vector.load %arg16[%c0_213, %c0_214, %c0_215] : memref<1x16x512xf32, #tpu.memory_space<vmem>>, vector<1x16x512xf32>
    %363 = vector.shape_cast %362 : vector<1x16x512xf32> to vector<16x512xf32>
    %364 = vector.shape_cast %361 : vector<16x512xf32> to vector<1x16x512xf32>
    tpu.vector_store %arg16[%c0_213, %c0_214, %c0_215], %364 {strides = array<i32>} : memref<1x16x512xf32, #tpu.memory_space<vmem>>, vector<1x16x512xf32>,
    return
  }
  func.func @transform_0(%arg0: i32) -> (i32, i32, i32) {
    %c0_i32 = arith.constant 0 : i32
    %c0_i32_0 = arith.constant 0 : i32
    %c0_i32_1 = arith.constant 0 : i32
    return %arg0, %c0_i32, %c0_i32_0 : i32, i32, i32
  }
  func.func @transform_1(%arg0: i32) -> (i32, i32, i32) {
    %c0_i32 = arith.constant 0 : i32
    %c0_i32_0 = arith.constant 0 : i32
    %c0_i32_1 = arith.constant 0 : i32
    return %arg0, %c0_i32, %c0_i32_0 : i32, i32, i32
  }
  func.func @transform_2(%arg0: i32) -> (i32, i32) {
    %c0_i32 = arith.constant 0 : i32
    %c0_i32_0 = arith.constant 0 : i32
    %c0_i32_1 = arith.constant 0 : i32
    return %c0_i32, %c0_i32_0 : i32, i32
  }
  func.func @transform_3(%arg0: i32) -> (i32, i32) {
    %c0_i32 = arith.constant 0 : i32
    %c0_i32_0 = arith.constant 0 : i32
    %c0_i32_1 = arith.constant 0 : i32
    return %c0_i32, %c0_i32_0 : i32, i32
  }
  func.func @transform_4(%arg0: i32) -> (i32, i32) {
    %c0_i32 = arith.constant 0 : i32
    %c0_i32_0 = arith.constant 0 : i32
    %c0_i32_1 = arith.constant 0 : i32
    return %c0_i32, %c0_i32_0 : i32, i32
  }
  func.func @transform_5(%arg0: i32) -> (i32, i32) {
    %c0_i32 = arith.constant 0 : i32
    %c0_i32_0 = arith.constant 0 : i32
    %c0_i32_1 = arith.constant 0 : i32
    return %c0_i32, %c0_i32_0 : i32, i32
  }
  func.func @transform_6(%arg0: i32) -> (i32, i32) {
    %c0_i32 = arith.constant 0 : i32
    %c0_i32_0 = arith.constant 0 : i32
    %c0_i32_1 = arith.constant 0 : i32
    return %c0_i32, %c0_i32_0 : i32, i32
  }
  func.func @transform_7(%arg0: i32) -> (i32, i32) {
    %c0_i32 = arith.constant 0 : i32
    %c0_i32_0 = arith.constant 0 : i32
    %c0_i32_1 = arith.constant 0 : i32
    return %c0_i32, %c0_i32_0 : i32, i32
  }
  func.func @transform_8(%arg0: i32) -> (i32, i32) {
    %c0_i32 = arith.constant 0 : i32
    %c0_i32_0 = arith.constant 0 : i32
    %c0_i32_1 = arith.constant 0 : i32
    return %c0_i32, %c0_i32_0 : i32, i32
  }
  func.func @transform_9(%arg0: i32) -> (i32, i32) {
    %c0_i32 = arith.constant 0 : i32
    %c0_i32_0 = arith.constant 0 : i32
    %c0_i32_1 = arith.constant 0 : i32
    return %c0_i32, %c0_i32_0 : i32, i32
  }
  func.func @transform_10(%arg0: i32) -> i32 {
    %c0_i32 = arith.constant 0 : i32
    %c0_i32_0 = arith.constant 0 : i32
    return %c0_i32 : i32
  }
  func.func @transform_11(%arg0: i32) -> (i32, i32, i32) {
    %c0_i32 = arith.constant 0 : i32
    %c0_i32_0 = arith.constant 0 : i32
    %c0_i32_1 = arith.constant 0 : i32
    %c0_i32_2 = arith.constant 0 : i32
    return %c0_i32, %c0_i32_0, %c0_i32_1 : i32, i32, i32
  }
  func.func @transform_12(%arg0: i32) -> (i32, i32) {
    %c0_i32 = arith.constant 0 : i32
    %c0_i32_0 = arith.constant 0 : i32
    %c0_i32_1 = arith.constant 0 : i32
    return %c0_i32, %c0_i32_0 : i32, i32
  }
  func.func @transform_13(%arg0: i32) -> (i32, i32, i32) {
    %c0_i32 = arith.constant 0 : i32
    %c0_i32_0 = arith.constant 0 : i32
    %c0_i32_1 = arith.constant 0 : i32
    %c0_i32_2 = arith.constant 0 : i32
    return %c0_i32, %c0_i32_0, %c0_i32_1 : i32, i32, i32
  }
  func.func @transform_14(%arg0: i32) -> (i32, i32, i32) {
    %c0_i32 = arith.constant 0 : i32
    %c0_i32_0 = arith.constant 0 : i32
    %c0_i32_1 = arith.constant 0 : i32
    return %arg0, %c0_i32, %c0_i32_0 : i32, i32, i32
  }
  func.func @transform_15(%arg0: i32) -> (i32, i32, i32) {
    %c0_i32 = arith.constant 0 : i32
    %c0_i32_0 = arith.constant 0 : i32
    %c0_i32_1 = arith.constant 0 : i32
    return %arg0, %c0_i32, %c0_i32_0 : i32, i32, i32
  }
}

</mosaic_0001>

<bundles_post_ra>
// kernel: tpu_custom_call.1
= control target key start
LH: loop header
LB: loop body
LE: loop exit
PB: predicated region body
PF: predicated region fallthrough
CT: control target
= control target key end

     0   :  { %21 = vsyncpa [#allocation3], 0  ;;  %s7361_s0 = inlined_call_operand.hbm [shape: f32[1,8,512], index: 0, kind: input, shape index: {}]   ;;  %s7362_s1 = inlined_call_operand.vmem [shape: f32[1,16,512], index: 1, kind: input, shape index: {}]   ;;  %s7363_s2 = inlined_call_operand.vmem [shape: f32[16,8], index: 2, kind: input, shape index: {}]   ;;  %s7364_s3 = inlined_call_operand.vmem [shape: f32[16,1], index: 3, kind: input, shape index: {}]   ;;  %s7365_s4 = inlined_call_operand.hbm [shape: f32[4,16], index: 4, kind: input, shape index: {}]   ;;  %s7366_s5 = inlined_call_operand.vmem [shape: f32[4,1], index: 5, kind: input, shape index: {}]   ;;  %s7367_s6 = inlined_call_operand.vmem [shape: f32[16,4], index: 6, kind: input, shape index: {}]   ;;  %s7368_s7 = inlined_call_operand.vmem [shape: f32[16,1], index: 7, kind: input, shape index: {}]   ;;  %s7369_s8 = inlined_call_operand.vmem [shape: f32[4,16], index: 8, kind: input, shape index: {}]   ;;  %s7370_s9 = inlined_call_operand.vmem [shape: f32[4,1], index: 9, kind: input, shape index: {}]   ;;  %s7371_s10 = inlined_call_operand.vmem [shape: f32[18], index: 10, kind: input, shape index: {}]   ;;  %s7372_s11 = inlined_call_operand.hbm [shape: f32[9,16,16], index: 11, kind: input, shape index: {}]   ;;  %s7373_s12 = inlined_call_operand.vmem [shape: f32[16,1], index: 12, kind: input, shape index: {}]   ;;  %s7374_s13 = inlined_call_operand.vmem [shape: f32[9,1,512], index: 13, kind: input, shape index: {}]   ;;  %s7375_s14 = inlined_call_operand.hbm [shape: f32[1,16,512], index: 14, kind: output, shape index: {0}]   ;;  %s7376_s15 = inlined_call_operand.hbm [shape: f32[1,16,512], index: 15, kind: output, shape index: {1}]  }
   0x1   :  { %22 = vsyncpa [#allocation7], 0 }
   0x2   :  { %23 = vsyncpa [#allocation5], 0 }
   0x3   :  { %24 = vsyncpa [#allocation4], 0 }
   0x4   :  { %25 = vsyncpa [#allocation12], 0  ;;  %s5553_s18 = smov [#allocation6]   ;;  %s5554_s20 = smov [#allocation2]  }
   0x5   :  { %s48_s19 = sshll.u32 %s5553_s18, 4  ;;  %s32_s21 = sshll.u32 %s5554_s20, 4  ;;  %s49_s19 = int_to_ptr.vmem [resolvable:$true] %s48_s19  ;;  %s33_s21 = int_to_ptr.vmem [resolvable:$true] %s32_s21 }
   0x6   :  { %s5437_s22 = scalar_lea.vmem %s49_s19, 64  ;;  %p5442_p1 = scmp.lt.s32.totalorder %s49_s19, %s49_s19 }
   0x7   :  { %p5438_p0 = scmp.ne.s32.totalorder %s49_s19, %s5437_s22  ;;  %p5443_p2 = scmp.lt.s32.totalorder %s5437_s22, %s5437_s22 }
   0x9   :  { %p5444_p3 = por %p5443_p2, %p5442_p1 }
   0xb   :  { %p5445_p4 = pnand %p5444_p3, %p5438_p0 }
   0xd   :  { %5448 = shalt.err (!%p5445_p4)
}
   0xe   :  { %51 = dma.hbm_to_vmem [thread:$0]  %s7365_s4, 64, %s49_s19, [#allocation7]  }
   0xf   :  { %s5457_s25 = scalar_lea.vmem %s33_s21, 512  ;;  %p5462_p6 = scmp.lt.s32.totalorder %s33_s21, %s33_s21 }
  0x10   :  { %p5458_p5 = scmp.ne.s32.totalorder %s33_s21, %s5457_s25  ;;  %p5463_p7 = scmp.lt.s32.totalorder %s5457_s25, %s5457_s25 }
  0x12   :  { %p5464_p8 = por %p5463_p7, %p5462_p6 }
  0x14   :  { %p5465_p9 = pnand %p5464_p8, %p5458_p5 }
  0x16   :  { %5468 = shalt.err (!%p5465_p9)
}
  0x17   :  { %35 = dma.hbm_to_vmem [thread:$0]  %s7361_s0, 512, %s33_s21, [#allocation3]  }
  0x18   :  { %s68_s30 = sshll.u32 %s7371_s10, 4  ;;  %s69_s30 = int_to_ptr.vmem [resolvable:$true] %s68_s30 }
  0x19   :  { %s5469_s16 = scalar_lea.vmem %s69_s30, 16  ;;  %p5474_p11 = scmp.lt.s32.totalorder %s69_s30, %s69_s30 }
  0x1a   :  { %p5470_p10 = scmp.ne.s32.totalorder %s69_s30, %s5469_s16  ;;  %p5475_p12 = scmp.lt.s32.totalorder %s5469_s16, %s5469_s16 }
  0x1c   :  { %p5476_p13 = por %p5475_p12, %p5474_p11 }
  0x1e   :  { %p5477_p0 = pnand %p5476_p13, %p5470_p10 }
  0x20   :  { %5480 = shalt.err (!%p5477_p0)
}
  0x21   :  { %s5555_s4 = smov [#allocation8]   ;;  %s5556_s17 = smov [#allocation9]  }
  0x22   :  { %71 = dma.vmem_to_smem %s69_s30, 16, %s5555_s4, [#allocation5]  }
  0x23   :  { %s77_s18 = sshll.u32 %s5556_s17, 4  ;;  %s78_s18 = int_to_ptr.vmem [resolvable:$true] %s77_s18 }
  0x24   :  { %s5489_s19 = scalar_lea.vmem %s78_s18, 2304  ;;  %p5494_p2 = scmp.lt.s32.totalorder %s78_s18, %s78_s18 }
  0x25   :  { %p5490_p1 = scmp.ne.s32.totalorder %s78_s18, %s5489_s19  ;;  %p5495_p3 = scmp.lt.s32.totalorder %s5489_s19, %s5489_s19 }
  0x27   :  { %p5496_p4 = por %p5495_p3, %p5494_p2 }
  0x29   :  { %p5497_p5 = pnand %p5496_p4, %p5490_p1 }
  0x2b   :  { %5500 = shalt.err (!%p5497_p5)
}
  0x2c   :  { %s5557_s0 = smov 128   ;;  %s5558_s10 = smov 8  }
  0x2d   :  { %83 = dma.hbm_to_vmem [thread:$0]  %s7372_s11, 2304, %s78_s18, [#allocation7], %s5557_s0, %s5557_s0, %s5558_s10  }
  0x2e   :  { %5541 = dma.done.wait [#allocation3], 512  }
  0x2f   :  { %5542 = vsyncadd [#allocation3], 4294966784 }
  0x30   :  { %5543 = dma.done.wait [#allocation7], 64  }
  0x31   :  { %5544 = vsyncadd [#allocation7], 4294967232 }
  0x32   :  { %5545 = dma.done.wait [#allocation5], 16  }
  0x33   :  { %5546 = vsyncadd [#allocation5], 4294967280 }
  0x34   :  { %5547 = dma.done.wait [#allocation7], 2304  }
  0x35   :  { %5548 = vsyncadd [#allocation7], 4294964992 }
  0x36   :  { %100 = sfence }
  0x37   :  { %v102_v0 = vld [vmem:[#allocation2 + $0x8] sm:$0xff]  ;;  %v104_v1 = vld [vmem:[#allocation2 + $0x18] sm:$0xff]  ;;  %v101_v2 = vld [vmem:[#allocation2] sm:$0xff]  ;;  %vm127_vm0 = vcmask 64512   ;;  %v7385_v5 = vmov 0.0   ;;  %v5560_v8 = vmov 0  }
  0x38   :  { %164 = vmatprep.subr.mxu0 %v102_v0  ;;  %241 = vmatprep.subr.mxu1 %v104_v1  ;;  %v103_v3 = vld [vmem:[#allocation2 + $0x10] sm:$0xff]  ;;  %v113_v4 = vld [vmem:[%s7363_s2] sm:$0xff]  ;;  %v116_v6 = vld [vmem:[%s7364_s3 + $0x8] sm:$0xff]  ;;  %vm5561_vm1 = vmmov 0   ;;  %vm313_vm2 = vcmask 7168   ;;  %vm323_vm3 = vcmask 130048  }
  0x39   :  { %165 = vmatpush1.msra.mxu0 %v101_v2  ;;  %198 = vmatprep.mubr.f32.mxu0 %v7385_v5  ;;  %v114_v7 = vld [vmem:[%s7363_s2 + $0x8] sm:$0xff]  ;;  %v115_v9 = vld [vmem:[%s7364_s3] sm:$0xff]  ;;  %vm412_vm4 = vcmask 31744   ;;  %vm419_vm5 = vcmask 1043456   ;;  %v5562_v61 = vmov 1   ;;  %s5563_s22 = smov 17  }
  0x3a   :  { %242 = vmatpush1.msra.mxu1 %v103_v3  ;;  %275 = vmatprep.mubr.f32.mxu1 %v7385_v5  ;;  %v317_v40 = vld [vmem:[%s7366_s5] sm:$0xf]  ;;  %v401_v41 = vld [vmem:[%s7368_s7 + $0x8] sm:$0xff]  ;;  %s5564_s23 = smov 16   ;;  %s5565_s25 = smov 15   ;;  %vm2760_vm14 = vcmask 1040384  }
  0x3b   :  { %5246 = vmatmul.mubr.msk.f32.vlgmr.msra.gmra.mxu0 %vm127_vm0, %v113_v4  ;;  %5248 = vmatmul.mubr.msk.f32.vlgmr.msra.gmra.mxu1 %vm127_vm0, %v113_v4  ;;  %v400_v42 = vld [vmem:[%s7368_s7] sm:$0xff]  ;;  %v399_v60 = vld [vmem:[%s7367_s6 + $0x8] sm:$0xff]  ;;  %s5566_s26 = smov 1   ;;  %s5567_s27 = smov 127  }
  0x3c   :  { %204 = vmatprep.mubr.f32.mxu0 %v7385_v5  ;;  %281 = vmatprep.mubr.f32.mxu1 %v7385_v5  ;;  %v316_v52 = vld [vmem:[#allocation6] sm:$0xf]  ;;  %s5568_s28 = smov 113   ;;  %s5569_s2 = smov 112  }
  0x3d   :  { %5399 = vset.pattern.permute.xlu0 %v5560_v8  ;;  %5365 = vmatprep.subr.mxu0 %v7385_v5  ;;  %v398_v54 = vld [vmem:[%s7367_s6] sm:$0xff]  ;;  %s5570_s18 = smov 111   ;;  %s5309_s19 = sld [smem:[#allocation8 + $0x8]] }
  0x3e   :  { %124 = vperm.xlu0 %5399, %v116_v6   ;;  %5400 = vset.pattern.permute.xlu1 %v5560_v8  ;;  %s2777_s0 = sld [smem:[#allocation8]] }
  0x3f   :  { %5247 = vmatmul.mubr.msk.f32.gmra.mxu0 %vm127_vm0, %v114_v7  ;;  %5249 = vmatmul.mubr.msk.f32.gmra.mxu1 %vm127_vm0, %v114_v7  ;;  %s5300_s10 = sld [smem:[#allocation8 + $0x2]] }
  0x40   :  { %5369 = vmatprep.mubr.msk.f32.mxu0 %vm5561_vm1, %v7385_v5  ;;  %5374 = vmatprep.mubr.msk.f32.mxu1 %vm412_vm4, %v398_v54  ;;  %s5301_s20 = sld [smem:[#allocation8 + $0x3]] }
  0x41   :  { %s6482_s21 = sld [smem:[#allocation8 + $0x4]] }
  0x42   :  { %119 = vperm.xlu0 %5399, %v115_v9   ;;  %s6487_s11 = sld [smem:[#allocation8 + $0x5]] }
  0x43   :  { %s6493_s29 = sld [smem:[#allocation8 + $0x6]] }
  0x44   :  { %s6497_s30 = sld [smem:[#allocation8 + $0x7]] }
  0x45   :  { %s6506_s5 = sld [smem:[#allocation8 + $0xa]] }
  0x46   :  { %5401 = vset.pattern.permute.xlu0 %v5562_v61  ;;  %s6519_s7 = sld [smem:[#allocation8 + $0xb]] }
  0x47   :  { %s6525_s17 = sld [smem:[#allocation8 + $0xc]] }
  0xb9   :  { %v125_v10 = vpop.permute.xlu0 %124 }
  0xbd   :  { %v120_v11 = vpop.permute.xlu0 %119 }
  0xfb   :  { %v200_v12 = vpop.f32.mrf.mxu0  ;;  %v277_v13 = vpop.f32.mrf.mxu1 }
  0xfc   :  { %v5690_v14 = vadd.f32 %v200_v12, %v120_v11  ;;  %v5710_v31 = vadd.f32 %v277_v13, %v120_v11 }
  0xfd   :  { %v202_v15 = vpop.f32.mrf.mxu0  ;;  %v279_v16 = vpop.f32.mrf.mxu1 }
  0xfe   :  { %7421 = vst [vmem:[#allocation19_spill] sm:$0xff] %v5690_v14  ;;  %v5692_v17 = vadd.f32 %v202_v15, %v120_v11  ;;  %v7380_v22 = vmax.f32 %v5690_v14, 0.0  ;;  %7427 = vst [vmem:[#allocation25_spill] sm:$0xff] %v5710_v31  ;;  %v5712_v32 = vadd.f32 %v279_v16, %v120_v11  ;;  %v7378_v36 = vmax.f32 %v5710_v31, 0.0 }
  0xff   :  { %v206_v18 = vpop.f32.mrf.mxu0  ;;  %v283_v19 = vpop.f32.mrf.mxu1 }
 0x100   :  { %7422 = vst [vmem:[#allocation20_spill] sm:$0xff] %v5692_v17  ;;  %v7379_v20 = vmax.f32 %v5692_v17, 0.0  ;;  %v5695_v21 = vadd.f32 %v206_v18, %v125_v10  ;;  %v5698_v25 = vadd.f32 %v283_v19, %v125_v10  ;;  %7428 = vst [vmem:[#allocation26_spill] sm:$0xff] %v5712_v32  ;;  %v7377_v37 = vmax.f32 %v5712_v32, 0.0  ;;  %v109_v18 = vld [vmem:[%s7362_s1 + $0x20] sm:$0xff]  ;;  %v110_v19 = vld [vmem:[%s7362_s1 + $0x28] sm:$0xff] }
 0x101   :  { %v208_v23 = vpop.f32.mrf.mxu0  ;;  %v285_v24 = vpop.f32.mrf.mxu1 }
 0x102   :  { %7423 = vst [vmem:[#allocation21_spill] sm:$0xff] %v5695_v21  ;;  %7424 = vst [vmem:[#allocation22_spill] sm:$0xff] %v5698_v25  ;;  %v5700_v26 = vadd.f32 %v208_v23, %v125_v10  ;;  %v5702_v27 = vadd.f32 %v285_v24, %v125_v10  ;;  %v296_v28 = vadd.f32 %v7379_v20, %v7380_v22  ;;  %v7384_v29 = vmax.f32 %v5695_v21, 0.0  ;;  %v563_v22 = vld [vmem:[%s7374_s13] sm:$0xf]  ;;  %v652_v21 = vld [vmem:[#allocation9 + $0x10] sm:$0xff] }
 0x103   :  { %v7382_v33 = vmax.f32 %v5698_v25, 0.0  ;;  %v305_v39 = vadd.f32 %v7377_v37, %v7378_v36 }
 0x104   :  { %7425 = vst [vmem:[#allocation23_spill] sm:$0xff] %v5700_v26  ;;  %7426 = vst [vmem:[#allocation24_spill] sm:$0xff] %v5702_v27  ;;  %v7383_v30 = vmax.f32 %v5700_v26, 0.0  ;;  %297 = vadd.xlane.f32.xlu0 %v296_v28  ;;  %v7381_v34 = vmax.f32 %v5702_v27, 0.0 }
 0x106   :  { %v299_v35 = vadd.f32 %v7383_v30, %v7384_v29  ;;  %v308_v38 = vadd.f32 %v7381_v34, %v7382_v33  ;;  %v5263_v29 = vld [vmem:[%s7374_s13 + $0x8] sm:$0xf] }
 0x108   :  { %300 = vadd.xlane.f32.xlu1 %v299_v35  ;;  %v112_v35 = vld [vmem:[%s7362_s1 + $0x38] sm:$0xff] }
 0x10c   :  { %309 = vadd.xlane.f32.xlu1 %v308_v38 }
 0x110   :  { %306 = vadd.xlane.f32.xlu1 %v305_v39  ;;  %v111_v39 = vld [vmem:[%s7362_s1 + $0x30] sm:$0xff] }
 0x121   :  { %320 = vperm.xlu1 %5400, %v317_v40  }
 0x125   :  { %409 = vperm.xlu1 %5400, %v401_v41  }
 0x129   :  { %404 = vperm.xlu1 %5400, %v400_v42   ;;  %v106_v42 = vld [vmem:[%s7362_s1 + $0x8] sm:$0xff] }
 0x18d   :  { %v298_v47 = vpop.xlane.xlu0 %297 }
 0x18e   :  { %v303_v50 = vmul.f32 0.00390625, %v298_v47  ;;  %v105_v47 = vld [vmem:[%s7362_s1] sm:$0xff] }
 0x191   :  { %v301_v43 = vpop.xlane.xlu1 %300 }
 0x192   :  { %v304_v45 = vmul.f32 0.00390625, %v301_v43 }
 0x195   :  { %v310_v44 = vpop.xlane.xlu1 %309 }
 0x196   :  { %v312_v46 = vmul.f32 0.00390625, %v310_v44  ;;  %v108_v44 = vld [vmem:[%s7362_s1 + $0x18] sm:$0xff] }
 0x198   :  { %v315_v48 = vsel %vm313_vm2, %v304_v45, %v312_v46 }
 0x199   :  { %5366 = vmatpush3.msra.mxu0 %v315_v48  ;;  %v307_v49 = vpop.xlane.xlu1 %306 }
 0x19a   :  { %v311_v51 = vmul.f32 0.00390625, %v307_v49  ;;  %5367 = vmatprep.subr.mxu0 %v7385_v5  ;;  %v107_v49 = vld [vmem:[%s7362_s1 + $0x10] sm:$0xff] }
 0x19c   :  { %v314_v53 = vsel %vm313_vm2, %v303_v50, %v311_v51  ;;  %v552_v51 = vlaneseq }
 0x19d   :  { %5368 = vmatpush3.msra.mxu0 %v314_v53  ;;  %v321_v55 = vpop.permute.xlu1 %320 }
 0x19e   :  { %5370 = vmatmul.mubr.msk.f32.vlgmr.msra.gmra.mxu0 %vm323_vm3, %v316_v52  ;;  %v566_v52 = vshrl.u32 %v552_v51, 7  ;;  %v5908_v53 = vand.u32 127, %v552_v51 }
 0x19f   :  { %724 = vmatprep.mubr.f32.mxu0 %v7385_v5 }
 0x1a0   :  { %v5910_v54 = vsub.s32 1, %v566_v52  ;;  %vm611_vm6 = vcmp.lt.s32.totalorder %v5908_v53, 16  ;;  %vm554_vm7 = vcmp.lt.s32.totalorder %v5908_v53, 17  ;;  %vm990_vm8 = vcmp.lt.s32.totalorder %v5908_v53, 15 }
 0x1a1   :  { %v410_v62 = vpop.permute.xlu1 %409  ;;  %vm1217_vm9 = vcmp.lt.s32.totalorder %v5908_v53, 1  ;;  %vm1615_vm10 = vcmp.lt.s32.totalorder %v5908_v53, 127  ;;  %vm1842_vm11 = vcmp.lt.s32.totalorder %v5908_v53, 113  ;;  %vm2069_vm12 = vcmp.lt.s32.totalorder %v5908_v53, 112 }
 0x1a2   :  { %vm2296_vm13 = vcmp.lt.s32.totalorder %v5908_v53, 111 }
 0x1a5   :  { %v405_v1 = vpop.permute.xlu1 %404 }
 0x25e   :  { %v393_v56 = vpop.f32.mrf.mxu0 }
 0x25f   :  { %v394_v57 = vadd.f32 %v393_v56, %v321_v55  ;;  %v5254_v55 = vld [vmem:[%s7374_s13 + $0x4] sm:$0xf] }
 0x260   :  { %v5371_v58 = vpop.f32.mrf.mxu0 }
 0x261   :  { %v397_v59 = vmax.f32 %v394_v57, 0.0  ;;  %v630_v58 = vrot.slane %v5254_v55, %v5910_v54 }
 0x263   :  { %5372 = vmatprep.subr.msk.mxu1 %vm419_vm5, %v397_v59 }
 0x264   :  { %5373 = vmatpush3.msk.msra.mxu1 %vm419_vm5, %v397_v59 }
 0x265   :  { %5375 = vmatmul.mubr.msk.f32.vlgmr.msra.gmra.mxu1 %vm412_vm4, %v399_v60 }
 0x266   :  { %801 = vmatprep.mubr.f32.mxu1 %v7385_v5 }
 0x325   :  { %v5376_v63 = vpop.f32.mrf.mxu1 }
 0x326   :  { %v495_v0 = vadd.f32 %v5376_v63, %v410_v62  ;;  %v5927_v62 = vsub.s32 0, %v566_v52 }
 0x327   :  { %v489_v2 = vpop.f32.mrf.mxu1 }
 0x328   :  { %v499_v3 = vsub.f32 0.0, %v495_v0  ;;  %v490_v4 = vadd.f32 %v489_v2, %v405_v1  ;;  %v5929_v0 = vsub.s32 3, %v566_v52  ;;  %v5931_v1 = vsub.s32 2, %v566_v52 }
 0x329   :  { %v568_v33 = vrot.slane %v563_v22, %v5927_v62 }
 0x32a   :  { %v502_v6 = vmul.f32 1.442695, %v499_v3  ;;  %v498_v7 = vsub.f32 0.0, %v490_v4  ;;  %v5938_v4 = vrot.slane %v5254_v55, %v5927_v62  ;;  %v580_v32 = vrot.slane %v563_v22, %v5929_v0 }
 0x32c   :  { %5405 = vpow2.f32 %v502_v6  ;;  %v500_v9 = vmul.f32 1.442695, %v498_v7  ;;  %v5941_v6 = vrot.slane %v5254_v55, %v5929_v0  ;;  %v5944_v7 = vrot.slane %v5254_v55, %v5931_v1 }
 0x32e   :  { %5407 = vpow2.f32 %v500_v9 }
 0x339   :  { %v5406_v10 = vpop.eup %5405 }
 0x33a   :  { %v505_v11 = vadd.f32 1.0, %v5406_v10 }
 0x33b   :  { %v5408_v12 = vpop.eup %5407 }
 0x33c   :  { %5409 = vrcp.f32 %v505_v11  ;;  %v504_v13 = vadd.f32 1.0, %v5408_v12 }
 0x33e   :  { %5411 = vrcp.f32 %v504_v13 }
 0x349   :  { %v5410_v15 = vpop.eup %5409 }
 0x34a   :  { %525 = vperm.xlu0 %5401, %v5410_v15   ;;  %517 = vperm.xlu1 %5400, %v5410_v15  }
 0x34b   :  { %v5412_v16 = vpop.eup %5411 }
 0x34e   :  { %512 = vperm.xlu1 %5400, %v5412_v16   ;;  %5404 = vset.pattern.permute.xlu0 %v5560_v8 }
 0x352   :  { %5402 = vset.pattern.permute.xlu1 %v5562_v61 }
 0x353   :  { %521 = vperm.xlu1 %5402, %v5412_v16  }
 0x357   :  { %5403 = vset.pattern.permute.xlu1 %v5560_v8 }
 0x3c5   :  { %v518_v23 = vpop.permute.xlu1 %517  ;;  %v526_v38 = vpop.permute.xlu0 %525 }
 0x3c6   :  { %v5760_v24 = vmul.f32 %v518_v23, %v109_v18  ;;  %v5762_v28 = vmul.f32 %v518_v23, %v110_v19  ;;  %v5771_v8 = vmul.f32 %v526_v38, %v112_v35  ;;  %v5780_v40 = vmul.f32 %v526_v38, %v111_v39 }
 0x3c8   :  { %542 = vrot.lane.b32.xlu0 %v5762_v28, %s5563_s22  ;;  %597 = vrot.lane.b32.xlu1 %v5760_v24, %s5564_s23 }
 0x3c9   :  { %v513_v41 = vpop.permute.xlu1 %512 }
 0x3ca   :  { %v5825_v43 = vmul.f32 %v513_v41, %v106_v42  ;;  %v5851_v48 = vmul.f32 %v513_v41, %v105_v47 }
 0x3cc   :  { %550 = vrot.lane.b32.xlu0 %v5771_v8, %s5563_s22  ;;  %601 = vrot.lane.b32.xlu1 %v5762_v28, %s5564_s23 }
 0x3ce   :  { %v522_v45 = vpop.permute.xlu1 %521 }
 0x3cf   :  { %v5834_v46 = vmul.f32 %v522_v45, %v108_v44  ;;  %v5864_v50 = vmul.f32 %v522_v45, %v107_v49  ;;  %v2544_v45 = vld [vmem:[%s7370_s9] sm:$0xf]  ;;  %s5299_s9 = sld [smem:[#allocation8 + $0x1]] }
 0x3d0   :  { %980 = vrot.lane.b32.xlu0 %v5762_v28, %s5565_s25  ;;  %605 = vrot.lane.b32.xlu1 %v5780_v40, %s5564_s23 }
 0x3d4   :  { %988 = vrot.lane.b32.xlu0 %v5771_v8, %s5565_s25  ;;  %609 = vrot.lane.b32.xlu1 %v5771_v8, %s5564_s23 }
 0x3d8   :  { %1207 = vrot.lane.b32.xlu0 %v5762_v28, %s5566_s26  ;;  %538 = vrot.lane.b32.xlu1 %v5760_v24, %s5563_s22 }
 0x3dc   :  { %1215 = vrot.lane.b32.xlu0 %v5771_v8, %s5566_s26  ;;  %546 = vrot.lane.b32.xlu1 %v5780_v40, %s5563_s22 }
 0x3e0   :  { %1605 = vrot.lane.b32.xlu0 %v5762_v28, %s5567_s27  ;;  %976 = vrot.lane.b32.xlu1 %v5760_v24, %s5565_s25 }
 0x3e4   :  { %1613 = vrot.lane.b32.xlu0 %v5771_v8, %s5567_s27  ;;  %984 = vrot.lane.b32.xlu1 %v5780_v40, %s5565_s25 }
 0x3e8   :  { %1832 = vrot.lane.b32.xlu0 %v5762_v28, %s5568_s28  ;;  %1203 = vrot.lane.b32.xlu1 %v5760_v24, %s5566_s26 }
 0x3ec   :  { %1840 = vrot.lane.b32.xlu0 %v5771_v8, %s5568_s28  ;;  %1211 = vrot.lane.b32.xlu1 %v5780_v40, %s5566_s26 }
 0x3f0   :  { %2059 = vrot.lane.b32.xlu0 %v5762_v28, %s5569_s2  ;;  %1601 = vrot.lane.b32.xlu1 %v5760_v24, %s5567_s27 }
 0x3f4   :  { %2067 = vrot.lane.b32.xlu0 %v5771_v8, %s5569_s2  ;;  %1609 = vrot.lane.b32.xlu1 %v5780_v40, %s5567_s27 }
 0x3f8   :  { %1828 = vrot.lane.b32.xlu1 %v5760_v24, %s5568_s28  ;;  %540 = vrot.lane.b32.xlu0 %v5825_v43, %s5563_s22 }
 0x3fc   :  { %1836 = vrot.lane.b32.xlu1 %v5780_v40, %s5568_s28  ;;  %548 = vrot.lane.b32.xlu0 %v5834_v46, %s5563_s22 }
 0x400   :  { %2055 = vrot.lane.b32.xlu1 %v5760_v24, %s5569_s2  ;;  %978 = vrot.lane.b32.xlu0 %v5825_v43, %s5565_s25 }
 0x404   :  { %2063 = vrot.lane.b32.xlu1 %v5780_v40, %s5569_s2  ;;  %986 = vrot.lane.b32.xlu0 %v5834_v46, %s5565_s25 }
 0x408   :  { %595 = vrot.lane.b32.xlu1 %v5851_v48, %s5564_s23  ;;  %1205 = vrot.lane.b32.xlu0 %v5825_v43, %s5566_s26 }
 0x40c   :  { %599 = vrot.lane.b32.xlu1 %v5825_v43, %s5564_s23  ;;  %1213 = vrot.lane.b32.xlu0 %v5834_v46, %s5566_s26 }
 0x410   :  { %2286 = vrot.lane.b32.xlu0 %v5762_v28, %s5570_s18  ;;  %603 = vrot.lane.b32.xlu1 %v5864_v50, %s5564_s23 }
 0x414   :  { %2294 = vrot.lane.b32.xlu0 %v5771_v8, %s5570_s18  ;;  %607 = vrot.lane.b32.xlu1 %v5834_v46, %s5564_s23 }
 0x418   :  { %1603 = vrot.lane.b32.xlu0 %v5825_v43, %s5567_s27  ;;  %536 = vrot.lane.b32.xlu1 %v5851_v48, %s5563_s22 }
 0x41c   :  { %1611 = vrot.lane.b32.xlu0 %v5834_v46, %s5567_s27  ;;  %544 = vrot.lane.b32.xlu1 %v5864_v50, %s5563_s22 }
 0x420   :  { %1830 = vrot.lane.b32.xlu0 %v5825_v43, %s5568_s28  ;;  %974 = vrot.lane.b32.xlu1 %v5851_v48, %s5565_s25 }
 0x424   :  { %1838 = vrot.lane.b32.xlu0 %v5834_v46, %s5568_s28  ;;  %982 = vrot.lane.b32.xlu1 %v5864_v50, %s5565_s25 }
 0x428   :  { %2057 = vrot.lane.b32.xlu0 %v5825_v43, %s5569_s2  ;;  %1201 = vrot.lane.b32.xlu1 %v5851_v48, %s5566_s26 }
 0x42c   :  { %2065 = vrot.lane.b32.xlu0 %v5834_v46, %s5569_s2  ;;  %1209 = vrot.lane.b32.xlu1 %v5864_v50, %s5566_s26 }
 0x430   :  { %2284 = vrot.lane.b32.xlu0 %v5825_v43, %s5570_s18  ;;  %2282 = vrot.lane.b32.xlu1 %v5760_v24, %s5570_s18 }
 0x434   :  { %2292 = vrot.lane.b32.xlu0 %v5834_v46, %s5570_s18  ;;  %2290 = vrot.lane.b32.xlu1 %v5780_v40, %s5570_s18 }
 0x438   :  { %1599 = vrot.lane.b32.xlu1 %v5851_v48, %s5567_s27 }
 0x43a   :  { %v5915_v56 = vpop.permute.xlu0 %542  ;;  %v598_v57 = vpop.permute.xlu1 %597 }
 0x43c   :  { %1607 = vrot.lane.b32.xlu1 %v5864_v50, %s5567_s27 }
 0x43e   :  { %v5921_v59 = vpop.permute.xlu0 %550  ;;  %v602_v60 = vpop.permute.xlu1 %601 }
 0x43f   :  { %v617_v61 = vsel %vm611_vm6, %v598_v57, %v602_v60 }
 0x440   :  { %1826 = vrot.lane.b32.xlu1 %v5851_v48, %s5568_s28  ;;  %v648_v63 = vmul.f32 %v630_v58, %v617_v61 }
 0x442   :  { %v5933_v2 = vpop.permute.xlu0 %980  ;;  %688 = vmatprep.subr.mxu0 %v648_v63  ;;  %v606_v3 = vpop.permute.xlu1 %605 }
 0x443   :  { %v615_v9 = vsel %vm611_vm6, %v602_v60, %v606_v3 }
 0x444   :  { %1834 = vrot.lane.b32.xlu1 %v5864_v50, %s5568_s28  ;;  %v649_v18 = vmul.f32 %v5944_v7, %v615_v9 }
 0x446   :  { %v5948_v10 = vpop.permute.xlu0 %988  ;;  %v610_v11 = vpop.permute.xlu1 %609 }
 0x447   :  { %v613_v12 = vsel %vm611_vm6, %v606_v3, %v610_v11  ;;  %v619_v13 = vsel %vm611_vm6, %v610_v11, %v598_v57 }
 0x448   :  { %v647_v15 = vmul.f32 %v5938_v4, %v619_v13  ;;  %2053 = vrot.lane.b32.xlu1 %v5851_v48, %s5569_s2  ;;  %v650_v16 = vmul.f32 %v5941_v6, %v613_v12 }
 0x44a   :  { %v5959_v19 = vpop.permute.xlu0 %1207  ;;  %689 = vmatpush1.msra.mxu0 %v647_v15  ;;  %765 = vmatprep.subr.mxu1 %v650_v16  ;;  %v539_v23 = vpop.permute.xlu1 %538 }
 0x44b   :  { %766 = vmatpush1.msra.mxu1 %v649_v18  ;;  %v560_v30 = vsel %vm554_vm7, %v539_v23, %v5915_v56  ;;  %v562_v31 = vsel %vm554_vm7, %v5921_v59, %v539_v23 }
 0x44c   :  { %2061 = vrot.lane.b32.xlu1 %v5864_v50, %s5569_s2 }
 0x44e   :  { %v5963_v35 = vpop.permute.xlu0 %1215  ;;  %v547_v38 = vpop.permute.xlu1 %546 }
 0x44f   :  { %v556_v17 = vsel %vm554_vm7, %v547_v38, %v5921_v59  ;;  %v558_v23 = vsel %vm554_vm7, %v5915_v56, %v547_v38  ;;  %v7430_v38 = vmov 0.0  }
 0x450   :  { %2280 = vrot.lane.b32.xlu1 %v5851_v48, %s5570_s18 }
 0x452   :  { %v5967_v39 = vpop.permute.xlu0 %1605  ;;  %v5969_v41 = vpop.permute.xlu1 %976 }
 0x454   :  { %2288 = vrot.lane.b32.xlu1 %v5864_v50, %s5570_s18 }
 0x456   :  { %v5973_v42 = vpop.permute.xlu0 %1613  ;;  %v5975_v44 = vpop.permute.xlu1 %984 }
 0x458   :  { %2547 = vperm.xlu1 %5403, %v2544_v45  }
 0x45a   :  { %v5980_v47 = vpop.permute.xlu0 %1832  ;;  %v5982_v49 = vpop.permute.xlu1 %1203 }
 0x45e   :  { %v5984_v51 = vpop.permute.xlu0 %1840  ;;  %v5986_v52 = vpop.permute.xlu1 %1211 }
 0x462   :  { %v5988_v55 = vpop.permute.xlu0 %2059  ;;  %v5990_v57 = vpop.permute.xlu1 %1601 }
 0x463   :  { %7429 = vst [vmem:[#allocation27_spill] sm:$0xff] %v5988_v55  ;;  %v589_v55 = vmul.f32 %v568_v33, %v562_v31  ;;  %v653_v31 = vld [vmem:[#allocation9 + $0x18] sm:$0xff] }
 0x466   :  { %v5992_v60 = vpop.permute.xlu0 %2067  ;;  %v5994_v61 = vpop.permute.xlu1 %1609 }
 0x46a   :  { %v5996_v63 = vpop.permute.xlu0 %540  ;;  %v5998_v3 = vpop.permute.xlu1 %1828 }
 0x46e   :  { %v6000_v9 = vpop.permute.xlu0 %548  ;;  %v6002_v11 = vpop.permute.xlu1 %1836 }
 0x472   :  { %v6004_v12 = vpop.permute.xlu1 %2055  ;;  %v6006_v13 = vpop.permute.xlu0 %978 }
 0x476   :  { %v6008_v15 = vpop.permute.xlu1 %2063  ;;  %v6010_v16 = vpop.permute.xlu0 %986 }
 0x47a   :  { %v596_v18 = vpop.permute.xlu1 %595  ;;  %v6014_v36 = vpop.permute.xlu0 %1205 }
 0x47e   :  { %v600_v45 = vpop.permute.xlu1 %599  ;;  %v6027_v5 = vpop.permute.xlu0 %1213 }
 0x47f   :  { %v616_v37 = vsel %vm611_vm6, %v596_v18, %v600_v45 }
 0x480   :  { %v644_v20 = vmul.f32 %v630_v58, %v616_v37 }
 0x482   :  { %690 = vmatprep.subr.mxu0 %v644_v20  ;;  %v604_v34 = vpop.permute.xlu1 %603  ;;  %v572_v20 = vrot.slane %v563_v22, %v5910_v54 }
 0x483   :  { %v614_v37 = vsel %vm611_vm6, %v600_v45, %v604_v34  ;;  %v576_v45 = vrot.slane %v563_v22, %v5931_v1 }
 0x484   :  { %v645_v59 = vmul.f32 %v5944_v7, %v614_v37  ;;  %v590_v22 = vmul.f32 %v572_v20, %v560_v30  ;;  %v998_v7 = vsel %vm990_vm8, %v5948_v10, %v5969_v41 }
 0x486   :  { %v608_v58 = vpop.permute.xlu1 %607 }
 0x487   :  { %v612_v14 = vsel %vm611_vm6, %v604_v34, %v608_v58  ;;  %v618_v27 = vsel %vm611_vm6, %v608_v58, %v596_v18  ;;  %v1009_v34 = vrot.slane %v5263_v29, %v5910_v54  ;;  %v592_v58 = vmul.f32 %v580_v32, %v556_v17 }
 0x488   :  { %v643_v25 = vmul.f32 %v5938_v4, %v618_v27  ;;  %v646_v26 = vmul.f32 %v5941_v6, %v612_v14  ;;  %v996_v14 = vsel %vm990_vm8, %v5969_v41, %v5933_v2  ;;  %v1005_v4 = vrot.slane %v5263_v29, %v5927_v62 }
 0x489   :  { %v1013_v6 = vrot.slane %v5263_v29, %v5931_v1  ;;  %v1027_v37 = vmul.f32 %v1009_v34, %v996_v14  ;;  %v1223_v14 = vsel %vm1217_vm9, %v5982_v49, %v5959_v19 }
 0x48a   :  { %691 = vmatpush1.msra.mxu0 %v643_v25  ;;  %767 = vmatprep.subr.mxu1 %v646_v26  ;;  %v537_v18 = vpop.permute.xlu1 %536  ;;  %v591_v25 = vmul.f32 %v576_v45, %v558_v23  ;;  %v6063_v26 = vpop.permute.xlu0 %2286 }
 0x48b   :  { %v559_v27 = vsel %vm554_vm7, %v537_v18, %v5996_v63  ;;  %v561_v56 = vsel %vm554_vm7, %v6000_v9, %v537_v18  ;;  %5255 = vmatmul.mubr.msk.f32.vlgmr.msra.gmra.mxu0 %vm323_vm3, %v652_v21  ;;  %768 = vmatpush1.msra.mxu1 %v645_v59  ;;  %v593_v18 = vld [vmem:[#allocation9] sm:$0xff] }
 0x48c   :  { %v585_v17 = vmul.f32 %v568_v33, %v561_v56  ;;  %848 = vmatprep.subr.mxu0 %v590_v22  ;;  %5257 = vmatmul.mubr.msk.f32.vlgmr.msra.gmra.mxu1 %vm323_vm3, %v652_v21  ;;  %v586_v30 = vmul.f32 %v572_v20, %v559_v27  ;;  %v1017_v21 = vrot.slane %v5263_v29, %v5929_v0 }
 0x48d   :  { %849 = vmatpush1.msra.mxu0 %v589_v55  ;;  %925 = vmatprep.subr.mxu1 %v592_v58  ;;  %v994_v20 = vsel %vm990_vm8, %v5933_v2, %v5975_v44  ;;  %v5268_v55 = vld [vmem:[%s7374_s13 + $0xc] sm:$0xf]  ;;  %v992_v29 = vsel %vm990_vm8, %v5975_v44, %v5948_v10 }
 0x48e   :  { %926 = vmatpush1.msra.mxu1 %v591_v25  ;;  %730 = vmatprep.mubr.f32.mxu0 %v7430_v38  ;;  %v545_v33 = vpop.permute.xlu1 %544  ;;  %v6095_v22 = vpop.permute.xlu0 %2294  ;;  %v1236_v10 = vrot.slane %v5268_v55, %v5910_v54  ;;  %v594_v25 = vld [vmem:[#allocation9 + $0x8] sm:$0xff] }
 0x48f   :  { %850 = vmatprep.subr.mxu0 %v586_v30  ;;  %v555_v41 = vsel %vm554_vm7, %v545_v33, %v6000_v9  ;;  %v557_v23 = vsel %vm554_vm7, %v5996_v63, %v545_v33  ;;  %5256 = vmatmul.mubr.msk.f32.gmra.mxu0 %vm323_vm3, %v653_v31  ;;  %v1026_v9 = vmul.f32 %v1005_v4, %v998_v7 }
 0x490   :  { %v587_v2 = vmul.f32 %v576_v45, %v557_v23  ;;  %807 = vmatprep.mubr.f32.mxu1 %v7430_v38  ;;  %851 = vmatpush1.msra.mxu0 %v585_v17  ;;  %v588_v59 = vmul.f32 %v580_v32, %v555_v41  ;;  %v1028_v63 = vmul.f32 %v1013_v6, %v994_v20 }
 0x491   :  { %5258 = vmatmul.mubr.msk.f32.gmra.mxu1 %vm323_vm3, %v653_v31  ;;  %1067 = vmatprep.subr.mxu0 %v1027_v37  ;;  %v1029_v45 = vmul.f32 %v1017_v21, %v992_v29  ;;  %v1232_v17 = vrot.slane %v5268_v55, %v5927_v62  ;;  %v1225_v30 = vsel %vm1217_vm9, %v5963_v35, %v5982_v49 }
 0x492   :  { %884 = vmatprep.mubr.f32.mxu0 %v7430_v38  ;;  %927 = vmatprep.subr.mxu1 %v588_v59  ;;  %v975_v58 = vpop.permute.xlu1 %974  ;;  %v1240_v31 = vrot.slane %v5268_v55, %v5931_v1  ;;  %v1244_v7 = vrot.slane %v5268_v55, %v5929_v0  ;;  %v1254_v49 = vmul.f32 %v1236_v10, %v1223_v14  ;;  %v6131_v20 = vpop.permute.xlu0 %1603  ;;  %v1032_v59 = vld [vmem:[#allocation9 + $0x28] sm:$0xff] }
 0x493   :  { %v995_v32 = vsel %vm990_vm8, %v975_v58, %v6006_v13  ;;  %v997_v44 = vsel %vm990_vm8, %v6010_v16, %v975_v58  ;;  %5259 = vmatmul.mubr.msk.f32.vlgmr.msra.gmra.mxu0 %vm323_vm3, %v593_v18  ;;  %928 = vmatpush1.msra.mxu1 %v587_v2  ;;  %v1219_v37 = vsel %vm1217_vm9, %v5986_v52, %v5963_v35 }
 0x494   :  { %v1022_v27 = vmul.f32 %v1005_v4, %v997_v44  ;;  %961 = vmatprep.mubr.f32.mxu1 %v7430_v38  ;;  %1068 = vmatpush1.msra.mxu0 %v1026_v9  ;;  %v1023_v56 = vmul.f32 %v1009_v34, %v995_v32  ;;  %v1253_v23 = vmul.f32 %v1232_v17, %v1225_v30  ;;  %v1258_v44 = vld [vmem:[#allocation9 + $0x30] sm:$0xff] }
 0x495   :  { %5261 = vmatmul.mubr.msk.f32.vlgmr.msra.gmra.mxu1 %vm323_vm3, %v593_v18  ;;  %1144 = vmatprep.subr.mxu1 %v1029_v45  ;;  %v5277_v45 = vld [vmem:[%s7374_s13 + $0x14] sm:$0xf]  ;;  %v1619_v14 = vsel %vm1615_vm10, %v5967_v39, %v5994_v61 }
 0x496   :  { %1145 = vmatpush1.msra.mxu1 %v1028_v63  ;;  %890 = vmatprep.mubr.f32.mxu0 %v7430_v38  ;;  %v983_v4 = vpop.permute.xlu1 %982  ;;  %v6149_v18 = vpop.permute.xlu0 %1611 }
 0x497   :  { %1069 = vmatprep.subr.mxu0 %v1023_v56  ;;  %v991_v34 = vsel %vm990_vm8, %v983_v4, %v6010_v16  ;;  %v993_v33 = vsel %vm990_vm8, %v6006_v13, %v983_v4  ;;  %5260 = vmatmul.mubr.msk.f32.gmra.mxu0 %vm323_vm3, %v594_v25  ;;  %v1031_v16 = vld [vmem:[#allocation9 + $0x20] sm:$0xff]  ;;  %v1221_v13 = vsel %vm1217_vm9, %v5959_v19, %v5986_v52 }
 0x498   :  { %v1024_v55 = vmul.f32 %v1013_v6, %v993_v33  ;;  %967 = vmatprep.mubr.f32.mxu1 %v7430_v38  ;;  %1070 = vmatpush1.msra.mxu0 %v1022_v27  ;;  %v1025_v41 = vmul.f32 %v1017_v21, %v991_v34  ;;  %v1256_v19 = vmul.f32 %v1244_v7, %v1219_v37 }
 0x499   :  { %5262 = vmatmul.mubr.msk.f32.gmra.mxu1 %vm323_vm3, %v594_v25  ;;  %1294 = vmatprep.subr.mxu0 %v1254_v49  ;;  %v1255_v52 = vmul.f32 %v1240_v31, %v1221_v13  ;;  %v1642_v56 = vrot.slane %v5277_v45, %v5929_v0  ;;  %v1623_v25 = vsel %vm1615_vm10, %v5973_v42, %v5990_v57 }
 0x49a   :  { %1103 = vmatprep.mubr.f32.mxu0 %v7430_v38  ;;  %1146 = vmatprep.subr.mxu1 %v1025_v41  ;;  %v1202_v35 = vpop.permute.xlu1 %1201  ;;  %v6175_v27 = vpop.permute.xlu0 %1830  ;;  %v1630_v4 = vrot.slane %v5277_v45, %v5927_v62  ;;  %v1638_v33 = vrot.slane %v5277_v45, %v5931_v1 }
 0x49b   :  { %v1222_v6 = vsel %vm1217_vm9, %v1202_v35, %v6014_v36  ;;  %v1224_v21 = vsel %vm1217_vm9, %v6027_v5, %v1202_v35  ;;  %5264 = vmatmul.mubr.msk.f32.vlgmr.msra.gmra.mxu0 %vm323_vm3, %v1031_v16  ;;  %1147 = vmatpush1.msra.mxu1 %v1024_v55  ;;  %v1654_v34 = vmul.f32 %v1642_v56, %v1623_v25  ;;  %v1429_v55 = vld [vmem:[#allocation9 + $0x40] sm:$0xff]  ;;  %v1430_v35 = vld [vmem:[#allocation9 + $0x48] sm:$0xff] }
 0x49c   :  { %v1249_v29 = vmul.f32 %v1232_v17, %v1224_v21  ;;  %1180 = vmatprep.mubr.f32.mxu1 %v7430_v38  ;;  %1295 = vmatpush1.msra.mxu0 %v1253_v23  ;;  %v1250_v2 = vmul.f32 %v1236_v10, %v1222_v6 }
 0x49d   :  { %5266 = vmatmul.mubr.msk.f32.vlgmr.msra.gmra.mxu1 %vm323_vm3, %v1031_v16  ;;  %1371 = vmatprep.subr.mxu1 %v1256_v19  ;;  %v5282_v16 = vld [vmem:[%s7374_s13 + $0x18] sm:$0xf] }
 0x49e   :  { %1372 = vmatpush1.msra.mxu1 %v1255_v52  ;;  %1109 = vmatprep.mubr.f32.mxu0 %v7430_v38  ;;  %v1210_v9 = vpop.permute.xlu1 %1209  ;;  %v6201_v49 = vpop.permute.xlu0 %1838  ;;  %v1869_v19 = vrot.slane %v5282_v16, %v5929_v0  ;;  %v1861_v52 = vrot.slane %v5282_v16, %v5910_v54 }
 0x49f   :  { %1296 = vmatprep.subr.mxu0 %v1250_v2  ;;  %v1218_v63 = vsel %vm1217_vm9, %v1210_v9, %v6027_v5  ;;  %v1220_v58 = vsel %vm1217_vm9, %v6014_v36, %v1210_v9  ;;  %5265 = vmatmul.mubr.msk.f32.gmra.mxu0 %vm323_vm3, %v1032_v59  ;;  %v1634_v36 = vrot.slane %v5277_v45, %v5910_v54 }
 0x4a0   :  { %v1251_v10 = vmul.f32 %v1240_v31, %v1220_v58  ;;  %1186 = vmatprep.mubr.f32.mxu1 %v7430_v38  ;;  %1297 = vmatpush1.msra.mxu0 %v1249_v29  ;;  %v1252_v32 = vmul.f32 %v1244_v7, %v1218_v63  ;;  %v1259_v31 = vld [vmem:[#allocation9 + $0x38] sm:$0xff]  ;;  %v1621_v7 = vsel %vm1615_vm10, %v5990_v57, %v5967_v39 }
 0x4a1   :  { %5267 = vmatmul.mubr.msk.f32.gmra.mxu1 %vm323_vm3, %v1032_v59  ;;  %1465 = vmatprep.subr.mxu0 %v5762_v28  ;;  %v1652_v17 = vmul.f32 %v1634_v36, %v1619_v14  ;;  %v1617_v39 = vsel %vm1615_vm10, %v5994_v61, %v5973_v42  ;;  %v1651_v41 = vmul.f32 %v1630_v4, %v1621_v7 }
 0x4a2   :  { %1330 = vmatprep.mubr.f32.mxu0 %v7430_v38  ;;  %1373 = vmatprep.subr.mxu1 %v1252_v32  ;;  %v6167_v5 = vpop.permute.xlu1 %2282  ;;  %v1653_v42 = vmul.f32 %v1638_v33, %v1617_v39  ;;  %v1850_v29 = vsel %vm1842_vm11, %v5984_v51, %v5998_v3  ;;  %v6236_v2 = vpop.permute.xlu0 %2057  ;;  %v1857_v9 = vrot.slane %v5282_v16, %v5927_v62 }
 0x4a3   :  { %5269 = vmatmul.mubr.msk.f32.vlgmr.msra.gmra.mxu0 %vm323_vm3, %v1258_v44  ;;  %1374 = vmatpush1.msra.mxu1 %v1251_v10  ;;  %v1848_v58 = vsel %vm1842_vm11, %v5998_v3, %v5980_v47  ;;  %v1865_v10 = vrot.slane %v5282_v16, %v5931_v1  ;;  %v1844_v45 = vsel %vm1842_vm11, %v6002_v11, %v5984_v51 }
 0x4a4   :  { %1407 = vmatprep.mubr.f32.mxu1 %v7430_v38  ;;  %1466 = vmatpush1.msra.mxu0 %v5760_v24  ;;  %v1881_v3 = vmul.f32 %v1869_v19, %v1850_v29 }
 0x4a5   :  { %5271 = vmatmul.mubr.msk.f32.vlgmr.msra.gmra.mxu1 %vm323_vm3, %v1258_v44  ;;  %1467 = vmatprep.subr.mxu0 %v5825_v43  ;;  %v1656_v44 = vld [vmem:[#allocation9 + $0x50] sm:$0xff] }
 0x4a6   :  { %1542 = vmatprep.subr.mxu1 %v5771_v8  ;;  %1468 = vmatpush1.msra.mxu0 %v5851_v48  ;;  %v6188_v30 = vpop.permute.xlu1 %2290  ;;  %v2066_v25 = vpop.permute.xlu0 %2065 }
 0x4a7   :  { %1543 = vmatpush1.msra.mxu1 %v5780_v40  ;;  %1336 = vmatprep.mubr.f32.mxu0 %v7430_v38 }
 0x4a8   :  { %1544 = vmatprep.subr.mxu1 %v5834_v46  ;;  %1692 = vmatprep.subr.mxu0 %v1652_v17 }
 0x4a9   :  { %5270 = vmatmul.mubr.msk.f32.gmra.mxu0 %vm323_vm3, %v1259_v31  ;;  %1413 = vmatprep.mubr.f32.mxu1 %v7430_v38 }
 0x4aa   :  { %1545 = vmatpush1.msra.mxu1 %v5864_v50  ;;  %1501 = vmatprep.mubr.f32.mxu0 %v7430_v38  ;;  %v1600_v37 = vpop.permute.xlu1 %1599 }
 0x4ab   :  { %5272 = vmatmul.mubr.msk.f32.gmra.mxu1 %vm323_vm3, %v1259_v31  ;;  %1769 = vmatprep.subr.mxu1 %v1654_v34  ;;  %v1622_v57 = vsel %vm1615_vm10, %v6149_v18, %v1600_v37  ;;  %v1620_v61 = vsel %vm1615_vm10, %v1600_v37, %v6131_v20 }
 0x4ac   :  { %1578 = vmatprep.mubr.f32.mxu1 %v7430_v38  ;;  %v1650_v13 = vmul.f32 %v1642_v56, %v1622_v57  ;;  %v1647_v63 = vmul.f32 %v1630_v4, %v1620_v61  ;;  %v1878_v56 = vmul.f32 %v1857_v9, %v1848_v58  ;;  %v1657_v4 = vld [vmem:[#allocation9 + $0x58] sm:$0xff] }
 0x4ad   :  { %5273 = vmatmul.mubr.msk.f32.vlgmr.msra.gmra.mxu0 %vm323_vm3, %v1429_v55 }
 0x4ae   :  { %1693 = vmatpush1.msra.mxu0 %v1651_v41  ;;  %1507 = vmatprep.mubr.f32.mxu0 %v7430_v38  ;;  %v1608_v23 = vpop.permute.xlu1 %1607 }
 0x4af   :  { %5275 = vmatmul.mubr.msk.f32.vlgmr.msra.gmra.mxu1 %vm323_vm3, %v1429_v55  ;;  %v1616_v6 = vsel %vm1615_vm10, %v1608_v23, %v6149_v18  ;;  %v1618_v21 = vsel %vm1615_vm10, %v6131_v20, %v1608_v23  ;;  %v1846_v20 = vsel %vm1842_vm11, %v5980_v47, %v6002_v11  ;;  %v1880_v11 = vmul.f32 %v1865_v10, %v1844_v45  ;;  %v1883_v23 = vld [vmem:[#allocation9 + $0x60] sm:$0xff] }
 0x4b0   :  { %1770 = vmatpush1.msra.mxu1 %v1653_v42  ;;  %v1649_v59 = vmul.f32 %v1638_v33, %v1616_v6  ;;  %1584 = vmatprep.mubr.f32.mxu1 %v7430_v38  ;;  %v1648_v18 = vmul.f32 %v1634_v36, %v1618_v21  ;;  %v5287_v36 = vld [vmem:[%s7374_s13 + $0x1c] sm:$0xf]  ;;  %v1879_v14 = vmul.f32 %v1861_v52, %v1846_v20  ;;  %v5292_v6 = vld [vmem:[%s7374_s13 + $0x20] sm:$0xf] }
 0x4b1   :  { %1771 = vmatprep.subr.mxu1 %v1650_v13  ;;  %5274 = vmatmul.mubr.msk.f32.gmra.mxu0 %vm323_vm3, %v1430_v35  ;;  %v2096_v7 = vrot.slane %v5287_v36, %v5929_v0  ;;  %v2088_v37 = vrot.slane %v5287_v36, %v5910_v54  ;;  %v2077_v55 = vsel %vm2069_vm12, %v5992_v60, %v6004_v12 }
 0x4b2   :  { %1694 = vmatprep.subr.mxu0 %v1648_v18  ;;  %1772 = vmatpush1.msra.mxu1 %v1649_v59  ;;  %v1827_v32 = vpop.permute.xlu1 %1826  ;;  %v2084_v41 = vrot.slane %v5287_v36, %v5927_v62  ;;  %v2092_v42 = vrot.slane %v5287_v36, %v5931_v1  ;;  %v2323_v20 = vrot.slane %v5292_v6, %v5929_v0 }
 0x4b3   :  { %5276 = vmatmul.mubr.msk.f32.gmra.mxu1 %vm323_vm3, %v1430_v35  ;;  %v1849_v47 = vsel %vm1842_vm11, %v6201_v49, %v1827_v32  ;;  %1695 = vmatpush1.msra.mxu0 %v1647_v63  ;;  %v1847_v17 = vsel %vm1842_vm11, %v1827_v32, %v6175_v27  ;;  %v2071_v35 = vsel %vm2069_vm12, %v6008_v15, %v5992_v60 }
 0x4b4   :  { %1728 = vmatprep.mubr.f32.mxu0 %v7430_v38  ;;  %1805 = vmatprep.mubr.f32.mxu1 %v7430_v38  ;;  %v1877_v51 = vmul.f32 %v1869_v19, %v1849_v47  ;;  %v2108_v21 = vmul.f32 %v2096_v7, %v2077_v55  ;;  %v2285_v19 = vpop.permute.xlu0 %2284  ;;  %v2304_v32 = vsel %vm2296_vm13, %v6095_v22, %v6167_v5 }
 0x4b5   :  { %1996 = vmatprep.subr.mxu1 %v1881_v3  ;;  %5278 = vmatmul.mubr.msk.f32.vlgmr.msra.gmra.mxu0 %vm323_vm3, %v1656_v44  ;;  %v2311_v36 = vrot.slane %v5292_v6, %v5927_v62  ;;  %v2300_v47 = vsel %vm2296_vm13, %v6063_v26, %v6188_v30  ;;  %v2302_v3 = vsel %vm2296_vm13, %v6167_v5, %v6063_v26 }
 0x4b6   :  { %1919 = vmatprep.subr.mxu0 %v1879_v14  ;;  %v1835_v31 = vpop.permute.xlu1 %1834  ;;  %1734 = vmatprep.mubr.f32.mxu0 %v7430_v38 }
 0x4b7   :  { %5280 = vmatmul.mubr.msk.f32.vlgmr.msra.gmra.mxu1 %vm323_vm3, %v1656_v44  ;;  %1920 = vmatpush1.msra.mxu0 %v1878_v56  ;;  %v1843_v34 = vsel %vm1842_vm11, %v1835_v31, %v6201_v49  ;;  %v1845_v33 = vsel %vm1842_vm11, %v6175_v27, %v1835_v31  ;;  %v7431_v49 = vld [vmem:[#allocation27_spill] sm:$0xff]  ;;  %v1874_v27 = vmul.f32 %v1857_v9, %v1847_v17  ;;  %v1884_v9 = vld [vmem:[#allocation9 + $0x68] sm:$0xff] }
 0x4b8   :  { %1997 = vmatpush1.msra.mxu1 %v1880_v11  ;;  %v1876_v39 = vmul.f32 %v1865_v10, %v1843_v34  ;;  %1811 = vmatprep.mubr.f32.mxu1 %v7430_v38  ;;  %v1875_v57 = vmul.f32 %v1861_v52, %v1845_v33  ;;  %v2073_v16 = vsel %vm2069_vm12, %v7431_v49, %v6008_v15  ;;  %v2293_v14 = vpop.permute.xlu0 %2292  ;;  %v2110_v11 = vld [vmem:[#allocation9 + $0x70] sm:$0xff]  ;;  %v2111_v34 = vld [vmem:[#allocation9 + $0x78] sm:$0xff] }
 0x4b9   :  { %1998 = vmatprep.subr.mxu1 %v1877_v51  ;;  %5279 = vmatmul.mubr.msk.f32.gmra.mxu0 %vm323_vm3, %v1657_v4  ;;  %v2075_v13 = vsel %vm2069_vm12, %v6004_v12, %v7431_v49  ;;  %v2106_v52 = vmul.f32 %v2088_v37, %v2073_v16  ;;  %v2107_v15 = vmul.f32 %v2092_v42, %v2071_v35  ;;  %v2338_v49 = vld [vmem:[#allocation9 + $0x88] sm:$0xff] }
 0x4ba   :  { %1921 = vmatprep.subr.mxu0 %v1875_v57  ;;  %1999 = vmatpush1.msra.mxu1 %v1876_v39  ;;  %v2054_v61 = vpop.permute.xlu1 %2053  ;;  %v2105_v29 = vmul.f32 %v2084_v41, %v2075_v13  ;;  %v2315_v10 = vrot.slane %v5292_v6, %v5910_v54  ;;  %v2319_v56 = vrot.slane %v5292_v6, %v5931_v1 }
 0x4bb   :  { %5281 = vmatmul.mubr.msk.f32.gmra.mxu1 %vm323_vm3, %v1657_v4  ;;  %v2076_v12 = vsel %vm2069_vm12, %v2066_v25, %v2054_v61  ;;  %1922 = vmatpush1.msra.mxu0 %v1874_v27  ;;  %v2074_v59 = vsel %vm2069_vm12, %v2054_v61, %v6236_v2  ;;  %v2335_v31 = vmul.f32 %v2323_v20, %v2304_v32 }
 0x4bc   :  { %1955 = vmatprep.mubr.f32.mxu0 %v7430_v38  ;;  %2032 = vmatprep.mubr.f32.mxu1 %v7430_v38  ;;  %v2104_v60 = vmul.f32 %v2096_v7, %v2076_v12  ;;  %v2333_v26 = vmul.f32 %v2315_v10, %v2300_v47  ;;  %v2332_v5 = vmul.f32 %v2311_v36, %v2302_v3 }
 0x4bd   :  { %2223 = vmatprep.subr.mxu1 %v2108_v21  ;;  %5283 = vmatmul.mubr.msk.f32.vlgmr.msra.gmra.mxu0 %vm323_vm3, %v1883_v23 }
 0x4be   :  { %2146 = vmatprep.subr.mxu0 %v2106_v52  ;;  %v2062_v18 = vpop.permute.xlu1 %2061  ;;  %1961 = vmatprep.mubr.f32.mxu0 %v7430_v38 }
 0x4bf   :  { %5285 = vmatmul.mubr.msk.f32.vlgmr.msra.gmra.mxu1 %vm323_vm3, %v1883_v23  ;;  %2147 = vmatpush1.msra.mxu0 %v2105_v29  ;;  %v2070_v63 = vsel %vm2069_vm12, %v2062_v18, %v2066_v25  ;;  %v2072_v58 = vsel %vm2069_vm12, %v6236_v2, %v2062_v18  ;;  %v2101_v2 = vmul.f32 %v2084_v41, %v2074_v59  ;;  %v2337_v41 = vld [vmem:[#allocation9 + $0x80] sm:$0xff] }
 0x4c0   :  { %2224 = vmatpush1.msra.mxu1 %v2107_v15  ;;  %v2103_v44 = vmul.f32 %v2092_v42, %v2070_v63  ;;  %2038 = vmatprep.mubr.f32.mxu1 %v7430_v38  ;;  %v2102_v45 = vmul.f32 %v2088_v37, %v2072_v58  ;;  %v2298_v25 = vsel %vm2296_vm13, %v6188_v30, %v6095_v22 }
 0x4c1   :  { %2225 = vmatprep.subr.mxu1 %v2104_v60  ;;  %5284 = vmatmul.mubr.msk.f32.gmra.mxu0 %vm323_vm3, %v1884_v9  ;;  %v2334_v7 = vmul.f32 %v2319_v56, %v2298_v25 }
 0x4c2   :  { %2148 = vmatprep.subr.mxu0 %v2102_v45  ;;  %2226 = vmatpush1.msra.mxu1 %v2103_v44  ;;  %v2281_v51 = vpop.permute.xlu1 %2280 }
 0x4c3   :  { %5286 = vmatmul.mubr.msk.f32.gmra.mxu1 %vm323_vm3, %v1884_v9  ;;  %v2303_v17 = vsel %vm2296_vm13, %v2293_v14, %v2281_v51  ;;  %2149 = vmatpush1.msra.mxu0 %v2101_v2  ;;  %v2301_v22 = vsel %vm2296_vm13, %v2281_v51, %v2285_v19 }
 0x4c4   :  { %2182 = vmatprep.mubr.f32.mxu0 %v7430_v38  ;;  %2259 = vmatprep.mubr.f32.mxu1 %v7430_v38  ;;  %v2331_v4 = vmul.f32 %v2323_v20, %v2303_v17  ;;  %v2328_v57 = vmul.f32 %v2311_v36, %v2301_v22 }
 0x4c5   :  { %2450 = vmatprep.subr.mxu1 %v2335_v31  ;;  %5288 = vmatmul.mubr.msk.f32.vlgmr.msra.gmra.mxu0 %vm323_vm3, %v2110_v11 }
 0x4c6   :  { %2373 = vmatprep.subr.mxu0 %v2333_v26  ;;  %v2289_v30 = vpop.permute.xlu1 %2288  ;;  %2188 = vmatprep.mubr.f32.mxu0 %v7430_v38 }
 0x4c7   :  { %5290 = vmatmul.mubr.msk.f32.vlgmr.msra.gmra.mxu1 %vm323_vm3, %v2110_v11  ;;  %2374 = vmatpush1.msra.mxu0 %v2332_v5  ;;  %v2297_v33 = vsel %vm2296_vm13, %v2289_v30, %v2293_v14  ;;  %v2299_v37 = vsel %vm2296_vm13, %v2285_v19, %v2289_v30 }
 0x4c8   :  { %2451 = vmatpush1.msra.mxu1 %v2334_v7  ;;  %v2330_v55 = vmul.f32 %v2319_v56, %v2297_v33  ;;  %2265 = vmatprep.mubr.f32.mxu1 %v7430_v38  ;;  %v2329_v39 = vmul.f32 %v2315_v10, %v2299_v37 }
 0x4c9   :  { %2452 = vmatprep.subr.mxu1 %v2331_v4  ;;  %5289 = vmatmul.mubr.msk.f32.gmra.mxu0 %vm323_vm3, %v2111_v34 }
 0x4ca   :  { %2375 = vmatprep.subr.mxu0 %v2329_v39  ;;  %2453 = vmatpush1.msra.mxu1 %v2330_v55 }
 0x4cb   :  { %5291 = vmatmul.mubr.msk.f32.gmra.mxu1 %vm323_vm3, %v2111_v34  ;;  %2376 = vmatpush1.msra.mxu0 %v2328_v57 }
 0x4cc   :  { %2409 = vmatprep.mubr.f32.mxu0 %v7430_v38  ;;  %2486 = vmatprep.mubr.f32.mxu1 %v7430_v38 }
 0x4cd   :  { %2652 = vmatprep.subr.mxu1 %v5771_v8  ;;  %5293 = vmatmul.mubr.msk.f32.vlgmr.msra.gmra.mxu0 %vm323_vm3, %v2337_v41 }
 0x4ce   :  { %2581 = vmatprep.subr.mxu0 %v5762_v28  ;;  %2415 = vmatprep.mubr.f32.mxu0 %v7430_v38 }
 0x4cf   :  { %5295 = vmatmul.mubr.msk.f32.vlgmr.msra.gmra.mxu1 %vm323_vm3, %v2337_v41  ;;  %2582 = vmatpush1.msra.mxu0 %v5760_v24  ;;  %v2543_v24 = vld [vmem:[%s7369_s8] sm:$0xf]  ;;  %s5310_s8 = sld [smem:[#allocation8 + $0x9]] }
 0x4d0   :  { %2653 = vmatpush1.msra.mxu1 %v5780_v40  ;;  %2583 = vmatprep.subr.mxu0 %v5825_v43 }
 0x4d1   :  { %2654 = vmatprep.subr.mxu1 %v5834_v46  ;;  %2492 = vmatprep.mubr.f32.mxu1 %v7430_v38 }
 0x4d2   :  { %2655 = vmatpush1.msra.mxu1 %v5864_v50  ;;  %2584 = vmatpush1.msra.mxu0 %v5851_v48 }
 0x4d3   :  { %5294 = vmatmul.mubr.msk.f32.gmra.mxu0 %vm323_vm3, %v2338_v49  ;;  %5296 = vmatmul.mubr.msk.f32.gmra.mxu1 %vm323_vm3, %v2338_v49 }
 0x4d4   :  { %2617 = vmatprep.mubr.f32.mxu0 %v7430_v38  ;;  %2688 = vmatprep.mubr.f32.mxu1 %v7430_v38 }
 0x4d7   :  { %5297 = vmatmul.mubr.msk.f32.vlgmr.msra.gmra.mxu0 %vm323_vm3, %v2543_v24  ;;  %5298 = vmatmul.mubr.msk.f32.vlgmr.msra.gmra.mxu1 %vm323_vm3, %v2543_v24 }
 0x4d8   :  { %3543 = vmatprep.mubr.f32.mxu0 %v7430_v38  ;;  %3620 = vmatprep.mubr.f32.mxu1 %v7430_v38 }
 0x54b   :  { %v726_v28 = vpop.f32.mrf.mxu0 }
 0x54c   :  { %v803_v8 = vpop.f32.mrf.mxu1 }
 0x54d   :  { %v728_v40 = vpop.f32.mrf.mxu0 }
 0x54e   :  { %v805_v43 = vpop.f32.mrf.mxu1 }
 0x54f   :  { %v732_v46 = vpop.f32.mrf.mxu0 }
 0x551   :  { %v809_v48 = vpop.f32.mrf.mxu1  ;;  %v734_v50 = vpop.f32.mrf.mxu0 }
 0x553   :  { %v811_v16 = vpop.f32.mrf.mxu1  ;;  %v886_v27 = vpop.f32.mrf.mxu0 }
 0x554   :  { %v887_v13 = vadd.f32 %v886_v27, %v726_v28 }
 0x555   :  { %v963_v42 = vpop.f32.mrf.mxu1  ;;  %v888_v61 = vpop.f32.mrf.mxu0 }
 0x556   :  { %v964_v23 = vadd.f32 %v963_v42, %v803_v8  ;;  %v889_v35 = vadd.f32 %v888_v61, %v728_v40 }
 0x557   :  { %v965_v6 = vpop.f32.mrf.mxu1  ;;  %v892_v12 = vpop.f32.mrf.mxu0 }
 0x558   :  { %v966_v21 = vadd.f32 %v965_v6, %v805_v43  ;;  %v893_v19 = vadd.f32 %v892_v12, %v732_v46 }
 0x559   :  { %v969_v52 = vpop.f32.mrf.mxu1  ;;  %v894_v29 = vpop.f32.mrf.mxu0 }
 0x55a   :  { %v970_v60 = vadd.f32 %v969_v52, %v809_v48  ;;  %v895_v15 = vadd.f32 %v894_v29, %v734_v50 }
 0x55b   :  { %v971_v59 = vpop.f32.mrf.mxu1  ;;  %v1105_v18 = vpop.f32.mrf.mxu0 }
 0x55c   :  { %v972_v9 = vadd.f32 %v971_v59, %v811_v16  ;;  %v1193_v20 = vadd.f32 %v1105_v18, %v887_v13 }
 0x55d   :  { %v1182_v63 = vpop.f32.mrf.mxu1  ;;  %v1107_v58 = vpop.f32.mrf.mxu0 }
 0x55e   :  { %v1195_v10 = vadd.f32 %v1182_v63, %v964_v23  ;;  %v1194_v32 = vadd.f32 %v1107_v58, %v889_v35 }
 0x55f   :  { %v1184_v44 = vpop.f32.mrf.mxu1  ;;  %v1111_v45 = vpop.f32.mrf.mxu0 }
 0x560   :  { %v1196_v36 = vadd.f32 %v1184_v44, %v966_v21  ;;  %v1197_v47 = vadd.f32 %v1111_v45, %v893_v19 }
 0x561   :  { %v1188_v2 = vpop.f32.mrf.mxu1  ;;  %v1113_v3 = vpop.f32.mrf.mxu0 }
 0x562   :  { %v1199_v14 = vadd.f32 %v1188_v2, %v970_v60  ;;  %v1198_v56 = vadd.f32 %v1113_v3, %v895_v15 }
 0x563   :  { %v1190_v51 = vpop.f32.mrf.mxu1  ;;  %v1332_v11 = vpop.f32.mrf.mxu0 }
 0x564   :  { %v1200_v25 = vadd.f32 %v1190_v51, %v972_v9  ;;  %v1420_v17 = vadd.f32 %v1332_v11, %v1193_v20 }
 0x565   :  { %v1409_v31 = vpop.f32.mrf.mxu1  ;;  %v1334_v26 = vpop.f32.mrf.mxu0 }
 0x566   :  { %v1422_v5 = vadd.f32 %v1409_v31, %v1195_v10  ;;  %v1421_v4 = vadd.f32 %v1334_v26, %v1194_v32 }
 0x567   :  { %v1411_v7 = vpop.f32.mrf.mxu1 }
 0x568   :  { %v1423_v22 = vadd.f32 %v1411_v7, %v1196_v36 }
 0x569   :  { %v1338_v30 = vpop.f32.mrf.mxu0 }
 0x56a   :  { %v1424_v34 = vadd.f32 %v1338_v30, %v1197_v47 }
 0x56b   :  { %v1415_v33 = vpop.f32.mrf.mxu1  ;;  %v1340_v37 = vpop.f32.mrf.mxu0 }
 0x56c   :  { %v1426_v55 = vadd.f32 %v1415_v33, %v1199_v14  ;;  %v1425_v39 = vadd.f32 %v1340_v37, %v1198_v56 }
 0x56d   :  { %v1417_v57 = vpop.f32.mrf.mxu1  ;;  %v1503_v41 = vpop.f32.mrf.mxu0 }
 0x56e   :  { %v1427_v49 = vadd.f32 %v1417_v57, %v1200_v25  ;;  %v1591_v24 = vadd.f32 %v1503_v41, %v1420_v17 }
 0x56f   :  { %v1580_v28 = vpop.f32.mrf.mxu1  ;;  %v1505_v8 = vpop.f32.mrf.mxu0 }
 0x570   :  { %v1593_v40 = vadd.f32 %v1580_v28, %v1422_v5  ;;  %v1592_v43 = vadd.f32 %v1505_v8, %v1421_v4 }
 0x571   :  { %v1582_v46 = vpop.f32.mrf.mxu1  ;;  %v1509_v48 = vpop.f32.mrf.mxu0 }
 0x572   :  { %v1594_v50 = vadd.f32 %v1582_v46, %v1423_v22  ;;  %v1595_v16 = vadd.f32 %v1509_v48, %v1424_v34 }
 0x573   :  { %v1586_v27 = vpop.f32.mrf.mxu1  ;;  %v1511_v13 = vpop.f32.mrf.mxu0 }
 0x574   :  { %v1597_v42 = vadd.f32 %v1586_v27, %v1426_v55  ;;  %v1596_v61 = vadd.f32 %v1511_v13, %v1425_v39 }
 0x575   :  { %v1588_v23 = vpop.f32.mrf.mxu1  ;;  %v1730_v35 = vpop.f32.mrf.mxu0 }
 0x576   :  { %v1598_v6 = vadd.f32 %v1588_v23, %v1427_v49  ;;  %v1818_v12 = vadd.f32 %v1730_v35, %v1591_v24 }
 0x577   :  { %v1807_v21 = vpop.f32.mrf.mxu1  ;;  %v1732_v19 = vpop.f32.mrf.mxu0 }
 0x578   :  { %v1820_v52 = vadd.f32 %v1807_v21, %v1593_v40  ;;  %v1819_v29 = vadd.f32 %v1732_v19, %v1592_v43  ;;  %v2548_v21 = vpop.permute.xlu1 %2547 }
 0x579   :  { %v1809_v60 = vpop.f32.mrf.mxu1  ;;  %v1736_v15 = vpop.f32.mrf.mxu0 }
 0x57a   :  { %v1821_v59 = vadd.f32 %v1809_v60, %v1594_v50  ;;  %v1822_v18 = vadd.f32 %v1736_v15, %v1595_v16 }
 0x57b   :  { %v1813_v9 = vpop.f32.mrf.mxu1  ;;  %v1738_v20 = vpop.f32.mrf.mxu0 }
 0x57c   :  { %v1824_v63 = vadd.f32 %v1813_v9, %v1597_v42  ;;  %v1823_v58 = vadd.f32 %v1738_v20, %v1596_v61 }
 0x57d   :  { %v1815_v10 = vpop.f32.mrf.mxu1  ;;  %v1957_v32 = vpop.f32.mrf.mxu0 }
 0x57e   :  { %v1825_v44 = vadd.f32 %v1815_v10, %v1598_v6  ;;  %v2045_v45 = vadd.f32 %v1957_v32, %v1818_v12 }
 0x57f   :  { %v2034_v36 = vpop.f32.mrf.mxu1  ;;  %v1959_v47 = vpop.f32.mrf.mxu0 }
 0x580   :  { %v2047_v2 = vadd.f32 %v2034_v36, %v1820_v52  ;;  %v2046_v3 = vadd.f32 %v1959_v47, %v1819_v29 }
 0x581   :  { %v2036_v14 = vpop.f32.mrf.mxu1  ;;  %v1963_v56 = vpop.f32.mrf.mxu0 }
 0x582   :  { %v2048_v51 = vadd.f32 %v2036_v14, %v1821_v59  ;;  %v2049_v11 = vadd.f32 %v1963_v56, %v1822_v18 }
 0x583   :  { %v2040_v25 = vpop.f32.mrf.mxu1  ;;  %v1965_v17 = vpop.f32.mrf.mxu0 }
 0x584   :  { %v2051_v31 = vadd.f32 %v2040_v25, %v1824_v63  ;;  %v2050_v26 = vadd.f32 %v1965_v17, %v1823_v58 }
 0x585   :  { %v2042_v5 = vpop.f32.mrf.mxu1  ;;  %v2184_v4 = vpop.f32.mrf.mxu0 }
 0x586   :  { %v2052_v7 = vadd.f32 %v2042_v5, %v1825_v44  ;;  %v2272_v22 = vadd.f32 %v2184_v4, %v2045_v45 }
 0x587   :  { %v2261_v30 = vpop.f32.mrf.mxu1  ;;  %v2186_v34 = vpop.f32.mrf.mxu0 }
 0x588   :  { %v2274_v33 = vadd.f32 %v2261_v30, %v2047_v2  ;;  %v2273_v37 = vadd.f32 %v2186_v34, %v2046_v3 }
 0x589   :  { %v2263_v55 = vpop.f32.mrf.mxu1  ;;  %v2190_v39 = vpop.f32.mrf.mxu0 }
 0x58a   :  { %v2275_v57 = vadd.f32 %v2263_v55, %v2048_v51  ;;  %v2276_v41 = vadd.f32 %v2190_v39, %v2049_v11 }
 0x58b   :  { %v2267_v49 = vpop.f32.mrf.mxu1  ;;  %v2192_v24 = vpop.f32.mrf.mxu0 }
 0x58c   :  { %v2278_v28 = vadd.f32 %v2267_v49, %v2051_v31  ;;  %v2277_v8 = vadd.f32 %v2192_v24, %v2050_v26 }
 0x58d   :  { %v2269_v40 = vpop.f32.mrf.mxu1  ;;  %v2411_v43 = vpop.f32.mrf.mxu0 }
 0x58e   :  { %v2279_v46 = vadd.f32 %v2269_v40, %v2052_v7  ;;  %v6382_v48 = vadd.f32 %v2411_v43, %v2272_v22 }
 0x58f   :  { %v2488_v50 = vpop.f32.mrf.mxu1  ;;  %v2413_v16 = vpop.f32.mrf.mxu0 }
 0x590   :  { %7432 = vst [vmem:[#allocation27_spill] sm:$0xff] %v6382_v48  ;;  %v6384_v27 = vadd.f32 %v2488_v50, %v2274_v33  ;;  %v6386_v13 = vadd.f32 %v2413_v16, %v2273_v37 }
 0x591   :  { %v2490_v42 = vpop.f32.mrf.mxu1 }
 0x592   :  { %7433 = vst [vmem:[#allocation28_spill] sm:$0xff] %v6384_v27  ;;  %7434 = vst [vmem:[#allocation29_spill] sm:$0xff] %v6386_v13  ;;  %v6388_v61 = vadd.f32 %v2490_v42, %v2275_v57 }
 0x593   :  { %v2417_v23 = vpop.f32.mrf.mxu0  ;;  %v2494_v35 = vpop.f32.mrf.mxu1 }
 0x594   :  { %7435 = vst [vmem:[#allocation30_spill] sm:$0xff] %v6388_v61  ;;  %v6390_v6 = vadd.f32 %v2417_v23, %v2276_v41  ;;  %v6392_v12 = vadd.f32 %v2494_v35, %v2278_v28 }
 0x595   :  { %v2419_v19 = vpop.f32.mrf.mxu0  ;;  %v2496_v52 = vpop.f32.mrf.mxu1 }
 0x596   :  { %7436 = vst [vmem:[#allocation31_spill] sm:$0xff] %v6390_v6  ;;  %7437 = vst [vmem:[#allocation32_spill] sm:$0xff] %v6392_v12  ;;  %v6394_v29 = vadd.f32 %v2419_v19, %v2277_v8  ;;  %v6396_v60 = vadd.f32 %v2496_v52, %v2279_v46 }
 0x597   :  { %v2690_v15 = vpop.f32.mrf.mxu1  ;;  %v2619_v59 = vpop.f32.mrf.mxu0 }
 0x598   :  { %7438 = vst [vmem:[#allocation33_spill] sm:$0xff] %v6394_v29  ;;  %7439 = vst [vmem:[#allocation34_spill] sm:$0xff] %v6396_v60  ;;  %v2691_v18 = vadd.f32 %v2690_v15, %v2548_v21  ;;  %v2620_v9 = vadd.f32 %v2619_v59, %v2548_v21 }
 0x599   :  { %v2621_v20 = vpop.f32.mrf.mxu0  ;;  %v2692_v63 = vpop.f32.mrf.mxu1 }
 0x59a   :  { %v2697_v58 = vmax.f32 %v2691_v18, 0.0  ;;  %v2695_v10 = vmax.f32 %v2620_v9, 0.0  ;;  %v2622_v32 = vadd.f32 %v2621_v20, %v2548_v21  ;;  %v2693_v44 = vadd.f32 %v2692_v63, %v2548_v21 }
 0x59c   :  { %v2713_v45 = vsel %vm419_vm5, %v2697_v58, 0.0  ;;  %v2746_v36 = vsel %vm419_vm5, %v2697_v58, -inf  ;;  %v2699_v47 = vsel %vm419_vm5, %v2695_v10, 0.0  ;;  %v2732_v2 = vsel %vm419_vm5, %v2695_v10, -inf }
 0x59d   :  { %v2714_v3 = vrot.slane %v2713_v45, 4  ;;  %v2747_v14 = vrot.slane %v2746_v36, 4  ;;  %v2700_v56 = vrot.slane %v2699_v47, 4  ;;  %v2733_v51 = vrot.slane %v2732_v2, 4 }
 0x59e   :  { %v2696_v11 = vmax.f32 %v2622_v32, 0.0  ;;  %v2698_v25 = vmax.f32 %v2693_v44, 0.0 }
 0x59f   :  { %v2715_v17 = vadd.f32 %v2714_v3, %v2713_v45  ;;  %v2748_v31 = vmax.f32 %v2746_v36, %v2747_v14  ;;  %v2701_v26 = vadd.f32 %v2700_v56, %v2699_v47  ;;  %v2734_v5 = vmax.f32 %v2732_v2, %v2733_v51 }
 0x5a0   :  { %v2706_v4 = vsel %vm419_vm5, %v2696_v11, 0.0  ;;  %v2739_v7 = vsel %vm419_vm5, %v2696_v11, -inf  ;;  %v2720_v22 = vsel %vm419_vm5, %v2698_v25, 0.0  ;;  %v2753_v30 = vsel %vm419_vm5, %v2698_v25, -inf }
 0x5a1   :  { %v2716_v34 = vrot.slane %v2715_v17, 2  ;;  %v2749_v33 = vrot.slane %v2748_v31, 2  ;;  %v2702_v37 = vrot.slane %v2701_v26, 2  ;;  %v2735_v55 = vrot.slane %v2734_v5, 2 }
 0x5a2   :  { %v2707_v39 = vrot.slane %v2706_v4, 4  ;;  %v2740_v57 = vrot.slane %v2739_v7, 4  ;;  %v2721_v41 = vrot.slane %v2720_v22, 4  ;;  %v2754_v49 = vrot.slane %v2753_v30, 4 }
 0x5a3   :  { %v2717_v24 = vadd.f32 %v2716_v34, %v2715_v17  ;;  %v2703_v28 = vadd.f32 %v2702_v37, %v2701_v26  ;;  %v2736_v8 = vmax.f32 %v2734_v5, %v2735_v55  ;;  %v2750_v42 = vmax.f32 %v2748_v31, %v2749_v33  ;;  %v2805_v37 = vld [vmem:[%s7374_s13] sm:$0xf] }
 0x5a4   :  { %v2708_v40 = vadd.f32 %v2707_v39, %v2706_v4  ;;  %v2741_v43 = vmax.f32 %v2739_v7, %v2740_v57  ;;  %v2722_v46 = vadd.f32 %v2721_v41, %v2720_v22  ;;  %v2755_v50 = vmax.f32 %v2753_v30, %v2754_v49 }
 0x5a5   :  { %v2718_v16 = vrot.slane %v2717_v24, 1  ;;  %v2704_v23 = vrot.slane %v2703_v28, 1  ;;  %v2737_v35 = vrot.slane %v2736_v8, 1  ;;  %v2751_v58 = vrot.slane %v2750_v42, 1 }
 0x5a6   :  { %v2709_v21 = vrot.slane %v2708_v40, 2  ;;  %v2742_v19 = vrot.slane %v2741_v43, 2  ;;  %v2723_v52 = vrot.slane %v2722_v46, 2  ;;  %v2756_v15 = vrot.slane %v2755_v50, 2 }
 0x5a7   :  { %v2719_v59 = vadd.f32 %v2718_v16, %v2717_v24  ;;  %v2705_v18 = vadd.f32 %v2704_v23, %v2703_v28  ;;  %v2738_v32 = vmax.f32 %v2736_v8, %v2737_v35  ;;  %v2752_v51 = vmax.f32 %v2750_v42, %v2751_v58  ;;  %v5302_v24 = vld [vmem:[%s7374_s13 + $0x4] sm:$0xf] }
 0x5a8   :  { %v2710_v9 = vadd.f32 %v2709_v21, %v2708_v40  ;;  %v2743_v20 = vmax.f32 %v2741_v43, %v2742_v19  ;;  %v2724_v63 = vadd.f32 %v2723_v52, %v2722_v46  ;;  %v2757_v47 = vmax.f32 %v2755_v50, %v2756_v15 }
 0x5a9   :  { %v2728_v10 = vmul.f32 0.25, %v2705_v18  ;;  %v2730_v2 = vmul.f32 0.25, %v2719_v59  ;;  %v3052_v22 = vstv %s5310_s8  ;;  %v3046_v57 = vstv %s5309_s19  ;;  %v5305_v59 = vld [vmem:[%s7374_s13 + $0x8] sm:$0xf]  ;;  %s6545_s8 = sld [smem:[#allocation8 + $0xd]] }
 0x5aa   :  { %v2711_v44 = vrot.slane %v2710_v9, 1  ;;  %v2744_v45 = vrot.slane %v2743_v20, 1  ;;  %v2725_v36 = vrot.slane %v2724_v63, 1  ;;  %v2758_v17 = vrot.slane %v2757_v47, 1 }
 0x5ab   :  { %v6407_v3 = vsel %vm2760_vm14, %v2728_v10, %v2738_v32  ;;  %v6412_v31 = vsel %vm2760_vm14, %v2730_v2, %v2752_v51  ;;  %v6499_v41 = vstv %s2777_s0  ;;  %v6501_v49 = vstv %s5299_s9  ;;  %s6573_s9 = sld [smem:[#allocation8 + $0xe]] }
 0x5ac   :  { %v2712_v14 = vadd.f32 %v2711_v44, %v2710_v9  ;;  %v2726_v56 = vadd.f32 %v2725_v36, %v2724_v63  ;;  %2765 = vrot.lane.b32.xlu0 %v6407_v3, %s5563_s22  ;;  %v2745_v25 = vmax.f32 %v2743_v20, %v2744_v45  ;;  %v2759_v4 = vmax.f32 %v2757_v47, %v2758_v17  ;;  %v5308_v36 = vld [vmem:[%s7374_s13 + $0xc] sm:$0xf] }
 0x5ad   :  { %v3053_v30 = vmul.f32 %v3052_v22, %v6407_v3  ;;  %v3055_v33 = vmul.f32 %v3052_v22, %v6412_v31  ;;  %v6509_v8 = vrot.slane %v2805_v37, %v5910_v54  ;;  %v6512_v40 = vrot.slane %v2805_v37, %v5931_v1 }
 0x5ae   :  { %v2729_v11 = vmul.f32 0.25, %v2712_v14  ;;  %v2731_v5 = vmul.f32 0.25, %v2726_v56  ;;  %v6517_v46 = vrot.slane %v2805_v37, %v5927_v62  ;;  %v6522_v42 = vrot.slane %v2805_v37, %v5929_v0 }
 0x5af   :  { %v3061_v28 = vrot.slane %v3053_v30, 1  ;;  %7440 = vst [vmem:[#allocation35_spill] sm:$0xff] %v6509_v8  ;;  %7441 = vst [vmem:[#allocation36_spill] sm:$0xff] %v6512_v40  ;;  %v3063_v50 = vrot.slane %v3055_v33, 1  ;;  %v3047_v23 = vmul.f32 %v3046_v57, %v6407_v3  ;;  %v6527_v19 = vstv %s5300_s10 }
 0x5b0   :  { %v6415_v26 = vsel %vm2760_vm14, %v2729_v11, %v2745_v25  ;;  %2769 = vrot.lane.b32.xlu0 %v6412_v31, %s5563_s22  ;;  %v6422_v7 = vsel %vm2760_vm14, %v2731_v5, %v2759_v4  ;;  %7442 = vst [vmem:[#allocation37_spill] sm:$0xff] %v6517_v46  ;;  %v6529_v52 = vstv %s5301_s20  ;;  %v6532_v15 = vrot.slane %v5302_v24, %v5910_v54 }
 0x5b1   :  { %2767 = vrot.lane.b32.xlu1 %v6415_v26, %s5563_s22  ;;  %v3054_v55 = vmul.f32 %v3052_v22, %v6415_v26  ;;  %v3056_v39 = vmul.f32 %v3052_v22, %v6422_v7  ;;  %v3049_v18 = vmul.f32 %v3046_v57, %v6412_v31  ;;  %v6539_v9 = vrot.slane %v5302_v24, %v5931_v1 }
 0x5b2   :  { %7443 = vst [vmem:[#allocation38_spill] sm:$0xff] %v6532_v15  ;;  %v6541_v20 = vadd.f32 %v3061_v28, %v3047_v23  ;;  %v3048_v63 = vmul.f32 %v3046_v57, %v6415_v26  ;;  %v3050_v58 = vmul.f32 %v3046_v57, %v6422_v7  ;;  %v6550_v32 = vrot.slane %v5302_v24, %v5927_v62  ;;  %v5316_v57 = vld [vmem:[%s7374_s13 + $0x18] sm:$0xf] }
 0x5b3   :  { %v3062_v35 = vrot.slane %v3054_v55, 1  ;;  %v3064_v21 = vrot.slane %v3056_v39, 1  ;;  %7444 = vst [vmem:[#allocation39_spill] sm:$0xff] %v6539_v9  ;;  %v6553_v44 = vrot.slane %v5302_v24, %v5929_v0  ;;  %v6556_v45 = vstv %s6482_s21  ;;  %s6590_s21 = sld [smem:[#allocation8 + $0xf]] }
 0x5b4   :  { %2835 = vrot.lane.b32.xlu0 %v6407_v3, %s5564_s23  ;;  %v6561_v47 = vadd.f32 %v3063_v50, %v3049_v18  ;;  %v6567_v14 = vrot.slane %v5305_v59, %v5910_v54  ;;  %v6579_v25 = vrot.slane %v5305_v59, %v5931_v1  ;;  %v6582_v17 = vrot.slane %v5305_v59, %v5927_v62 }
 0x5b5   :  { %2771 = vrot.lane.b32.xlu1 %v6422_v7, %s5563_s22  ;;  %v6569_v56 = vadd.f32 %v3062_v35, %v3048_v63  ;;  %v6571_v51 = vadd.f32 %v3064_v21, %v3050_v58  ;;  %v6593_v5 = vstv %s6493_s29  ;;  %v6596_v4 = vstv %s6497_s30  ;;  %s6642_s29 = sld [smem:[#allocation8 + $0x11]] }
 0x5b6   :  { %7445 = vst [vmem:[#allocation40_spill] sm:$0xff] %v6561_v47  ;;  %v6602_v22 = vrot.slane %v5308_v36, %v5931_v1  ;;  %v6607_v33 = vrot.slane %v5308_v36, %v5927_v62  ;;  %v6610_v37 = vrot.slane %v5308_v36, %v5929_v0  ;;  %v6613_v55 = vstv %s6506_s5 }
 0x5b7   :  { %7446 = vst [vmem:[#allocation41_spill] sm:$0xff] %v6569_v56  ;;  %7447 = vst [vmem:[#allocation42_spill] sm:$0xff] %v6571_v51  ;;  %v6616_v39 = vstv %s6519_s7  ;;  %v6629_v35 = vstv %s6525_s17  ;;  %v6654_v60 = vrot.slane %v5316_v57, %v5927_v62  ;;  %v6665_v6 = vrot.slane %v5316_v57, %v5910_v54 }
 0x5b8   :  { %2839 = vrot.lane.b32.xlu0 %v6412_v31, %s5564_s23  ;;  %v6669_v48 = vrot.slane %v5316_v57, %v5931_v1  ;;  %v6672_v38 = vrot.slane %v5316_v57, %v5929_v0 }
 0x5b9   :  { %2837 = vrot.lane.b32.xlu1 %v6415_v26, %s5564_s23  ;;  %7450 = vst [vmem:[#allocation45_spill] sm:$0xff] %v6654_v60  ;;  %7451 = vst [vmem:[#allocation46_spill] sm:$0xff] %v6665_v6  ;;  %v6679_v60 = vstv %s6590_s21 }
 0x5ba   :  { %7452 = vst [vmem:[#allocation47_spill] sm:$0xff] %v6669_v48  ;;  %7453 = vst [vmem:[#allocation48_spill] sm:$0xff] %v6672_v38 }
 0x5bb   :  { %7455 = vst [vmem:[#allocation50_spill] sm:$0xff] %v6679_v60 }
 0x5bc   :  { %2905 = vrot.lane.b32.xlu0 %v6407_v3, %s5565_s25 }
 0x5bd   :  { %2841 = vrot.lane.b32.xlu1 %v6422_v7, %s5564_s23 }
 0x5c0   :  { %2909 = vrot.lane.b32.xlu0 %v6412_v31, %s5565_s25 }
 0x5c1   :  { %2907 = vrot.lane.b32.xlu1 %v6415_v26, %s5565_s25 }
 0x5c4   :  { %2975 = vrot.lane.b32.xlu0 %v6407_v3, %s5566_s26 }
 0x5c5   :  { %2911 = vrot.lane.b32.xlu1 %v6422_v7, %s5565_s25 }
 0x5c8   :  { %2979 = vrot.lane.b32.xlu0 %v6412_v31, %s5566_s26 }
 0x5c9   :  { %2977 = vrot.lane.b32.xlu1 %v6415_v26, %s5566_s26 }
 0x5cc   :  { %3077 = vrot.lane.b32.xlu0 %v6407_v3, %s5567_s27 }
 0x5cd   :  { %2981 = vrot.lane.b32.xlu1 %v6422_v7, %s5566_s26 }
 0x5d0   :  { %3081 = vrot.lane.b32.xlu0 %v6412_v31, %s5567_s27 }
 0x5d1   :  { %3079 = vrot.lane.b32.xlu1 %v6415_v26, %s5567_s27 }
 0x5d4   :  { %3147 = vrot.lane.b32.xlu0 %v6407_v3, %s5568_s28 }
 0x5d5   :  { %3083 = vrot.lane.b32.xlu1 %v6422_v7, %s5567_s27 }
 0x5d8   :  { %3151 = vrot.lane.b32.xlu0 %v6412_v31, %s5568_s28 }
 0x5d9   :  { %3149 = vrot.lane.b32.xlu1 %v6415_v26, %s5568_s28 }
 0x5dc   :  { %3217 = vrot.lane.b32.xlu0 %v6407_v3, %s5569_s2 }
 0x5dd   :  { %3153 = vrot.lane.b32.xlu1 %v6422_v7, %s5568_s28 }
 0x5e0   :  { %3221 = vrot.lane.b32.xlu0 %v6412_v31, %s5569_s2 }
 0x5e1   :  { %3219 = vrot.lane.b32.xlu1 %v6415_v26, %s5569_s2 }
 0x5e4   :  { %3287 = vrot.lane.b32.xlu0 %v6407_v3, %s5570_s18  ;;  %v6564_v3 = vstv %s6487_s11  ;;  %s6604_s11 = sld [smem:[#allocation8 + $0x10]] }
 0x5e5   :  { %3223 = vrot.lane.b32.xlu1 %v6422_v7, %s5569_s2 }
 0x5e8   :  { %3291 = vrot.lane.b32.xlu0 %v6412_v31, %s5570_s18  ;;  %v6585_v31 = vrot.slane %v5305_v59, %v5929_v0 }
 0x5e9   :  { %3289 = vrot.lane.b32.xlu1 %v6415_v26, %s5570_s18  ;;  %v5313_v26 = vld [vmem:[%s7374_s13 + $0x14] sm:$0xf] }
 0x5ea   :  { %v6623_v50 = vrot.slane %v5313_v26, %v5927_v62  ;;  %v6626_v23 = vrot.slane %v5313_v26, %v5910_v54  ;;  %v6640_v63 = vrot.slane %v5313_v26, %v5931_v1  ;;  %v6690_v48 = vstv %s6604_s11 }
 0x5eb   :  { %7458 = vst [vmem:[#allocation53_spill] sm:$0xff] %v6690_v48 }
 0x5ec   :  { %7448 = vst [vmem:[#allocation43_spill] sm:$0xff] %v6640_v63 }
 0x5ed   :  { %3293 = vrot.lane.b32.xlu1 %v6422_v7, %s5570_s18  ;;  %v6599_v7 = vrot.slane %v5308_v36, %v5910_v54  ;;  %v6648_v36 = vrot.slane %v5313_v26, %v5929_v0 }
 0x5ef   :  { %7449 = vst [vmem:[#allocation44_spill] sm:$0xff] %v6648_v36 }
 0x61e   :  { %v6485_v34 = vpop.permute.xlu0 %2765 }
 0x622   :  { %v6514_v43 = vpop.permute.xlu0 %2769 }
 0x623   :  { %v2768_v16 = vpop.permute.xlu1 %2767 }
 0x624   :  { %v2775_v11 = vsel %vm554_vm7, %v6485_v34, %v2768_v16  ;;  %v2774_v21 = vsel %vm554_vm7, %v2768_v16, %v6514_v43  ;;  %v6651_v16 = vstv %s6545_s8 }
 0x625   :  { %v2786_v24 = vmul.f32 %v6501_v49, %v2775_v11  ;;  %v2787_v27 = vmul.f32 %v6501_v49, %v2774_v21 }
 0x626   :  { %v6547_v10 = vpop.permute.xlu0 %2835 }
 0x627   :  { %v2772_v2 = vpop.permute.xlu1 %2771  ;;  %v2794_v61 = vrot.slane %v2786_v24, 1  ;;  %v2780_v24 = vmul.f32 %v6499_v41, %v2775_v11  ;;  %v2795_v11 = vrot.slane %v2787_v27, 1  ;;  %v2781_v27 = vmul.f32 %v6499_v41, %v2774_v21 }
 0x628   :  { %v2776_v58 = vsel %vm554_vm7, %v2772_v2, %v6485_v34  ;;  %v2773_v12 = vsel %vm554_vm7, %v6514_v43, %v2772_v2  ;;  %v6676_v2 = vstv %s6573_s9 }
 0x629   :  { %v2785_v43 = vmul.f32 %v6501_v49, %v2776_v58  ;;  %7454 = vst [vmem:[#allocation49_spill] sm:$0xff] %v6676_v2  ;;  %v2788_v6 = vmul.f32 %v6501_v49, %v2773_v12  ;;  %v2802_v51 = vadd.f32 %v2794_v61, %v2780_v24 }
 0x62a   :  { %v2840_v30 = vpop.permute.xlu0 %2839 }
 0x62b   :  { %v2838_v28 = vpop.permute.xlu1 %2837  ;;  %v2796_v61 = vrot.slane %v2788_v6, 1 }
 0x62c   :  { %v2845_v59 = vsel %vm611_vm6, %v6547_v10, %v2838_v28  ;;  %v2844_v18 = vsel %vm611_vm6, %v2838_v28, %v2840_v30  ;;  %v5319_v28 = vld [vmem:[%s7374_s13 + $0x1c] sm:$0xf] }
 0x62d   :  { %v2856_v34 = vmul.f32 %v6529_v52, %v2845_v59  ;;  %v2857_v26 = vmul.f32 %v6529_v52, %v2844_v18  ;;  %v6682_v36 = vrot.slane %v5319_v28, %v5927_v62  ;;  %v6687_v63 = vrot.slane %v5319_v28, %v5910_v54 }
 0x62e   :  { %v2906_v29 = vpop.permute.xlu0 %2905  ;;  %v6698_v49 = vrot.slane %v5319_v28, %v5931_v1 }
 0x62f   :  { %v2842_v13 = vpop.permute.xlu1 %2841  ;;  %7456 = vst [vmem:[#allocation51_spill] sm:$0xff] %v6682_v36  ;;  %7457 = vst [vmem:[#allocation52_spill] sm:$0xff] %v6687_v63  ;;  %v2864_v57 = vrot.slane %v2856_v34, 1  ;;  %v2865_v38 = vrot.slane %v2857_v26, 1  ;;  %v6701_v63 = vrot.slane %v5319_v28, %v5929_v0  ;;  %v6706_v34 = vld [vmem:[%s7374_s13 + $0x20] sm:$0xf]  ;;  %v2850_v26 = vmul.f32 %v6527_v19, %v2845_v59 }
 0x630   :  { %v2843_v2 = vsel %vm611_vm6, %v2840_v30, %v2842_v13  ;;  %v2846_v60 = vsel %vm611_vm6, %v2842_v13, %v6547_v10  ;;  %7459 = vst [vmem:[#allocation54_spill] sm:$0xff] %v6698_v49  ;;  %v2793_v30 = vrot.slane %v2785_v43, 1  ;;  %v2851_v13 = vmul.f32 %v6527_v19, %v2844_v18 }
 0x631   :  { %7460 = vst [vmem:[#allocation55_spill] sm:$0xff] %v6701_v63  ;;  %v6711_v10 = vstv %s6642_s29  ;;  %v2855_v24 = vmul.f32 %v6529_v52, %v2846_v60  ;;  %v2858_v28 = vmul.f32 %v6529_v52, %v2843_v2  ;;  %v2779_v63 = vmul.f32 %v6499_v41, %v2776_v58 }
 0x632   :  { %v2910_v36 = vpop.permute.xlu0 %2909  ;;  %7461 = vst [vmem:[#allocation56_spill] sm:$0xff] %v6711_v10  ;;  %v2872_v49 = vadd.f32 %v2864_v57, %v2850_v26  ;;  %v2873_v48 = vadd.f32 %v2865_v38, %v2851_v13  ;;  %v6719_v43 = vrot.slane %v6706_v34, %v5927_v62  ;;  %v2828_v59 = vmul.f32 %v6509_v8, %v2802_v51 }
 0x633   :  { %v2908_v47 = vpop.permute.xlu1 %2907  ;;  %v2803_v18 = vadd.f32 %v2795_v11, %v2781_v27  ;;  %v2782_v10 = vmul.f32 %v6499_v41, %v2773_v12  ;;  %v6725_v6 = vrot.slane %v6706_v34, %v5910_v54  ;;  %v2801_v52 = vadd.f32 %v2793_v30, %v2779_v63 }
 0x634   :  { %v2915_v58 = vsel %vm990_vm8, %v2906_v29, %v2908_v47  ;;  %v2914_v38 = vsel %vm990_vm8, %v2908_v47, %v2910_v36  ;;  %v2863_v51 = vrot.slane %v2855_v24, 1  ;;  %v2866_v11 = vrot.slane %v2858_v28, 1 }
 0x635   :  { %v2804_v26 = vadd.f32 %v2796_v61, %v2782_v10  ;;  %v2898_v41 = vmul.f32 %v6532_v15, %v2872_v49  ;;  %v2899_v54 = vmul.f32 %v6539_v9, %v2873_v48  ;;  %v2849_v63 = vmul.f32 %v6527_v19, %v2846_v60 }
 0x636   :  { %v2976_v56 = vpop.permute.xlu0 %2975  ;;  %v2852_v30 = vmul.f32 %v6527_v19, %v2843_v2  ;;  %v2926_v47 = vmul.f32 %v6564_v3, %v2915_v58  ;;  %v2927_v27 = vmul.f32 %v6564_v3, %v2914_v38  ;;  %v2827_v49 = vmul.f32 %v6517_v46, %v2801_v52 }
 0x637   :  { %v2912_v21 = vpop.permute.xlu1 %2911  ;;  %v2830_v19 = vmul.f32 %v6522_v42, %v2804_v26  ;;  %v2871_v2 = vadd.f32 %v2863_v51, %v2849_v63  ;;  %v2920_v26 = vmul.f32 %v6556_v45, %v2915_v58  ;;  %v2921_v51 = vmul.f32 %v6556_v45, %v2914_v38 }
 0x638   :  { %v2913_v57 = vsel %vm990_vm8, %v2910_v36, %v2912_v21  ;;  %v2916_v12 = vsel %vm990_vm8, %v2912_v21, %v2906_v29  ;;  %v2829_v29 = vmul.f32 %v6512_v40, %v2803_v18  ;;  %v2874_v24 = vadd.f32 %v2866_v11, %v2852_v30 }
 0x639   :  { %v2925_v36 = vmul.f32 %v6564_v3, %v2916_v12  ;;  %v2928_v10 = vmul.f32 %v6564_v3, %v2913_v57  ;;  %v6750_v21 = vadd.f32 %v2898_v41, %v2828_v59  ;;  %v2934_v40 = vrot.slane %v2926_v47, 1 }
 0x63a   :  { %v2980_v13 = vpop.permute.xlu0 %2979  ;;  %v6752_v8 = vadd.f32 %v2899_v54, %v2829_v29  ;;  %v2935_v46 = vrot.slane %v2927_v27, 1  ;;  %v2919_v9 = vmul.f32 %v6556_v45, %v2916_v12  ;;  %v2897_v41 = vmul.f32 %v6550_v32, %v2871_v2 }
 0x63b   :  { %v2978_v61 = vpop.permute.xlu1 %2977  ;;  %v2933_v28 = vrot.slane %v2925_v36, 1  ;;  %v2936_v15 = vrot.slane %v2928_v10, 1  ;;  %v2900_v54 = vmul.f32 %v6553_v44, %v2874_v24  ;;  %v2922_v63 = vmul.f32 %v6556_v45, %v2913_v57 }
 0x63c   :  { %v2985_v48 = vsel %vm1217_vm9, %v2976_v56, %v2978_v61  ;;  %v2984_v60 = vsel %vm1217_vm9, %v2978_v61, %v2980_v13  ;;  %v2942_v36 = vadd.f32 %v2934_v40, %v2920_v26  ;;  %v2943_v10 = vadd.f32 %v2935_v46, %v2921_v51 }
 0x63d   :  { %v2996_v3 = vmul.f32 %v6596_v4, %v2985_v48  ;;  %v2997_v18 = vmul.f32 %v6596_v4, %v2984_v60  ;;  %v2941_v30 = vadd.f32 %v2933_v28, %v2919_v9  ;;  %v2990_v29 = vmul.f32 %v6593_v5, %v2985_v48 }
 0x63e   :  { %v3078_v52 = vpop.permute.xlu0 %3077  ;;  %v2991_v2 = vmul.f32 %v6593_v5, %v2984_v60  ;;  %v2901_v9 = vadd.f32 %v2897_v41, %v2827_v49  ;;  %v2904_v60 = vadd.f32 %v2900_v54, %v2830_v19 }
 0x63f   :  { %v2982_v61 = vpop.permute.xlu1 %2981  ;;  %v3004_v12 = vrot.slane %v2996_v3, 1  ;;  %v3005_v47 = vrot.slane %v2997_v18, 1  ;;  %v2967_v46 = vmul.f32 %v6582_v17, %v2941_v30 }
 0x640   :  { %v2983_v59 = vsel %vm1217_vm9, %v2980_v13, %v2982_v61  ;;  %v2986_v11 = vsel %vm1217_vm9, %v2982_v61, %v2976_v56  ;;  %v2944_v13 = vadd.f32 %v2936_v15, %v2922_v63 }
 0x641   :  { %v2995_v27 = vmul.f32 %v6596_v4, %v2986_v11  ;;  %v2998_v58 = vmul.f32 %v6596_v4, %v2983_v59  ;;  %v2989_v24 = vmul.f32 %v6593_v5, %v2986_v11  ;;  %v2992_v57 = vmul.f32 %v6593_v5, %v2983_v59 }
 0x642   :  { %v3082_v38 = vpop.permute.xlu0 %3081  ;;  %v3012_v15 = vadd.f32 %v3004_v12, %v2990_v29  ;;  %v3013_v4 = vadd.f32 %v3005_v47, %v2991_v2  ;;  %v2968_v5 = vmul.f32 %v6567_v14, %v2942_v36  ;;  %v2969_v59 = vmul.f32 %v6579_v25, %v2943_v10 }
 0x643   :  { %v3080_v56 = vpop.permute.xlu1 %3079  ;;  %v3003_v61 = vrot.slane %v2995_v27, 1  ;;  %v3006_v45 = vrot.slane %v2998_v58, 1  ;;  %v2970_v11 = vmul.f32 %v6585_v31, %v2944_v13  ;;  %v2971_v54 = vadd.f32 %v2967_v46, %v2901_v9 }
 0x644   :  { %v3087_v28 = vsel %vm1615_vm10, %v3078_v52, %v3080_v56  ;;  %v3086_v40 = vsel %vm1615_vm10, %v3080_v56, %v3082_v38  ;;  %v3038_v47 = vmul.f32 %v6599_v7, %v3012_v15  ;;  %v3039_v27 = vmul.f32 %v6602_v22, %v3013_v4 }
 0x645   :  { %v3011_v48 = vadd.f32 %v3003_v61, %v2989_v24  ;;  %v3014_v18 = vadd.f32 %v3006_v45, %v2992_v57  ;;  %v3097_v26 = vmul.f32 %v6616_v39, %v3087_v28  ;;  %v3098_v49 = vmul.f32 %v6616_v39, %v3086_v40 }
 0x646   :  { %v3148_v3 = vpop.permute.xlu0 %3147  ;;  %v3091_v58 = vmul.f32 %v6613_v55, %v3087_v28  ;;  %v3092_v13 = vmul.f32 %v6613_v55, %v3086_v40  ;;  %v2972_v2 = vadd.f32 %v2968_v5, %v6750_v21  ;;  %v2974_v45 = vadd.f32 %v2970_v11, %v2904_v60 }
 0x647   :  { %v3084_v51 = vpop.permute.xlu1 %3083  ;;  %v3037_v41 = vmul.f32 %v6607_v33, %v3011_v48  ;;  %v3105_v63 = vrot.slane %v3097_v26, 1  ;;  %v3106_v30 = vrot.slane %v3098_v49, 1  ;;  %v3040_v10 = vmul.f32 %v6610_v37, %v3014_v18 }
 0x648   :  { %v3085_v12 = vsel %vm1615_vm10, %v3082_v38, %v3084_v51  ;;  %v3088_v19 = vsel %vm1615_vm10, %v3084_v51, %v3078_v52  ;;  %v2973_v52 = vadd.f32 %v2969_v59, %v6752_v8  ;;  %v6803_v21 = vrot.slane %v6706_v34, %v5931_v1 }
 0x649   :  { %v3099_v29 = vmul.f32 %v6616_v39, %v3085_v12  ;;  %v3100_v56 = vmul.f32 %v6616_v39, %v3088_v19  ;;  %v3041_v9 = vadd.f32 %v3037_v41, %v2971_v54  ;;  %v3113_v57 = vadd.f32 %v3105_v63, %v3091_v58 }
 0x64a   :  { %v3152_v36 = vpop.permute.xlu0 %3151  ;;  %v3114_v28 = vadd.f32 %v3106_v30, %v3092_v13  ;;  %v3042_v8 = vadd.f32 %v3038_v47, %v2972_v2  ;;  %v3043_v4 = vadd.f32 %v3039_v27, %v2973_v52  ;;  %v3044_v48 = vadd.f32 %v3040_v10, %v2974_v45  ;;  %v7463_v27 = vld [vmem:[#allocation40_spill] sm:$0xff]  ;;  %v7464_v13 = vld [vmem:[#allocation42_spill] sm:$0xff] }
 0x64b   :  { %v3150_v38 = vpop.permute.xlu1 %3149  ;;  %v3107_v40 = vrot.slane %v3099_v29, 1  ;;  %v3108_v46 = vrot.slane %v3100_v56, 1  ;;  %v3093_v60 = vmul.f32 %v6613_v55, %v3085_v12  ;;  %v3094_v49 = vmul.f32 %v6613_v55, %v3088_v19  ;;  %v7462_v19 = vld [vmem:[#allocation41_spill] sm:$0xff] }
 0x64c   :  { %v3157_v24 = vsel %vm1842_vm11, %v3148_v3, %v3150_v38  ;;  %v3156_v61 = vsel %vm1842_vm11, %v3150_v38, %v3152_v36  ;;  %v3073_v59 = vadd.f32 %v6541_v20, %v3041_v9  ;;  %v3139_v11 = vmul.f32 %v6623_v50, %v3113_v57  ;;  %v7466_v9 = vld [vmem:[#allocation44_spill] sm:$0xff] }
 0x64d   :  { %v3167_v15 = vmul.f32 %v6651_v16, %v3157_v24  ;;  %v3168_v18 = vmul.f32 %v6651_v16, %v3156_v61  ;;  %v3140_v1 = vmul.f32 %v6626_v23, %v3114_v28  ;;  %v3115_v63 = vadd.f32 %v3107_v40, %v3093_v60 }
 0x64e   :  { %v3218_v39 = vpop.permute.xlu0 %3217  ;;  %v3116_v30 = vadd.f32 %v3108_v46, %v3094_v49  ;;  %v3161_v54 = vmul.f32 %v6629_v35, %v3157_v24  ;;  %v6818_v55 = vrot.slane %v6706_v34, %v5929_v0  ;;  %v3074_v47 = vadd.f32 %v7462_v19, %v3042_v8  ;;  %v7465_v24 = vld [vmem:[#allocation43_spill] sm:$0xff] }
 0x64f   :  { %v3154_v26 = vpop.permute.xlu1 %3153  ;;  %v3175_v51 = vrot.slane %v3167_v15, 1  ;;  %v3075_v20 = vadd.f32 %v7463_v27, %v3043_v4  ;;  %v3176_v58 = vrot.slane %v3168_v18, 1  ;;  %v3076_v29 = vadd.f32 %v7464_v13, %v3044_v48  ;;  %v7468_v18 = vld [vmem:[#allocation45_spill] sm:$0xff] }
 0x650   :  { %v3155_v5 = vsel %vm1842_vm11, %v3152_v36, %v3154_v26  ;;  %v3158_v41 = vsel %vm1842_vm11, %v3154_v26, %v3148_v3  ;;  %v3162_v56 = vmul.f32 %v6629_v35, %v3156_v61  ;;  %v3143_v2 = vadd.f32 %v3139_v11, %v3073_v59 }
 0x651   :  { %v3169_v36 = vmul.f32 %v6651_v16, %v3155_v5  ;;  %v3183_v3 = vadd.f32 %v3175_v51, %v3161_v54  ;;  %v3170_v38 = vmul.f32 %v6651_v16, %v3158_v41  ;;  %v3144_v52 = vadd.f32 %v3140_v1, %v3074_v47  ;;  %v7467_v16 = vld [vmem:[#allocation50_spill] sm:$0xff] }
 0x652   :  { %v3222_v12 = vpop.permute.xlu0 %3221  ;;  %v3141_v45 = vmul.f32 %v7465_v24, %v3115_v63  ;;  %v3142_v57 = vmul.f32 %v7466_v9, %v3116_v30  ;;  %v3163_v28 = vmul.f32 %v6629_v35, %v3155_v5  ;;  %v3164_v40 = vmul.f32 %v6629_v35, %v3158_v41  ;;  %v7469_v5 = vld [vmem:[#allocation49_spill] sm:$0xff] }
 0x653   :  { %v3220_v10 = vpop.permute.xlu1 %3219  ;;  %v3184_v61 = vadd.f32 %v3176_v58, %v3162_v56  ;;  %v3177_v15 = vrot.slane %v3169_v36, 1  ;;  %v3209_v26 = vmul.f32 %v7468_v18, %v3183_v3  ;;  %v3178_v60 = vrot.slane %v3170_v38, 1  ;;  %v7470_v3 = vld [vmem:[#allocation46_spill] sm:$0xff] }
 0x654   :  { %v3227_v0 = vsel %vm2069_vm12, %v3218_v39, %v3220_v10  ;;  %v3226_v34 = vsel %vm2069_vm12, %v3220_v10, %v3222_v12  ;;  %v3145_v41 = vadd.f32 %v3141_v45, %v3075_v20  ;;  %v3146_v63 = vadd.f32 %v3142_v57, %v3076_v29  ;;  %v7472_v45 = vld [vmem:[#allocation51_spill] sm:$0xff] }
 0x655   :  { %v3237_v8 = vmul.f32 %v7467_v16, %v3227_v0  ;;  %v3238_v4 = vmul.f32 %v7467_v16, %v3226_v34  ;;  %v3231_v59 = vmul.f32 %v7469_v5, %v3227_v0  ;;  %v3232_v11 = vmul.f32 %v7469_v5, %v3226_v34  ;;  %v7471_v0 = vld [vmem:[#allocation56_spill] sm:$0xff] }
 0x656   :  { %v3288_v46 = vpop.permute.xlu0 %3287  ;;  %v3185_v47 = vadd.f32 %v3177_v15, %v3163_v28  ;;  %v3213_v29 = vadd.f32 %v3209_v26, %v3143_v2  ;;  %v3210_v56 = vmul.f32 %v7470_v3, %v3184_v61  ;;  %v3186_v38 = vadd.f32 %v3178_v60, %v3164_v40 }
 0x657   :  { %v3224_v48 = vpop.permute.xlu1 %3223  ;;  %v3245_v35 = vrot.slane %v3237_v8, 1  ;;  %v3246_v1 = vrot.slane %v3238_v4, 1  ;;  %v7473_v8 = vld [vmem:[#allocation47_spill] sm:$0xff] }
 0x658   :  { %v3225_v49 = vsel %vm2069_vm12, %v3222_v12, %v3224_v48  ;;  %v3228_v51 = vsel %vm2069_vm12, %v3224_v48, %v3218_v39  ;;  %v3211_v4 = vmul.f32 %v7473_v8, %v3185_v47  ;;  %v7474_v48 = vld [vmem:[#allocation52_spill] sm:$0xff] }
 0x659   :  { %v3239_v30 = vmul.f32 %v7467_v16, %v3225_v49  ;;  %v3240_v54 = vmul.f32 %v7467_v16, %v3228_v51  ;;  %v3253_v27 = vadd.f32 %v3245_v35, %v3231_v59  ;;  %v3254_v58 = vadd.f32 %v3246_v1, %v3232_v11  ;;  %v7475_v59 = vld [vmem:[#allocation53_spill] sm:$0xff] }
 0x65a   :  { %v3292_v19 = vpop.permute.xlu0 %3291  ;;  %v3233_v12 = vmul.f32 %v7469_v5, %v3225_v49  ;;  %v3234_v28 = vmul.f32 %v7469_v5, %v3228_v51  ;;  %v3214_v1 = vadd.f32 %v3210_v56, %v3144_v52  ;;  %v3215_v52 = vadd.f32 %v3211_v4, %v3145_v41  ;;  %v7478_v56 = vld [vmem:[#allocation55_spill] sm:$0xff] }
 0x65b   :  { %v3290_v36 = vpop.permute.xlu1 %3289  ;;  %v3247_v39 = vrot.slane %v3239_v30, 1  ;;  %v3248_v10 = vrot.slane %v3240_v54, 1  ;;  %v3279_v57 = vmul.f32 %v7472_v45, %v3253_v27  ;;  %v3280_v49 = vmul.f32 %v7474_v48, %v3254_v58  ;;  %v7476_v54 = vld [vmem:[#allocation48_spill] sm:$0xff]  ;;  %v7477_v58 = vld [vmem:[#allocation54_spill] sm:$0xff] }
 0x65c   :  { %v3297_v13 = vsel %vm2296_vm13, %v3288_v46, %v3290_v36  ;;  %v3296_v20 = vsel %vm2296_vm13, %v3290_v36, %v3292_v19  ;;  %v3212_v47 = vmul.f32 %v7476_v54, %v3186_v38 }
 0x65d   :  { %v3307_v34 = vmul.f32 %v7471_v0, %v3297_v13  ;;  %v3255_v15 = vadd.f32 %v3247_v39, %v3233_v12  ;;  %v3308_v16 = vmul.f32 %v7471_v0, %v3296_v20  ;;  %v3301_v35 = vmul.f32 %v7475_v59, %v3297_v13 }
 0x65e   :  { %v3256_v26 = vadd.f32 %v3248_v10, %v3234_v28  ;;  %v3302_v40 = vmul.f32 %v7475_v59, %v3296_v20  ;;  %v3283_v27 = vadd.f32 %v3279_v57, %v3213_v29  ;;  %v3284_v20 = vadd.f32 %v3280_v49, %v3214_v1 }
 0x65f   :  { %v3315_v11 = vrot.slane %v3307_v34, 1  ;;  %v3294_v2 = vpop.permute.xlu1 %3293  ;;  %v3316_v61 = vrot.slane %v3308_v16, 1  ;;  %v3281_v12 = vmul.f32 %v7477_v58, %v3255_v15  ;;  %v3216_v15 = vadd.f32 %v3212_v47, %v3146_v63 }
 0x660   :  { %v3295_v60 = vsel %vm2296_vm13, %v3292_v19, %v3294_v2  ;;  %v3298_v5 = vsel %vm2296_vm13, %v3294_v2, %v3288_v46  ;;  %v3282_v34 = vmul.f32 %v7478_v56, %v3256_v26 }
 0x661   :  { %v3323_v51 = vadd.f32 %v3315_v11, %v3301_v35  ;;  %v3309_v30 = vmul.f32 %v7471_v0, %v3295_v60  ;;  %v3324_v36 = vadd.f32 %v3316_v61, %v3302_v40  ;;  %v3303_v10 = vmul.f32 %v7475_v59, %v3295_v60 }
 0x662   :  { %v3310_v13 = vmul.f32 %v7471_v0, %v3298_v5  ;;  %v3304_v38 = vmul.f32 %v7475_v59, %v3298_v5  ;;  %v3285_v35 = vadd.f32 %v3281_v12, %v3215_v52  ;;  %v3286_v61 = vadd.f32 %v3282_v34, %v3216_v15  ;;  %v7479_v34 = vld [vmem:[#allocation21_spill] sm:$0xff] }
 0x663   :  { %v3349_v39 = vmul.f32 %v6719_v43, %v3323_v51  ;;  %v3317_v19 = vrot.slane %v3309_v30, 1  ;;  %v3350_v46 = vmul.f32 %v6725_v6, %v3324_v36 }
 0x664   :  { %v3318_v29 = vrot.slane %v3310_v13, 1 }
 0x665   :  { %v3353_v28 = vadd.f32 %v3349_v39, %v3283_v27  ;;  %v3325_v57 = vadd.f32 %v3317_v19, %v3303_v10  ;;  %v3354_v16 = vadd.f32 %v3350_v46, %v3284_v20  ;;  %v7480_v46 = vmax.f32 %v7479_v34, 0.0 }
 0x666   :  { %v3326_v2 = vadd.f32 %v3318_v29, %v3304_v38  ;;  %v7481_v29 = vld [vmem:[#allocation23_spill] sm:$0xff] }
 0x667   :  { %v3357_v11 = vsub.f32 0.0, %v3353_v28  ;;  %v3351_v40 = vmul.f32 %v6803_v21, %v3325_v57  ;;  %v3358_v0 = vsub.f32 0.0, %v3354_v16  ;;  %v7482_v57 = vmax.f32 %v7481_v29, 0.0 }
 0x668   :  { %v3352_v4 = vmul.f32 %v6818_v55, %v3326_v2  ;;  %v7483_v2 = vld [vmem:[#allocation22_spill] sm:$0xff] }
 0x669   :  { %v3361_v41 = vmul.f32 1.442695, %v3357_v11  ;;  %v3355_v49 = vadd.f32 %v3351_v40, %v3285_v35  ;;  %v3363_v26 = vmul.f32 1.442695, %v3358_v0  ;;  %v7484_v40 = vmax.f32 %v7483_v2, 0.0 }
 0x66a   :  { %v3356_v60 = vadd.f32 %v3352_v4, %v3286_v61  ;;  %v7485_v61 = vld [vmem:[#allocation24_spill] sm:$0xff] }
 0x66b   :  { %5413 = vpow2.f32 %v3361_v41  ;;  %v3359_v1 = vsub.f32 0.0, %v3355_v49  ;;  %v7486_v41 = vmax.f32 %v7485_v61, 0.0  ;;  %v7487_v49 = vld [vmem:[#allocation19_spill] sm:$0xff] }
 0x66c   :  { %5415 = vpow2.f32 %v3363_v26  ;;  %v3360_v59 = vsub.f32 0.0, %v3356_v60  ;;  %v7488_v26 = vmax.f32 %v7487_v49, 0.0  ;;  %v2508_v49 = vld [vmem:[%s7373_s12 + $0x8] sm:$0xff] }
 0x66d   :  { %v3365_v51 = vmul.f32 1.442695, %v3359_v1  ;;  %v7489_v1 = vld [vmem:[#allocation20_spill] sm:$0xff] }
 0x66e   :  { %v3367_v63 = vmul.f32 1.442695, %v3360_v59 }
 0x66f   :  { %5417 = vpow2.f32 %v3365_v51  ;;  %v7491_v51 = vld [vmem:[#allocation25_spill] sm:$0xff] }
 0x670   :  { %5419 = vpow2.f32 %v3367_v63  ;;  %v7492_v63 = vmax.f32 %v7491_v51, 0.0 }
 0x678   :  { %v5414_v5 = vpop.eup %5413 }
 0x679   :  { %v5416_v30 = vpop.eup %5415  ;;  %v3369_v47 = vadd.f32 1.0, %v5414_v5 }
 0x67a   :  { %v3370_v27 = vadd.f32 1.0, %v5416_v30  ;;  %v7493_v30 = vld [vmem:[#allocation26_spill] sm:$0xff] }
 0x67b   :  { %5421 = vrcp.f32 %v3369_v47  ;;  %v7494_v47 = vmax.f32 %v7493_v30, 0.0 }
 0x67c   :  { %v5418_v12 = vpop.eup %5417  ;;  %5423 = vrcp.f32 %v3370_v27 }
 0x67d   :  { %v3371_v36 = vadd.f32 1.0, %v5418_v12  ;;  %v5420_v39 = vpop.eup %5419 }
 0x67e   :  { %v3372_v10 = vadd.f32 1.0, %v5420_v39 }
 0x67f   :  { %5425 = vrcp.f32 %v3371_v36 }
 0x680   :  { %5427 = vrcp.f32 %v3372_v10  ;;  %v7495_v10 = vld [vmem:[#allocation38_spill] sm:$0xff] }
 0x688   :  { %v5422_v13 = vpop.eup %5421 }
 0x689   :  { %v5424_v19 = vpop.eup %5423  ;;  %v3384_v52 = vrot.slane %v5422_v13, %v5927_v62 }
 0x68a   :  { %v3388_v20 = vrot.slane %v5424_v19, %v5927_v62 }
 0x68b   :  { %v6878_v28 = vmul.f32 %v3384_v52, %v7480_v46  ;;  %v6902_v60 = vmul.f32 %v3384_v52, %v7488_v26 }
 0x68c   :  { %v5426_v38 = vpop.eup %5425  ;;  %v6882_v15 = vmul.f32 %v3388_v20, %v7482_v57 }
 0x68d   :  { %v3392_v16 = vrot.slane %v5426_v38, %v5927_v62  ;;  %3441 = vrot.lane.b32.xlu0 %v6878_v28, %s5564_s23  ;;  %v5428_v35 = vpop.eup %5427 }
 0x68e   :  { %3445 = vrot.lane.b32.xlu1 %v6882_v15, %s5564_s23  ;;  %v3396_v11 = vrot.slane %v5428_v35, %v5927_v62  ;;  %v7490_v62 = vmax.f32 %v7489_v1, 0.0 }
 0x68f   :  { %v6892_v0 = vmul.f32 %v3392_v16, %v7484_v40  ;;  %v6914_v5 = vmul.f32 %v3392_v16, %v7492_v63  ;;  %v7496_v16 = vld [vmem:[#allocation39_spill] sm:$0xff] }
 0x690   :  { %v6896_v4 = vmul.f32 %v3396_v11, %v7486_v41  ;;  %v6908_v59 = vmul.f32 %v3388_v20, %v7490_v62  ;;  %v6920_v27 = vmul.f32 %v3396_v11, %v7494_v47  ;;  %v2507_v41 = vld [vmem:[%s7373_s12] sm:$0xff]  ;;  %s5571_s12 = smov [#allocation10]  }
 0x691   :  { %3449 = vrot.lane.b32.xlu0 %v6892_v0, %s5564_s23 }
 0x692   :  { %3453 = vrot.lane.b32.xlu1 %v6896_v4, %s5564_s23 }
 0x695   :  { %3439 = vrot.lane.b32.xlu0 %v6902_v60, %s5564_s23 }
 0x696   :  { %3443 = vrot.lane.b32.xlu1 %v6908_v59, %s5564_s23 }
 0x699   :  { %3447 = vrot.lane.b32.xlu0 %v6914_v5, %s5564_s23 }
 0x69a   :  { %3451 = vrot.lane.b32.xlu1 %v6920_v27, %s5564_s23 }
 0x69d   :  { %3407 = vrot.lane.b32.xlu0 %v6878_v28, %s5563_s22 }
 0x69e   :  { %3411 = vrot.lane.b32.xlu1 %v6882_v15, %s5563_s22 }
 0x6a1   :  { %3415 = vrot.lane.b32.xlu0 %v6892_v0, %s5563_s22 }
 0x6a2   :  { %3419 = vrot.lane.b32.xlu1 %v6896_v4, %s5563_s22 }
 0x6a5   :  { %3405 = vrot.lane.b32.xlu0 %v6902_v60, %s5563_s22 }
 0x6a6   :  { %3409 = vrot.lane.b32.xlu1 %v6908_v59, %s5563_s22 }
 0x6a9   :  { %3413 = vrot.lane.b32.xlu0 %v6914_v5, %s5563_s22 }
 0x6aa   :  { %3417 = vrot.lane.b32.xlu1 %v6920_v27, %s5563_s22 }
 0x6ad   :  { %3795 = vrot.lane.b32.xlu0 %v6878_v28, %s5565_s25 }
 0x6ae   :  { %3799 = vrot.lane.b32.xlu1 %v6882_v15, %s5565_s25 }
 0x6b1   :  { %3803 = vrot.lane.b32.xlu0 %v6892_v0, %s5565_s25 }
 0x6b2   :  { %3807 = vrot.lane.b32.xlu1 %v6896_v4, %s5565_s25 }
 0x6b5   :  { %3793 = vrot.lane.b32.xlu0 %v6902_v60, %s5565_s25 }
 0x6b6   :  { %3797 = vrot.lane.b32.xlu1 %v6908_v59, %s5565_s25 }
 0x6b9   :  { %3801 = vrot.lane.b32.xlu0 %v6914_v5, %s5565_s25 }
 0x6ba   :  { %3805 = vrot.lane.b32.xlu1 %v6920_v27, %s5565_s25 }
 0x6bd   :  { %3997 = vrot.lane.b32.xlu0 %v6878_v28, %s5566_s26 }
 0x6be   :  { %4001 = vrot.lane.b32.xlu1 %v6882_v15, %s5566_s26 }
 0x6c1   :  { %4005 = vrot.lane.b32.xlu0 %v6892_v0, %s5566_s26 }
 0x6c2   :  { %4009 = vrot.lane.b32.xlu1 %v6896_v4, %s5566_s26 }
 0x6c5   :  { %3995 = vrot.lane.b32.xlu0 %v6902_v60, %s5566_s26 }
 0x6c6   :  { %3999 = vrot.lane.b32.xlu1 %v6908_v59, %s5566_s26 }
 0x6c9   :  { %4003 = vrot.lane.b32.xlu0 %v6914_v5, %s5566_s26 }
 0x6ca   :  { %4007 = vrot.lane.b32.xlu1 %v6920_v27, %s5566_s26  ;;  %s5216_s26 = sshll.u32 %s5571_s12, 4  ;;  %s5217_s26 = int_to_ptr.vmem [resolvable:$true] %s5216_s26 }
 0x6cb   :  { %p5506_p7 = scmp.lt.s32.totalorder %s5217_s26, %s5217_s26 }
 0x6cd   :  { %4369 = vrot.lane.b32.xlu0 %v6878_v28, %s5567_s27 }
 0x6ce   :  { %4373 = vrot.lane.b32.xlu1 %v6882_v15, %s5567_s27 }
 0x6d1   :  { %4377 = vrot.lane.b32.xlu0 %v6892_v0, %s5567_s27 }
 0x6d2   :  { %4381 = vrot.lane.b32.xlu1 %v6896_v4, %s5567_s27 }
 0x6d5   :  { %4367 = vrot.lane.b32.xlu0 %v6902_v60, %s5567_s27 }
 0x6d6   :  { %4371 = vrot.lane.b32.xlu1 %v6908_v59, %s5567_s27 }
 0x6d9   :  { %4375 = vrot.lane.b32.xlu0 %v6914_v5, %s5567_s27 }
 0x6da   :  { %4379 = vrot.lane.b32.xlu1 %v6920_v27, %s5567_s27  ;;  %s5501_s27 = scalar_lea.vmem %s5217_s26, 1024 }
 0x6db   :  { %p5502_p6 = scmp.ne.s32.totalorder %s5217_s26, %s5501_s27  ;;  %p5507_p8 = scmp.lt.s32.totalorder %s5501_s27, %s5501_s27 }
 0x6dd   :  { %4571 = vrot.lane.b32.xlu0 %v6878_v28, %s5568_s28  ;;  %p5508_p9 = por %p5507_p8, %p5506_p7 }
 0x6de   :  { %4575 = vrot.lane.b32.xlu1 %v6882_v15, %s5568_s28 }
 0x6df   :  { %p5509_p10 = pnand %p5508_p9, %p5502_p6 }
 0x6e1   :  { %4579 = vrot.lane.b32.xlu0 %v6892_v0, %s5568_s28 }
 0x6e2   :  { %4583 = vrot.lane.b32.xlu1 %v6896_v4, %s5568_s28 }
 0x6e5   :  { %4569 = vrot.lane.b32.xlu0 %v6902_v60, %s5568_s28 }
 0x6e6   :  { %4573 = vrot.lane.b32.xlu1 %v6908_v59, %s5568_s28 }
 0x6e9   :  { %4577 = vrot.lane.b32.xlu0 %v6914_v5, %s5568_s28 }
 0x6ea   :  { %4581 = vrot.lane.b32.xlu1 %v6920_v27, %s5568_s28 }
 0x6ed   :  { %4773 = vrot.lane.b32.xlu0 %v6878_v28, %s5569_s2 }
 0x6ee   :  { %4777 = vrot.lane.b32.xlu1 %v6882_v15, %s5569_s2 }
 0x6f1   :  { %4781 = vrot.lane.b32.xlu0 %v6892_v0, %s5569_s2 }
 0x6f2   :  { %4785 = vrot.lane.b32.xlu1 %v6896_v4, %s5569_s2 }
 0x6f5   :  { %4771 = vrot.lane.b32.xlu0 %v6902_v60, %s5569_s2 }
 0x6f6   :  { %4775 = vrot.lane.b32.xlu1 %v6908_v59, %s5569_s2 }
 0x6f9   :  { %4779 = vrot.lane.b32.xlu0 %v6914_v5, %s5569_s2 }
 0x6fa   :  { %4783 = vrot.lane.b32.xlu1 %v6920_v27, %s5569_s2 }
 0x6fd   :  { %4975 = vrot.lane.b32.xlu0 %v6878_v28, %s5570_s18 }
 0x6fe   :  { %4979 = vrot.lane.b32.xlu1 %v6882_v15, %s5570_s18 }
 0x6ff   :  { %v3442_v12 = vpop.permute.xlu0 %3441 }
 0x700   :  { %v3446_v36 = vpop.permute.xlu1 %3445 }
 0x701   :  { %v3460_v39 = vsel %vm611_vm6, %v3442_v12, %v3446_v36  ;;  %4983 = vrot.lane.b32.xlu0 %v6892_v0, %s5570_s18 }
 0x702   :  { %v3468_v13 = vmul.f32 %v3460_v39, %v7495_v10  ;;  %4987 = vrot.lane.b32.xlu1 %v6896_v4, %s5570_s18 }
 0x703   :  { %v3450_v19 = vpop.permute.xlu0 %3449 }
 0x704   :  { %3507 = vmatprep.subr.mxu0 %v3468_v13  ;;  %v3458_v52 = vsel %vm611_vm6, %v3446_v36, %v3450_v19  ;;  %v3454_v20 = vpop.permute.xlu1 %3453  ;;  %v7497_v13 = vld [vmem:[#allocation35_spill] sm:$0xff] }
 0x705   :  { %4973 = vrot.lane.b32.xlu0 %v6902_v60, %s5570_s18  ;;  %v3456_v34 = vsel %vm611_vm6, %v3450_v19, %v3454_v20  ;;  %v3462_v46 = vsel %vm611_vm6, %v3454_v20, %v3442_v12  ;;  %v3469_v35 = vmul.f32 %v3458_v52, %v7496_v16  ;;  %v3471_v12 = vld [vmem:[#allocation9 + $0x10] sm:$0xff]  ;;  %v7498_v52 = vmov 0.0  }
 0x706   :  { %v3467_v38 = vmul.f32 %v3462_v46, %v6550_v32  ;;  %v3470_v29 = vmul.f32 %v3456_v34, %v6553_v44  ;;  %4977 = vrot.lane.b32.xlu1 %v6908_v59, %s5570_s18 }
 0x707   :  { %v3440_v57 = vpop.permute.xlu0 %3439 }
 0x708   :  { %v3444_v11 = vpop.permute.xlu1 %3443  ;;  %3508 = vmatpush1.msra.mxu0 %v3467_v38  ;;  %3584 = vmatprep.subr.mxu1 %v3470_v29  ;;  %v7499_v29 = vld [vmem:[#allocation37_spill] sm:$0xff] }
 0x709   :  { %v3459_v2 = vsel %vm611_vm6, %v3440_v57, %v3444_v11  ;;  %4981 = vrot.lane.b32.xlu0 %v6914_v5, %s5570_s18  ;;  %3585 = vmatpush1.msra.mxu1 %v3469_v35 }
 0x70a   :  { %v3464_v40 = vmul.f32 %v3459_v2, %v7495_v10  ;;  %4985 = vrot.lane.b32.xlu1 %v6920_v27, %s5570_s18 }
 0x70b   :  { %v3448_v61 = vpop.permute.xlu0 %3447 }
 0x70c   :  { %v3457_v26 = vsel %vm611_vm6, %v3444_v11, %v3448_v61  ;;  %v3452_v1 = vpop.permute.xlu1 %3451  ;;  %3509 = vmatprep.subr.mxu0 %v3464_v40  ;;  %v7500_v11 = vld [vmem:[#allocation36_spill] sm:$0xff] }
 0x70d   :  { %v3455_v62 = vsel %vm611_vm6, %v3448_v61, %v3452_v1  ;;  %v3461_v51 = vsel %vm611_vm6, %v3452_v1, %v3440_v57  ;;  %2511 = vperm.xlu0 %5404, %v2507_v41   ;;  %v3465_v36 = vmul.f32 %v3457_v26, %v7496_v16 }
 0x70e   :  { %v3463_v63 = vmul.f32 %v3461_v51, %v6550_v32  ;;  %v3466_v30 = vmul.f32 %v3455_v62, %v6553_v44  ;;  %2516 = vperm.xlu1 %5403, %v2508_v49   ;;  %v3472_v44 = vld [vmem:[#allocation9 + $0x18] sm:$0xff] }
 0x70f   :  { %v3408_v47 = vpop.permute.xlu0 %3407 }
 0x710   :  { %v3412_v39 = vpop.permute.xlu1 %3411  ;;  %3510 = vmatpush1.msra.mxu0 %v3463_v63  ;;  %3586 = vmatprep.subr.mxu1 %v3466_v30 }
 0x711   :  { %v3426_v10 = vsel %vm554_vm7, %v3408_v47, %v3412_v39  ;;  %3587 = vmatpush1.msra.mxu1 %v3465_v36  ;;  %5323 = vmatmul.mubr.msk.f32.vlgmr.msra.gmra.mxu0 %vm323_vm3, %v3471_v12 }
 0x712   :  { %v3434_v19 = vmul.f32 %v3426_v10, %v7497_v13  ;;  %5179 = vperm.xlu1 %5403, %v2507_v41   ;;  %5325 = vmatmul.mubr.msk.f32.vlgmr.msra.gmra.mxu1 %vm323_vm3, %v3471_v12  ;;  %v3437_v12 = vld [vmem:[#allocation9] sm:$0xff] }
 0x713   :  { %v3416_v32 = vpop.permute.xlu0 %3415  ;;  %3549 = vmatprep.mubr.f32.mxu0 %v7498_v52  ;;  %3626 = vmatprep.mubr.f32.mxu1 %v7498_v52 }
 0x714   :  { %v3424_v20 = vsel %vm554_vm7, %v3412_v39, %v3416_v32  ;;  %v3420_v34 = vpop.permute.xlu1 %3419  ;;  %3667 = vmatprep.subr.mxu0 %v3434_v19  ;;  %5184 = vperm.xlu0 %5404, %v2508_v49  }
 0x715   :  { %v3422_v46 = vsel %vm554_vm7, %v3416_v32, %v3420_v34  ;;  %v3428_v38 = vsel %vm554_vm7, %v3420_v34, %v3408_v47  ;;  %5324 = vmatmul.mubr.msk.f32.gmra.mxu0 %vm323_vm3, %v3472_v44  ;;  %v3435_v2 = vmul.f32 %v3424_v20, %v7500_v11 }
 0x716   :  { %v3433_v57 = vmul.f32 %v3428_v38, %v7499_v29  ;;  %v3436_v16 = vmul.f32 %v3422_v46, %v6522_v42  ;;  %5326 = vmatmul.mubr.msk.f32.gmra.mxu1 %vm323_vm3, %v3472_v44  ;;  %3703 = vmatprep.mubr.f32.mxu0 %v7498_v52 }
 0x717   :  { %v3406_v35 = vpop.permute.xlu0 %3405  ;;  %3780 = vmatprep.mubr.f32.mxu1 %v7498_v52 }
 0x718   :  { %v3410_v40 = vpop.permute.xlu1 %3409  ;;  %3668 = vmatpush1.msra.mxu0 %v3433_v57  ;;  %3744 = vmatprep.subr.mxu1 %v3436_v16 }
 0x719   :  { %v3425_v61 = vsel %vm554_vm7, %v3406_v35, %v3410_v40  ;;  %3745 = vmatpush1.msra.mxu1 %v3435_v2 }
 0x71a   :  { %v3430_v41 = vmul.f32 %v3425_v61, %v7497_v13 }
 0x71b   :  { %v3414_v49 = vpop.permute.xlu0 %3413 }
 0x71c   :  { %v3423_v26 = vsel %vm554_vm7, %v3410_v40, %v3414_v49  ;;  %v3418_v1 = vpop.permute.xlu1 %3417  ;;  %3669 = vmatprep.subr.mxu0 %v3430_v41 }
 0x71d   :  { %v3421_v62 = vsel %vm554_vm7, %v3414_v49, %v3418_v1  ;;  %v3427_v51 = vsel %vm554_vm7, %v3418_v1, %v3406_v35  ;;  %v3431_v36 = vmul.f32 %v3423_v26, %v7500_v11 }
 0x71e   :  { %v3429_v63 = vmul.f32 %v3427_v51, %v7499_v29  ;;  %v3432_v30 = vmul.f32 %v3421_v62, %v6522_v42  ;;  %v3438_v42 = vld [vmem:[#allocation9 + $0x8] sm:$0xff]  ;;  %v3825_v51 = vld [vmem:[#allocation9 + $0x20] sm:$0xff] }
 0x71f   :  { %v3796_v47 = vpop.permute.xlu0 %3795 }
 0x720   :  { %v3800_v39 = vpop.permute.xlu1 %3799  ;;  %3670 = vmatpush1.msra.mxu0 %v3429_v63  ;;  %3746 = vmatprep.subr.mxu1 %v3432_v30 }
 0x721   :  { %v3814_v10 = vsel %vm990_vm8, %v3796_v47, %v3800_v39  ;;  %3747 = vmatpush1.msra.mxu1 %v3431_v36  ;;  %5327 = vmatmul.mubr.msk.f32.vlgmr.msra.gmra.mxu0 %vm323_vm3, %v3437_v12 }
 0x722   :  { %v3822_v13 = vmul.f32 %v3814_v10, %v6567_v14  ;;  %5329 = vmatmul.mubr.msk.f32.vlgmr.msra.gmra.mxu1 %vm323_vm3, %v3437_v12  ;;  %3709 = vmatprep.mubr.f32.mxu0 %v7498_v52 }
 0x723   :  { %v3804_v19 = vpop.permute.xlu0 %3803  ;;  %3786 = vmatprep.mubr.f32.mxu1 %v7498_v52 }
 0x724   :  { %v3812_v32 = vsel %vm990_vm8, %v3800_v39, %v3804_v19  ;;  %v3808_v44 = vpop.permute.xlu1 %3807  ;;  %3861 = vmatprep.subr.mxu0 %v3822_v13 }
 0x725   :  { %v3810_v20 = vsel %vm990_vm8, %v3804_v19, %v3808_v44  ;;  %v3816_v34 = vsel %vm990_vm8, %v3808_v44, %v3796_v47  ;;  %5328 = vmatmul.mubr.msk.f32.gmra.mxu0 %vm323_vm3, %v3438_v42  ;;  %v3823_v57 = vmul.f32 %v3812_v32, %v6579_v25 }
 0x726   :  { %v3821_v46 = vmul.f32 %v3816_v34, %v6582_v17  ;;  %v3824_v38 = vmul.f32 %v3810_v20, %v6585_v31  ;;  %5330 = vmatmul.mubr.msk.f32.gmra.mxu1 %vm323_vm3, %v3438_v42  ;;  %3897 = vmatprep.mubr.f32.mxu0 %v7498_v52 }
 0x727   :  { %v3794_v29 = vpop.permute.xlu0 %3793  ;;  %3974 = vmatprep.mubr.f32.mxu1 %v7498_v52 }
 0x728   :  { %v3798_v16 = vpop.permute.xlu1 %3797  ;;  %3862 = vmatpush1.msra.mxu0 %v3821_v46  ;;  %3938 = vmatprep.subr.mxu1 %v3824_v38 }
 0x729   :  { %v3813_v35 = vsel %vm990_vm8, %v3794_v29, %v3798_v16  ;;  %3939 = vmatpush1.msra.mxu1 %v3823_v57 }
 0x72a   :  { %v3818_v11 = vmul.f32 %v3813_v35, %v6567_v14 }
 0x72b   :  { %v3802_v2 = vpop.permute.xlu0 %3801 }
 0x72c   :  { %v3811_v40 = vsel %vm990_vm8, %v3798_v16, %v3802_v2  ;;  %v3806_v61 = vpop.permute.xlu1 %3805  ;;  %3863 = vmatprep.subr.mxu0 %v3818_v11 }
 0x72d   :  { %v3809_v41 = vsel %vm990_vm8, %v3802_v2, %v3806_v61  ;;  %v3815_v49 = vsel %vm990_vm8, %v3806_v61, %v3794_v29  ;;  %v3819_v14 = vmul.f32 %v3811_v40, %v6579_v25  ;;  %v4027_v2 = vld [vmem:[#allocation9 + $0x30] sm:$0xff] }
 0x72e   :  { %v3817_v26 = vmul.f32 %v3815_v49, %v6582_v17  ;;  %v3820_v1 = vmul.f32 %v3809_v41, %v6585_v31  ;;  %v3826_v17 = vld [vmem:[#allocation9 + $0x28] sm:$0xff] }
 0x72f   :  { %v3998_v62 = vpop.permute.xlu0 %3997 }
 0x730   :  { %v4002_v63 = vpop.permute.xlu1 %4001  ;;  %3864 = vmatpush1.msra.mxu0 %v3817_v26  ;;  %3940 = vmatprep.subr.mxu1 %v3820_v1 }
 0x731   :  { %v4016_v30 = vsel %vm1217_vm9, %v3998_v62, %v4002_v63  ;;  %3941 = vmatpush1.msra.mxu1 %v3819_v14  ;;  %5331 = vmatmul.mubr.msk.f32.vlgmr.msra.gmra.mxu0 %vm323_vm3, %v3825_v51 }
 0x732   :  { %v4024_v47 = vmul.f32 %v4016_v30, %v6599_v7  ;;  %5333 = vmatmul.mubr.msk.f32.vlgmr.msra.gmra.mxu1 %vm323_vm3, %v3825_v51  ;;  %3903 = vmatprep.mubr.f32.mxu0 %v7498_v52  ;;  %v4198_v51 = vld [vmem:[#allocation9 + $0x48] sm:$0xff] }
 0x733   :  { %v4006_v12 = vpop.permute.xlu0 %4005  ;;  %3980 = vmatprep.mubr.f32.mxu1 %v7498_v52 }
 0x734   :  { %v4014_v25 = vsel %vm1217_vm9, %v4002_v63, %v4006_v12  ;;  %v4010_v31 = vpop.permute.xlu1 %4009  ;;  %4063 = vmatprep.subr.mxu0 %v4024_v47 }
 0x735   :  { %v4012_v36 = vsel %vm1217_vm9, %v4006_v12, %v4010_v31  ;;  %v4018_v39 = vsel %vm1217_vm9, %v4010_v31, %v3998_v62  ;;  %5332 = vmatmul.mubr.msk.f32.gmra.mxu0 %vm323_vm3, %v3826_v17  ;;  %v4025_v42 = vmul.f32 %v4014_v25, %v6602_v22 }
 0x736   :  { %v4023_v10 = vmul.f32 %v4018_v39, %v6607_v33  ;;  %v4026_v13 = vmul.f32 %v4012_v36, %v6610_v37  ;;  %5334 = vmatmul.mubr.msk.f32.gmra.mxu1 %vm323_vm3, %v3826_v17  ;;  %4099 = vmatprep.mubr.f32.mxu0 %v7498_v52  ;;  %v4400_v39 = vld [vmem:[#allocation9 + $0x58] sm:$0xff] }
 0x737   :  { %v3996_v19 = vpop.permute.xlu0 %3995  ;;  %4176 = vmatprep.mubr.f32.mxu1 %v7498_v52 }
 0x738   :  { %v4000_v32 = vpop.permute.xlu1 %3999  ;;  %4064 = vmatpush1.msra.mxu0 %v4023_v10  ;;  %4140 = vmatprep.subr.mxu1 %v4026_v13 }
 0x739   :  { %v4015_v44 = vsel %vm1217_vm9, %v3996_v19, %v4000_v32  ;;  %4141 = vmatpush1.msra.mxu1 %v4025_v42 }
 0x73a   :  { %v4020_v20 = vmul.f32 %v4015_v44, %v6599_v7 }
 0x73b   :  { %v4004_v34 = vpop.permute.xlu0 %4003 }
 0x73c   :  { %v4013_v46 = vsel %vm1217_vm9, %v4000_v32, %v4004_v34  ;;  %v4008_v38 = vpop.permute.xlu1 %4007  ;;  %4065 = vmatprep.subr.mxu0 %v4020_v20 }
 0x73d   :  { %v4011_v29 = vsel %vm1217_vm9, %v4004_v34, %v4008_v38  ;;  %v4017_v57 = vsel %vm1217_vm9, %v4008_v38, %v3996_v19  ;;  %v4021_v7 = vmul.f32 %v4013_v46, %v6602_v22 }
 0x73e   :  { %v4019_v16 = vmul.f32 %v4017_v57, %v6607_v33  ;;  %v4022_v35 = vmul.f32 %v4011_v29, %v6610_v37  ;;  %v4028_v37 = vld [vmem:[#allocation9 + $0x38] sm:$0xff] }
 0x73f   :  { %v4370_v11 = vpop.permute.xlu0 %4369 }
 0x740   :  { %v4374_v40 = vpop.permute.xlu1 %4373  ;;  %4066 = vmatpush1.msra.mxu0 %v4019_v16  ;;  %4142 = vmatprep.subr.mxu1 %v4022_v35 }
 0x741   :  { %5335 = vmatmul.mubr.msk.f32.vlgmr.msra.gmra.mxu0 %vm323_vm3, %v4027_v2  ;;  %4143 = vmatpush1.msra.mxu1 %v4021_v7 }
 0x742   :  { %4233 = vmatprep.subr.mxu0 %v6882_v15  ;;  %5337 = vmatmul.mubr.msk.f32.vlgmr.msra.gmra.mxu1 %vm323_vm3, %v4027_v2 }
 0x743   :  { %v4378_v61 = vpop.permute.xlu0 %4377  ;;  %4234 = vmatpush1.msra.mxu0 %v6878_v28  ;;  %4310 = vmatprep.subr.mxu1 %v6896_v4  ;;  %v4388_v28 = vsel %vm1615_vm10, %v4370_v11, %v4374_v40 }
 0x744   :  { %v4386_v33 = vsel %vm1615_vm10, %v4374_v40, %v4378_v61  ;;  %4235 = vmatprep.subr.mxu0 %v6908_v59  ;;  %4311 = vmatpush1.msra.mxu1 %v6892_v0  ;;  %v4382_v41 = vpop.permute.xlu1 %4381  ;;  %v4197_v0 = vld [vmem:[#allocation9 + $0x40] sm:$0xff]  ;;  %v4395_v26 = vmul.f32 %v4388_v28, %v6623_v50 }
 0x745   :  { %v4396_v22 = vmul.f32 %v4386_v33, %v6626_v23  ;;  %v4390_v15 = vsel %vm1615_vm10, %v4382_v41, %v4370_v11  ;;  %4105 = vmatprep.mubr.f32.mxu0 %v7498_v52  ;;  %4236 = vmatpush1.msra.mxu0 %v6902_v60  ;;  %v4384_v49 = vsel %vm1615_vm10, %v4378_v61, %v4382_v41  ;;  %v4601_v40 = vld [vmem:[#allocation9 + $0x60] sm:$0xff] }
 0x746   :  { %v4398_v4 = vmul.f32 %v4390_v15, %v7466_v9  ;;  %4312 = vmatprep.subr.mxu1 %v6920_v27  ;;  %5336 = vmatmul.mubr.msk.f32.gmra.mxu0 %vm323_vm3, %v4028_v37  ;;  %v4397_v1 = vmul.f32 %v4384_v49, %v7465_v24 }
 0x747   :  { %v4368_v59 = vpop.permute.xlu0 %4367  ;;  %4182 = vmatprep.mubr.f32.mxu1 %v7498_v52  ;;  %4313 = vmatpush1.msra.mxu1 %v6914_v5 }
 0x748   :  { %5338 = vmatmul.mubr.msk.f32.gmra.mxu1 %vm323_vm3, %v4028_v37  ;;  %4435 = vmatprep.subr.mxu0 %v4396_v22  ;;  %v4372_v60 = vpop.permute.xlu1 %4371 }
 0x749   :  { %4269 = vmatprep.mubr.f32.mxu0 %v7498_v52  ;;  %4512 = vmatprep.subr.mxu1 %v4398_v4  ;;  %v4387_v27 = vsel %vm1615_vm10, %v4368_v59, %v4372_v60 }
 0x74a   :  { %5339 = vmatmul.mubr.msk.f32.vlgmr.msra.gmra.mxu0 %vm323_vm3, %v4197_v0  ;;  %4346 = vmatprep.mubr.f32.mxu1 %v7498_v52  ;;  %v4391_v30 = vmul.f32 %v4387_v27, %v6623_v50  ;;  %v4399_v50 = vld [vmem:[#allocation9 + $0x50] sm:$0xff] }
 0x74b   :  { %v4376_v5 = vpop.permute.xlu0 %4375  ;;  %4436 = vmatpush1.msra.mxu0 %v4395_v26  ;;  %4275 = vmatprep.mubr.f32.mxu0 %v7498_v52 }
 0x74c   :  { %v4385_v62 = vsel %vm1615_vm10, %v4372_v60, %v4376_v5  ;;  %5341 = vmatmul.mubr.msk.f32.vlgmr.msra.gmra.mxu1 %vm323_vm3, %v4197_v0  ;;  %v4380_v63 = vpop.permute.xlu1 %4379 }
 0x74d   :  { %v4392_v14 = vmul.f32 %v4385_v62, %v6626_v23  ;;  %4513 = vmatpush1.msra.mxu1 %v4397_v1  ;;  %v4383_v47 = vsel %vm1615_vm10, %v4376_v5, %v4380_v63  ;;  %v4389_v12 = vsel %vm1615_vm10, %v4380_v63, %v4368_v59  ;;  %4352 = vmatprep.mubr.f32.mxu1 %v7498_v52 }
 0x74e   :  { %v4393_v17 = vmul.f32 %v4383_v47, %v7465_v24  ;;  %v4394_v25 = vmul.f32 %v4389_v12, %v7466_v9  ;;  %5340 = vmatmul.mubr.msk.f32.gmra.mxu0 %vm323_vm3, %v4198_v51  ;;  %v4803_v47 = vld [vmem:[#allocation9 + $0x70] sm:$0xff] }
 0x74f   :  { %4437 = vmatprep.subr.mxu0 %v4392_v14  ;;  %v4572_v23 = vpop.permute.xlu0 %4571  ;;  %4471 = vmatprep.mubr.f32.mxu0 %v7498_v52 }
 0x750   :  { %4438 = vmatpush1.msra.mxu0 %v4391_v30  ;;  %5342 = vmatmul.mubr.msk.f32.gmra.mxu1 %vm323_vm3, %v4198_v51  ;;  %v4576_v31 = vpop.permute.xlu1 %4575 }
 0x751   :  { %4514 = vmatprep.subr.mxu1 %v4394_v25  ;;  %4548 = vmatprep.mubr.f32.mxu1 %v7498_v52  ;;  %v4590_v24 = vsel %vm1842_vm11, %v4572_v23, %v4576_v31 }
 0x752   :  { %4515 = vmatpush1.msra.mxu1 %v4393_v17  ;;  %5343 = vmatmul.mubr.msk.f32.vlgmr.msra.gmra.mxu0 %vm323_vm3, %v4399_v50  ;;  %v4597_v19 = vmul.f32 %v4590_v24, %v7468_v18 }
 0x753   :  { %v4580_v9 = vpop.permute.xlu0 %4579  ;;  %4477 = vmatprep.mubr.f32.mxu0 %v7498_v52 }
 0x754   :  { %v4588_v36 = vsel %vm1842_vm11, %v4576_v31, %v4580_v9  ;;  %5345 = vmatmul.mubr.msk.f32.vlgmr.msra.gmra.mxu1 %vm323_vm3, %v4399_v50  ;;  %v4584_v13 = vpop.permute.xlu1 %4583 }
 0x755   :  { %v4598_v10 = vmul.f32 %v4588_v36, %v7470_v3  ;;  %v4586_v42 = vsel %vm1842_vm11, %v4580_v9, %v4584_v13  ;;  %v4592_v32 = vsel %vm1842_vm11, %v4584_v13, %v4572_v23  ;;  %4554 = vmatprep.mubr.f32.mxu1 %v7498_v52 }
 0x756   :  { %v4599_v44 = vmul.f32 %v4586_v42, %v7473_v8  ;;  %v4600_v20 = vmul.f32 %v4592_v32, %v7476_v54  ;;  %5344 = vmatmul.mubr.msk.f32.gmra.mxu0 %vm323_vm3, %v4400_v39 }
 0x757   :  { %4637 = vmatprep.subr.mxu0 %v4598_v10  ;;  %v4570_v34 = vpop.permute.xlu0 %4569  ;;  %4673 = vmatprep.mubr.f32.mxu0 %v7498_v52 }
 0x758   :  { %4638 = vmatpush1.msra.mxu0 %v4597_v19  ;;  %5346 = vmatmul.mubr.msk.f32.gmra.mxu1 %vm323_vm3, %v4400_v39  ;;  %v4574_v46 = vpop.permute.xlu1 %4573 }
 0x759   :  { %4714 = vmatprep.subr.mxu1 %v4600_v20  ;;  %4750 = vmatprep.mubr.f32.mxu1 %v7498_v52  ;;  %v4589_v38 = vsel %vm1842_vm11, %v4570_v34, %v4574_v46 }
 0x75a   :  { %4715 = vmatpush1.msra.mxu1 %v4599_v44  ;;  %v4593_v11 = vmul.f32 %v4589_v38, %v7468_v18  ;;  %v4602_v18 = vld [vmem:[#allocation9 + $0x68] sm:$0xff] }
 0x75b   :  { %v4578_v29 = vpop.permute.xlu0 %4577 }
 0x75c   :  { %v4587_v57 = vsel %vm1842_vm11, %v4574_v46, %v4578_v29  ;;  %v4582_v35 = vpop.permute.xlu1 %4581 }
 0x75d   :  { %v4594_v16 = vmul.f32 %v4587_v57, %v7470_v3  ;;  %v4585_v2 = vsel %vm1842_vm11, %v4578_v29, %v4582_v35  ;;  %v4591_v7 = vsel %vm1842_vm11, %v4582_v35, %v4570_v34  ;;  %v5005_v35 = vld [vmem:[#allocation9 + $0x80] sm:$0xff] }
 0x75e   :  { %v4595_v61 = vmul.f32 %v4585_v2, %v7473_v8  ;;  %v4596_v33 = vmul.f32 %v4591_v7, %v7476_v54  ;;  %v7503_v2 = vld [vmem:[#allocation28_spill] sm:$0xff] }
 0x75f   :  { %4639 = vmatprep.subr.mxu0 %v4594_v16  ;;  %v4774_v37 = vpop.permute.xlu0 %4773 }
 0x760   :  { %4640 = vmatpush1.msra.mxu0 %v4593_v11  ;;  %v4778_v22 = vpop.permute.xlu1 %4777  ;;  %4716 = vmatprep.subr.mxu1 %v4596_v33 }
 0x761   :  { %5347 = vmatmul.mubr.msk.f32.vlgmr.msra.gmra.mxu0 %vm323_vm3, %v4601_v40  ;;  %4717 = vmatpush1.msra.mxu1 %v4595_v61  ;;  %v4792_v3 = vsel %vm2069_vm12, %v4774_v37, %v4778_v22 }
 0x762   :  { %4679 = vmatprep.mubr.f32.mxu0 %v7498_v52  ;;  %5349 = vmatmul.mubr.msk.f32.vlgmr.msra.gmra.mxu1 %vm323_vm3, %v4601_v40  ;;  %v4799_v28 = vmul.f32 %v4792_v3, %v7472_v45  ;;  %v7504_v40 = vld [vmem:[#allocation30_spill] sm:$0xff] }
 0x763   :  { %v4782_v41 = vpop.permute.xlu0 %4781  ;;  %4756 = vmatprep.mubr.f32.mxu1 %v7498_v52 }
 0x764   :  { %v4790_v8 = vsel %vm2069_vm12, %v4778_v22, %v4782_v41  ;;  %v4786_v15 = vpop.permute.xlu1 %4785 }
 0x765   :  { %v4800_v54 = vmul.f32 %v4790_v8, %v7474_v48  ;;  %5348 = vmatmul.mubr.msk.f32.gmra.mxu0 %vm323_vm3, %v4602_v18  ;;  %v4788_v4 = vsel %vm2069_vm12, %v4782_v41, %v4786_v15  ;;  %v4794_v59 = vsel %vm2069_vm12, %v4786_v15, %v4774_v37  ;;  %v7505_v37 = vld [vmem:[#allocation31_spill] sm:$0xff]  ;;  %v7507_v41 = vld [vmem:[#allocation32_spill] sm:$0xff]  ;;  %v7508_v8 = vld [vmem:[#allocation34_spill] sm:$0xff] }
 0x766   :  { %4875 = vmatprep.mubr.f32.mxu0 %v7498_v52  ;;  %v4801_v0 = vmul.f32 %v4788_v4, %v7477_v58  ;;  %v4802_v49 = vmul.f32 %v4794_v59, %v7478_v56  ;;  %5350 = vmatmul.mubr.msk.f32.gmra.mxu1 %vm323_vm3, %v4602_v18  ;;  %v7506_v18 = vld [vmem:[#allocation33_spill] sm:$0xff] }
 0x767   :  { %4839 = vmatprep.subr.mxu0 %v4800_v54  ;;  %v4772_v60 = vpop.permute.xlu0 %4771  ;;  %4952 = vmatprep.mubr.f32.mxu1 %v7498_v52 }
 0x768   :  { %4840 = vmatpush1.msra.mxu0 %v4799_v28  ;;  %v4776_v26 = vpop.permute.xlu1 %4775  ;;  %4916 = vmatprep.subr.mxu1 %v4802_v49 }
 0x769   :  { %4917 = vmatpush1.msra.mxu1 %v4801_v0  ;;  %v4791_v27 = vsel %vm2069_vm12, %v4772_v60, %v4776_v26 }
 0x76a   :  { %v4795_v14 = vmul.f32 %v4791_v27, %v7472_v45  ;;  %v4804_v45 = vld [vmem:[#allocation9 + $0x78] sm:$0xff] }
 0x76b   :  { %v4780_v5 = vpop.permute.xlu0 %4779 }
 0x76c   :  { %v4789_v1 = vsel %vm2069_vm12, %v4776_v26, %v4780_v5  ;;  %v4784_v51 = vpop.permute.xlu1 %4783 }
 0x76d   :  { %v4796_v62 = vmul.f32 %v4789_v1, %v7474_v48  ;;  %v4787_v63 = vsel %vm2069_vm12, %v4780_v5, %v4784_v51  ;;  %v4793_v30 = vsel %vm2069_vm12, %v4784_v51, %v4772_v60 }
 0x76e   :  { %v4797_v12 = vmul.f32 %v4787_v63, %v7477_v58  ;;  %v4798_v17 = vmul.f32 %v4793_v30, %v7478_v56 }
 0x76f   :  { %4841 = vmatprep.subr.mxu0 %v4796_v62  ;;  %v4976_v25 = vpop.permute.xlu0 %4975 }
 0x770   :  { %4842 = vmatpush1.msra.mxu0 %v4795_v14  ;;  %v4980_v23 = vpop.permute.xlu1 %4979  ;;  %4918 = vmatprep.subr.mxu1 %v4798_v17 }
 0x771   :  { %5351 = vmatmul.mubr.msk.f32.vlgmr.msra.gmra.mxu0 %vm323_vm3, %v4803_v47  ;;  %4919 = vmatpush1.msra.mxu1 %v4797_v12  ;;  %v4994_v48 = vsel %vm2296_vm13, %v4976_v25, %v4980_v23 }
 0x772   :  { %4881 = vmatprep.mubr.f32.mxu0 %v7498_v52  ;;  %5353 = vmatmul.mubr.msk.f32.vlgmr.msra.gmra.mxu1 %vm323_vm3, %v4803_v47  ;;  %v5001_v24 = vmul.f32 %v4994_v48, %v6719_v43 }
 0x773   :  { %v4984_v50 = vpop.permute.xlu0 %4983  ;;  %4958 = vmatprep.mubr.f32.mxu1 %v7498_v52 }
 0x774   :  { %v4992_v58 = vsel %vm2296_vm13, %v4980_v23, %v4984_v50  ;;  %v4988_v31 = vpop.permute.xlu1 %4987 }
 0x775   :  { %v5002_v56 = vmul.f32 %v4992_v58, %v6725_v6  ;;  %5352 = vmatmul.mubr.msk.f32.gmra.mxu0 %vm323_vm3, %v4804_v45  ;;  %v4990_v9 = vsel %vm2296_vm13, %v4984_v50, %v4988_v31  ;;  %v4996_v36 = vsel %vm2296_vm13, %v4988_v31, %v4976_v25 }
 0x776   :  { %5077 = vmatprep.mubr.f32.mxu0 %v7498_v52  ;;  %v5003_v39 = vmul.f32 %v4990_v9, %v6803_v21  ;;  %v5004_v10 = vmul.f32 %v4996_v36, %v6818_v55  ;;  %5354 = vmatmul.mubr.msk.f32.gmra.mxu1 %vm323_vm3, %v4804_v45 }
 0x777   :  { %5041 = vmatprep.subr.mxu0 %v5002_v56  ;;  %v4974_v13 = vpop.permute.xlu0 %4973  ;;  %5154 = vmatprep.mubr.f32.mxu1 %v7498_v52 }
 0x778   :  { %5042 = vmatpush1.msra.mxu0 %v5001_v24  ;;  %v4978_v19 = vpop.permute.xlu1 %4977  ;;  %5118 = vmatprep.subr.mxu1 %v5004_v10 }
 0x779   :  { %5119 = vmatpush1.msra.mxu1 %v5003_v39  ;;  %v4993_v42 = vsel %vm2296_vm13, %v4974_v13, %v4978_v19 }
 0x77a   :  { %v4997_v29 = vmul.f32 %v4993_v42, %v6719_v43  ;;  %v7501_v43 = vld [vmem:[#allocation27_spill] sm:$0xff] }
 0x77b   :  { %v4982_v32 = vpop.permute.xlu0 %4981 }
 0x77c   :  { %v4991_v44 = vsel %vm2296_vm13, %v4978_v19, %v4982_v32  ;;  %v4986_v20 = vpop.permute.xlu1 %4985 }
 0x77d   :  { %v4998_v34 = vmul.f32 %v4991_v44, %v6725_v6  ;;  %v4989_v46 = vsel %vm2296_vm13, %v4982_v32, %v4986_v20  ;;  %v4995_v38 = vsel %vm2296_vm13, %v4986_v20, %v4974_v13  ;;  %v5006_v6 = vld [vmem:[#allocation9 + $0x88] sm:$0xff] }
 0x77e   :  { %v4999_v57 = vmul.f32 %v4989_v46, %v6803_v21  ;;  %v5000_v16 = vmul.f32 %v4995_v38, %v6818_v55  ;;  %v7502_v55 = vld [vmem:[#allocation29_spill] sm:$0xff] }
 0x77f   :  { %5043 = vmatprep.subr.mxu0 %v4998_v34 }
 0x780   :  { %5044 = vmatpush1.msra.mxu0 %v4997_v29  ;;  %5120 = vmatprep.subr.mxu1 %v5000_v16 }
 0x781   :  { %5355 = vmatmul.mubr.msk.f32.vlgmr.msra.gmra.mxu0 %vm323_vm3, %v5005_v35  ;;  %5121 = vmatpush1.msra.mxu1 %v4999_v57 }
 0x782   :  { %5357 = vmatmul.mubr.msk.f32.vlgmr.msra.gmra.mxu1 %vm323_vm3, %v5005_v35  ;;  %5083 = vmatprep.mubr.f32.mxu0 %v7498_v52 }
 0x783   :  { %5160 = vmatprep.mubr.f32.mxu1 %v7498_v52 }
 0x785   :  { %5356 = vmatmul.mubr.msk.f32.gmra.mxu0 %vm323_vm3, %v5006_v6 }
 0x786   :  { %5358 = vmatmul.mubr.msk.f32.gmra.mxu1 %vm323_vm3, %v5006_v6 }
 0x788   :  { %v2512_v53 = vpop.permute.xlu0 %2511 }
 0x789   :  { %v2519_v21 = vadd.f32 %v2512_v53, %v7501_v43  ;;  %v2520_v11 = vadd.f32 %v2512_v53, %v7502_v55  ;;  %v2521_v7 = vadd.f32 %v2512_v53, %v7503_v2  ;;  %v2522_v61 = vadd.f32 %v2512_v53, %v7504_v40  ;;  %v2517_v33 = vpop.permute.xlu1 %2516 }
 0x78a   :  { %v2523_v22 = vadd.f32 %v2517_v33, %v7505_v37  ;;  %v2524_v3 = vadd.f32 %v2517_v33, %v7506_v18  ;;  %v2525_v52 = vadd.f32 %v2517_v33, %v7507_v41  ;;  %v2526_v54 = vadd.f32 %v2517_v33, %v7508_v8 }
 0x78b   :  { %v2527_v15 = vmax.f32 %v2519_v21, 0.0  ;;  %v2528_v28 = vmax.f32 %v2520_v11, 0.0  ;;  %v2529_v4 = vmax.f32 %v2521_v7, 0.0  ;;  %v2530_v59 = vmax.f32 %v2522_v61, 0.0 }
 0x78c   :  { %v2531_v0 = vmax.f32 %v2523_v22, 0.0  ;;  %v2532_v49 = vmax.f32 %v2524_v3, 0.0  ;;  %v2533_v60 = vmax.f32 %v2525_v52, 0.0  ;;  %v2534_v26 = vmax.f32 %v2526_v54, 0.0 }
 0x78d   :  { %2535 = vst [vmem:[#allocation10] sm:$0xff] %v2527_v15  ;;  %2536 = vst [vmem:[#allocation10 + $0x8] sm:$0xff] %v2528_v28 }
 0x78e   :  { %2537 = vst [vmem:[#allocation10 + $0x10] sm:$0xff] %v2529_v4  ;;  %2538 = vst [vmem:[#allocation10 + $0x18] sm:$0xff] %v2530_v59 }
 0x78f   :  { %2539 = vst [vmem:[#allocation10 + $0x20] sm:$0xff] %v2531_v0  ;;  %2540 = vst [vmem:[#allocation10 + $0x28] sm:$0xff] %v2532_v49 }
 0x790   :  { %2541 = vst [vmem:[#allocation10 + $0x30] sm:$0xff] %v2533_v60  ;;  %2542 = vst [vmem:[#allocation10 + $0x38] sm:$0xff] %v2534_v26 }
 0x7d1   :  { %v7322_v27 = vpop.f32.mrf.mxu0 }
 0x7d2   :  { %v7324_v5 = vpop.f32.mrf.mxu1 }
 0x7d3   :  { %5512 = shalt.err (!%p5509_p10)
}
 0x7d4   :  { %s5572_s28 = smov 512   ;;  %s5573_s2 = smov 32   ;;  %v3547_v1 = vpop.f32.mrf.mxu0  ;;  %v3624_v62 = vpop.f32.mrf.mxu1 }
 0x7d5   :  { %5222 = dma.vmem_to_hbm [thread:$0]  %s5217_s26, 1024, %s7375_s14, [#allocation4], %s5572_s28, %s5572_s28, %s5573_s2  }
 0x7d6   :  { %v3551_v51 = vpop.f32.mrf.mxu0  ;;  %v3628_v14 = vpop.f32.mrf.mxu1  ;;  %s5574_s14 = smov [#allocation11]  }
 0x7d7   :  { %s5228_s17 = sshll.u32 %s5574_s14, 4  ;;  %s5229_s17 = int_to_ptr.vmem [resolvable:$true] %s5228_s17 }
 0x7d8   :  { %v3553_v63 = vpop.f32.mrf.mxu0  ;;  %v7332_v30 = vpop.f32.mrf.mxu1  ;;  %s5521_s1 = scalar_lea.vmem %s5229_s17, 1024  ;;  %p5526_p12 = scmp.lt.s32.totalorder %s5229_s17, %s5229_s17 }
 0x7d9   :  { %7509 = vst [vmem:[#allocation41_spill] sm:$0xff] %v7332_v30  ;;  %p5522_p11 = scmp.ne.s32.totalorder %s5229_s17, %s5521_s1  ;;  %p5527_p13 = scmp.lt.s32.totalorder %s5521_s1, %s5521_s1 }
 0x7db   :  { %p5528_p0 = por %p5527_p13, %p5526_p12 }
 0x7dd   :  { %p5529_p1 = pnand %p5528_p0, %p5522_p11 }
 0x7e1   :  { %v3705_v47 = vpop.f32.mrf.mxu0 }
 0x7e2   :  { %v3782_v12 = vpop.f32.mrf.mxu1  ;;  %v3706_v52 = vadd.f32 %v3705_v47, %v7322_v27  ;;  %v7516_v47 = vld [vmem:[#allocation41_spill] sm:$0xff] }
 0x7e3   :  { %v3707_v17 = vpop.f32.mrf.mxu0  ;;  %v3783_v54 = vadd.f32 %v3782_v12, %v7324_v5 }
 0x7e4   :  { %v3784_v25 = vpop.f32.mrf.mxu1  ;;  %v3708_v28 = vadd.f32 %v3707_v17, %v3547_v1 }
 0x7e5   :  { %v3711_v23 = vpop.f32.mrf.mxu0  ;;  %v3785_v49 = vadd.f32 %v3784_v25, %v3624_v62 }
 0x7e6   :  { %v3788_v45 = vpop.f32.mrf.mxu1  ;;  %v3712_v4 = vadd.f32 %v3711_v23, %v3551_v51 }
 0x7e7   :  { %v3713_v48 = vpop.f32.mrf.mxu0 }
 0x7e8   :  { %v3790_v50 = vpop.f32.mrf.mxu1 }
 0x7e9   :  { %v3791_v5 = vadd.f32 %v3790_v50, %v7516_v47 }
 0x7f1   :  { %v3899_v58 = vpop.f32.mrf.mxu0 }
 0x7f2   :  { %v3976_v56 = vpop.f32.mrf.mxu1  ;;  %v3987_v59 = vadd.f32 %v3899_v58, %v3706_v52 }
 0x7f3   :  { %v3901_v31 = vpop.f32.mrf.mxu0 }
 0x7f4   :  { %v3978_v24 = vpop.f32.mrf.mxu1 }
 0x7f5   :  { %v3905_v9 = vpop.f32.mrf.mxu0  ;;  %v3990_v12 = vadd.f32 %v3978_v24, %v3785_v49 }
 0x7f6   :  { %v3982_v36 = vpop.f32.mrf.mxu1  ;;  %v3991_v30 = vadd.f32 %v3905_v9, %v3712_v4 }
 0x7f7   :  { %v3907_v39 = vpop.f32.mrf.mxu0 }
 0x7f8   :  { %v3984_v10 = vpop.f32.mrf.mxu1 }
 0x7f9   :  { %v3994_v62 = vadd.f32 %v3984_v10, %v3791_v5 }
 0x801   :  { %v4101_v13 = vpop.f32.mrf.mxu0 }
 0x802   :  { %v4178_v19 = vpop.f32.mrf.mxu1  ;;  %v4189_v27 = vadd.f32 %v4101_v13, %v3987_v59 }
 0x803   :  { %v4103_v42 = vpop.f32.mrf.mxu0 }
 0x804   :  { %v4180_v32 = vpop.f32.mrf.mxu1 }
 0x805   :  { %v4192_v25 = vadd.f32 %v4180_v32, %v3990_v12  ;;  %v5185_v12 = vpop.permute.xlu0 %5184 }
 0x806   :  { %v4107_v44 = vpop.f32.mrf.mxu0 }
 0x807   :  { %v4193_v52 = vadd.f32 %v4107_v44, %v3991_v30 }
 0x808   :  { %v4184_v20 = vpop.f32.mrf.mxu1  ;;  %v4109_v34 = vpop.f32.mrf.mxu0 }
 0x80a   :  { %v7334_v46 = vpop.f32.mrf.mxu1  ;;  %v4271_v38 = vpop.f32.mrf.mxu0 }
 0x80b   :  { %7510 = vst [vmem:[#allocation40_spill] sm:$0xff] %v7334_v46  ;;  %v3988_v46 = vadd.f32 %v3901_v31, %v3708_v28 }
 0x80c   :  { %v4348_v29 = vpop.f32.mrf.mxu1  ;;  %v4273_v57 = vpop.f32.mrf.mxu0 }
 0x80d   :  { %v4190_v58 = vadd.f32 %v4103_v42, %v3988_v46 }
 0x80e   :  { %v4350_v16 = vpop.f32.mrf.mxu1  ;;  %v4277_v35 = vpop.f32.mrf.mxu0 }
 0x80f   :  { %v4362_v9 = vadd.f32 %v4350_v16, %v4192_v25  ;;  %v4363_v24 = vadd.f32 %v4277_v35, %v4193_v52 }
 0x810   :  { %v4354_v6 = vpop.f32.mrf.mxu1  ;;  %v4279_v53 = vpop.f32.mrf.mxu0 }
 0x812   :  { %v7336_v43 = vpop.f32.mrf.mxu1  ;;  %v4473_v21 = vpop.f32.mrf.mxu0 }
 0x813   :  { %7511 = vst [vmem:[#allocation42_spill] sm:$0xff] %v7336_v43  ;;  %v3714_v43 = vadd.f32 %v3713_v48, %v3553_v63 }
 0x814   :  { %v4550_v55 = vpop.f32.mrf.mxu1  ;;  %v4475_v11 = vpop.f32.mrf.mxu0 }
 0x815   :  { %v3992_v51 = vadd.f32 %v3907_v39, %v3714_v43 }
 0x816   :  { %v4552_v2 = vpop.f32.mrf.mxu1  ;;  %v4479_v7 = vpop.f32.mrf.mxu0 }
 0x817   :  { %v4194_v50 = vadd.f32 %v4109_v34, %v3992_v51  ;;  %v4564_v42 = vadd.f32 %v4552_v2, %v4362_v9  ;;  %v4565_v32 = vadd.f32 %v4479_v7, %v4363_v24  ;;  %v5180_v2 = vpop.permute.xlu1 %5179 }
 0x818   :  { %v4556_v40 = vpop.f32.mrf.mxu1  ;;  %v7338_v61 = vpop.f32.mrf.mxu0 }
 0x819   :  { %7512 = vst [vmem:[#allocation43_spill] sm:$0xff] %v7338_v61  ;;  %v3989_v61 = vadd.f32 %v3976_v56, %v3783_v54  ;;  %v4360_v56 = vadd.f32 %v4273_v57, %v4190_v58  ;;  %v4364_v10 = vadd.f32 %v4279_v53, %v4194_v50 }
 0x81a   :  { %v7340_v33 = vpop.f32.mrf.mxu1  ;;  %v7518_v57 = vld [vmem:[#allocation42_spill] sm:$0xff] }
 0x81b   :  { %7513 = vst [vmem:[#allocation44_spill] sm:$0xff] %v7340_v33  ;;  %v3789_v33 = vadd.f32 %v3788_v45, %v3628_v14  ;;  %v4191_v23 = vadd.f32 %v4178_v19, %v3989_v61  ;;  %v4562_v54 = vadd.f32 %v4475_v11, %v4360_v56 }
 0x81d   :  { %v3993_v17 = vadd.f32 %v3982_v36, %v3789_v33  ;;  %v4361_v14 = vadd.f32 %v4348_v29, %v4191_v23  ;;  %v7517_v36 = vld [vmem:[#allocation40_spill] sm:$0xff] }
 0x81e   :  { %v4196_v19 = vadd.f32 %v7517_v36, %v3994_v62 }
 0x81f   :  { %v4195_v31 = vadd.f32 %v4184_v20, %v3993_v17  ;;  %v4563_v13 = vadd.f32 %v4550_v55, %v4361_v14 }
 0x820   :  { %v4366_v43 = vadd.f32 %v7518_v57, %v4196_v19  ;;  %v7519_v35 = vld [vmem:[#allocation43_spill] sm:$0xff] }
 0x821   :  { %v4675_v37 = vpop.f32.mrf.mxu0  ;;  %v4365_v39 = vadd.f32 %v4354_v6, %v4195_v31  ;;  %v4566_v55 = vadd.f32 %v7519_v35, %v4364_v10 }
 0x822   :  { %v4752_v22 = vpop.f32.mrf.mxu1 }
 0x823   :  { %v4677_v18 = vpop.f32.mrf.mxu0  ;;  %v4765_v30 = vadd.f32 %v4752_v22, %v4563_v13  ;;  %v4567_v20 = vadd.f32 %v4556_v40, %v4365_v39 }
 0x824   :  { %v4754_v3 = vpop.f32.mrf.mxu1  ;;  %v4764_v46 = vadd.f32 %v4677_v18, %v4562_v54 }
 0x825   :  { %v4681_v41 = vpop.f32.mrf.mxu0  ;;  %v4766_v16 = vadd.f32 %v4754_v3, %v4564_v42 }
 0x826   :  { %v4758_v8 = vpop.f32.mrf.mxu1  ;;  %v4767_v11 = vadd.f32 %v4681_v41, %v4565_v32 }
 0x827   :  { %v7344_v15 = vpop.f32.mrf.mxu0  ;;  %v4769_v53 = vadd.f32 %v4758_v8, %v4567_v20 }
 0x828   :  { %7514 = vst [vmem:[#allocation50_spill] sm:$0xff] %v7344_v15  ;;  %v7346_v0 = vpop.f32.mrf.mxu1 }
 0x829   :  { %7515 = vst [vmem:[#allocation45_spill] sm:$0xff] %v7346_v0  ;;  %v4359_v0 = vadd.f32 %v4271_v38, %v4189_v27 }
 0x82b   :  { %v4561_v63 = vadd.f32 %v4473_v21, %v4359_v0 }
 0x82d   :  { %v4763_v28 = vadd.f32 %v4675_v37, %v4561_v63  ;;  %v7520_v37 = vld [vmem:[#allocation44_spill] sm:$0xff] }
 0x82e   :  { %v4568_v22 = vadd.f32 %v7520_v37, %v4366_v43 }
 0x82f   :  { %v7521_v59 = vld [vmem:[#allocation50_spill] sm:$0xff] }
 0x830   :  { %v4768_v0 = vadd.f32 %v7521_v59, %v4566_v55 }
 0x831   :  { %v4877_v60 = vpop.f32.mrf.mxu0 }
 0x832   :  { %v4954_v26 = vpop.f32.mrf.mxu1  ;;  %v4965_v38 = vadd.f32 %v4877_v60, %v4763_v28 }
 0x833   :  { %v4879_v15 = vpop.f32.mrf.mxu0  ;;  %v4967_v21 = vadd.f32 %v4954_v26, %v4765_v30  ;;  %v7522_v26 = vld [vmem:[#allocation45_spill] sm:$0xff] }
 0x834   :  { %v4956_v1 = vpop.f32.mrf.mxu1  ;;  %v4966_v61 = vadd.f32 %v4879_v15, %v4764_v46  ;;  %v4770_v27 = vadd.f32 %v7522_v26, %v4568_v22 }
 0x835   :  { %v4883_v45 = vpop.f32.mrf.mxu0  ;;  %v4968_v7 = vadd.f32 %v4956_v1, %v4766_v16 }
 0x836   :  { %v4960_v48 = vpop.f32.mrf.mxu1  ;;  %v4969_v49 = vadd.f32 %v4883_v45, %v4767_v11 }
 0x837   :  { %v4885_v44 = vpop.f32.mrf.mxu0  ;;  %v4971_v47 = vadd.f32 %v4960_v48, %v4769_v53 }
 0x838   :  { %v4962_v29 = vpop.f32.mrf.mxu1  ;;  %v4970_v17 = vadd.f32 %v4885_v44, %v4768_v0 }
 0x839   :  { %v4972_v58 = vadd.f32 %v4962_v29, %v4770_v27 }
 0x841   :  { %v5079_v34 = vpop.f32.mrf.mxu0 }
 0x842   :  { %v5167_v33 = vadd.f32 %v5079_v34, %v4965_v38  ;;  %v5156_v6 = vpop.f32.mrf.mxu1 }
 0x843   :  { %v5081_v18 = vpop.f32.mrf.mxu0  ;;  %v5169_v4 = vadd.f32 %v5156_v6, %v4967_v21 }
 0x844   :  { %v5187_v40 = vadd.f32 %v5180_v2, %v5167_v33  ;;  %v5168_v3 = vadd.f32 %v5081_v18, %v4966_v61  ;;  %v5158_v60 = vpop.f32.mrf.mxu1 }
 0x845   :  { %v5189_v41 = vadd.f32 %v5180_v2, %v5169_v4  ;;  %v5085_v15 = vpop.f32.mrf.mxu0  ;;  %v5170_v5 = vadd.f32 %v5158_v60, %v4968_v7 }
 0x846   :  { %v5195_v23 = vmax.f32 %v5187_v40, 0.0  ;;  %v5188_v51 = vadd.f32 %v5180_v2, %v5168_v3  ;;  %v5171_v8 = vadd.f32 %v5085_v15, %v4969_v49  ;;  %v5162_v1 = vpop.f32.mrf.mxu1 }
 0x847   :  { %v5197_v52 = vmax.f32 %v5189_v41, 0.0  ;;  %v5190_v62 = vadd.f32 %v5180_v2, %v5170_v5  ;;  %v5087_v25 = vpop.f32.mrf.mxu0  ;;  %v5173_v14 = vadd.f32 %v5162_v1, %v4971_v47 }
 0x848   :  { %5203 = vst [vmem:[#allocation11] sm:$0xff] %v5195_v23  ;;  %v5196_v45 = vmax.f32 %v5188_v51, 0.0  ;;  %v5172_v56 = vadd.f32 %v5087_v25, %v4970_v17  ;;  %v5191_v63 = vadd.f32 %v5185_v12, %v5171_v8  ;;  %v5164_v31 = vpop.f32.mrf.mxu1 }
 0x849   :  { %5205 = vst [vmem:[#allocation11 + $0x10] sm:$0xff] %v5197_v52  ;;  %v5198_v48 = vmax.f32 %v5190_v62, 0.0  ;;  %v5193_v9 = vadd.f32 %v5185_v12, %v5173_v14  ;;  %v5174_v13 = vadd.f32 %v5164_v31, %v4972_v58 }
 0x84a   :  { %5204 = vst [vmem:[#allocation11 + $0x8] sm:$0xff] %v5196_v45  ;;  %v5192_v50 = vadd.f32 %v5185_v12, %v5172_v56  ;;  %v5199_v24 = vmax.f32 %v5191_v63, 0.0 }
 0x84b   :  { %5206 = vst [vmem:[#allocation11 + $0x18] sm:$0xff] %v5198_v48  ;;  %v5201_v54 = vmax.f32 %v5193_v9, 0.0  ;;  %v5194_v28 = vadd.f32 %v5185_v12, %v5174_v13 }
 0x84c   :  { %v5200_v36 = vmax.f32 %v5192_v50, 0.0  ;;  %5207 = vst [vmem:[#allocation11 + $0x20] sm:$0xff] %v5199_v24 }
 0x84d   :  { %5209 = vst [vmem:[#allocation11 + $0x30] sm:$0xff] %v5201_v54  ;;  %v5202_v19 = vmax.f32 %v5194_v28, 0.0 }
 0x84e   :  { %5208 = vst [vmem:[#allocation11 + $0x28] sm:$0xff] %v5200_v36 }
 0x84f   :  { %5210 = vst [vmem:[#allocation11 + $0x38] sm:$0xff] %v5202_v19 }
 0x850   :  { %5532 = shalt.err (!%p5529_p1)
}
 0x851   :  { %5234 = dma.vmem_to_hbm [thread:$0]  %s5229_s17, 1024, %s7376_s15, [#allocation12], %s5572_s28, %s5572_s28, %s5573_s2  }
 0x852   :  { %5549 = dma.done.wait [#allocation4], 1024  }
 0x853   :  { %5550 = vsyncadd [#allocation4], 4294966272 }
 0x854   :  { %5551 = dma.done.wait [#allocation12], 1024  }
 0x855   :  { %5552 = vsyncadd [#allocation12], 4294966272 }
 0x856   :  { %5241 = vsyncpa [#allocation3], 1 }
 0x857   :  { %5242 = vsyncpa [#allocation7], 1 }
 0x858   :  { %5243 = vsyncpa [#allocation4], 1 }
 0x859   :  { %5244 = vsyncpa [#allocation12], 1 }
 0x85a   :  { %5245 = vsyncpa [#allocation5], 1 }

</bundles_post_ra>
